<compile_context>
chip_gen: v7x
topology: tpu7x:2x2x1
jax: 0.10.0
libtpu: 0.0.40
codegen_flags: <defaults>
</compile_context>

<pallas_src>
import functools
import math

import jax
import jax.numpy as jnp
from jax.experimental import pallas as pl
from jax.experimental.pallas import tpu as pltpu

EPS = 1e-5  # nn.LayerNorm default eps


# ---------------------------------------------------------------------------
# small utilities
# ---------------------------------------------------------------------------
def _round_up(x, m):
    return ((x + m - 1) // m) * m


def _vmem_limit_bytes():
    """Generation-aware scoped-VMEM budget: ~3/4 of physical, capped at 100 MiB
    (=> ~48 MiB on v7x's 64 MiB/TC, ~96 MiB on v5e/v6e's 128 MiB)."""
    try:
        cap = int(pltpu.get_tpu_info().vmem_capacity_bytes)
    except Exception:
        cap = 64 * 1024 * 1024  # conservative fallback (v7x per-TC size)
    return int(min(100 * 1024 * 1024, (cap * 3) // 4))


def _pick_batch_tile(B, N):
    """Target >=128 MXU rows per grid step for the token-wise matmuls; for real
    configs (N >= 128) this returns 1 so the batch axis keeps many parallel steps."""
    bt = max(1, min(B, -(-128 // max(N, 1))))
    while B % bt:
        bt -= 1
    return bt


# ---------------------------------------------------------------------------
# math helpers (kernel-side)
# ---------------------------------------------------------------------------
def _layernorm(x, w, b):
    mu = jnp.mean(x, axis=-1, keepdims=True)
    var = jnp.mean(jnp.square(x - mu), axis=-1, keepdims=True)
    return (x - mu) * jax.lax.rsqrt(var + EPS) * w + b


def _erf_kernel(x):
    # Abramowitz & Stegun 7.1.26 polynomial approximation of erf (kernel-only:
    # uses the EUP approximate reciprocal for the rational term).
    a1, a2, a3, a4, a5 = 0.254829592, -0.284496736, 1.421413741, -1.453152027, 1.061405429
    p = 0.3275911
    s = jnp.where(x >= 0.0, 1.0, -1.0)
    ax = jnp.abs(x)
    t = pl.reciprocal(1.0 + p * ax, approx=True)
    poly = ((((a5 * t + a4) * t + a3) * t + a2) * t + a1) * t
    return s * (1.0 - poly * jnp.exp(-ax * ax))


def _gelu_kernel(x):
    # exact-erf GELU (nn.GELU default). TODO(synk): switch to tanh-GELU (EUP) if
    # profiling on v5e shows the VALU slot binding in the MLP epilogue.
    return 0.5 * x * (1.0 + _erf_kernel(x * (1.0 / math.sqrt(2.0))))


def _split_heads(t, BT, N, H, hd, use_einshape):
    """(BT*N, H*hd) -> (BT*H, N, hd)."""
    if use_einshape:
        t4 = t.reshape(BT, N, H, hd)
        return pltpu.einshape("bnhd->bhnd", t4).reshape(BT * H, N, hd)
    # fallback: explicit lane slices + stack (previously-validated lowering path)
    parts = [t[b * N:(b + 1) * N, h * hd:(h + 1) * hd]
             for b in range(BT) for h in range(H)]
    return jnp.stack(parts, axis=0)


def _merge_heads(o3, BT, N, H, hd, use_einshape):
    """(BT*H, N, hd) -> (BT*N, H*hd), matching torch's concat-of-heads layout."""
    if use_einshape:
        o4 = pltpu.einshape("bhnd->bnhd", o3.reshape(BT, H, N, hd))
        return o4.reshape(BT * N, H * hd)
    rows = [jnp.concatenate([o3[b * H + h] for h in range(H)], axis=-1)
            for b in range(BT)]
    return jnp.concatenate(rows, axis=0)


# ---------------------------------------------------------------------------
# Pallas kernels
# ---------------------------------------------------------------------------
def _decoder_blocks_kernel(x_ref, ln1w, ln1b, wqkv, projw, projb,
                           ln2w, ln2b, fc1w, fc1b, fc2w, fc2b,
                           o_ref, xres, *, num_heads, use_einshape):
    """One grid step = (one batch tile, one transformer layer).
    The residual stream lives in the VMEM scratch `xres` across the layer axis."""
    layer = pl.program_id(1)

    @pl.when(layer == 0)
    def _():
        xres[...] = x_ref[...]

    BT, N, D = xres.shape
    H = num_heads
    hd = D // H
    R = BT * N

    x2 = xres[...].reshape(R, D)                        # (R, D) f32 residual stream

    # ---- Multi-head self-attention (pre-LN) ----
    xn = _layernorm(x2, ln1w[...], ln1b[...])
    # fused QKV: ONE full-width bf16 MXU matmul, f32 accumulation
    # (attention scale pre-folded into the Q columns of wqkv host-side)
    qkv = jnp.dot(xn.astype(jnp.bfloat16), wqkv[...],
                  preferred_element_type=jnp.float32)   # (R, 3D) f32
    qkv = qkv.astype(jnp.bfloat16)
    q3 = _split_heads(qkv[:, :D], BT, N, H, hd, use_einshape)          # (BT*H, N, hd)
    k3 = _split_heads(qkv[:, D:2 * D], BT, N, H, hd, use_einshape)
    v3 = _split_heads(qkv[:, 2 * D:], BT, N, H, hd, use_einshape)

    # TODO(synk): flash-style q/k tiling with online softmax for long sequences.
    s = jnp.einsum("hqe,hke->hqk", q3, k3,
                   preferred_element_type=jnp.float32)                 # (BT*H, N, N)
    s = s - jnp.max(s, axis=-1, keepdims=True)
    e = jnp.exp(s)
    p = e * (1.0 / jnp.sum(e, axis=-1, keepdims=True))                 # exact softmax
    o3 = jnp.einsum("hqk,hke->hqe", p.astype(jnp.bfloat16), v3,
                    preferred_element_type=jnp.float32)                # (BT*H, N, hd)

    # merge heads back to a lane-dense (R, D) slab, then ONE output projection
    attn = _merge_heads(o3, BT, N, H, hd, use_einshape)
    attn = jnp.dot(attn.astype(jnp.bfloat16), projw[...],
                   preferred_element_type=jnp.float32) + projb[...]
    x2 = x2 + attn

    # ---- MLP (pre-LN) ----
    xn2 = _layernorm(x2, ln2w[...], ln2b[...])
    h1 = jnp.dot(xn2.astype(jnp.bfloat16), fc1w[...],
                 preferred_element_type=jnp.float32) + fc1b[...]
    h1 = _gelu_kernel(h1)
    mlp = jnp.dot(h1.astype(jnp.bfloat16), fc2w[...],
                  preferred_element_type=jnp.float32) + fc2b[...]
    x2 = x2 + mlp

    xnew = x2.reshape(BT, N, D)
    xres[...] = xnew

    @pl.when(layer == pl.num_programs(1) - 1)
    def _():
        o_ref[...] = xnew.astype(o_ref.dtype)


def _head_kernel(x_ref, nw, nb, hw, hb, o_ref):
    """Final LayerNorm + Linear head on a row tile. x_ref: (TR, D); o_ref: (TR, Cpad)."""
    xn = _layernorm(x_ref[...], nw[...], nb[...])
    y = jnp.dot(xn.astype(jnp.bfloat16), hw[...],
                preferred_element_type=jnp.float32) + hb[...]
    o_ref[...] = y.astype(o_ref.dtype)


# ---------------------------------------------------------------------------
# wrappers
# ---------------------------------------------------------------------------
def run_blocks(x, kp, num_heads, batch_tile, vmem_limit, use_einshape):
    B, N, D = x.shape
    L = kp["ln1w"].shape[0]
    names = ("ln1w", "ln1b", "wqkv", "projw", "projb",
             "ln2w", "ln2b", "fc1w", "fc1b", "fc2w", "fc2b")
    weights = [kp[n] for n in names]

    def wspec(arr):
        # per-layer block of a (L, ...) stacked weight; index depends only on the
        # layer axis -> BlockSpec double-buffers / prefetches layer l+1's weights.
        per = tuple(arr.shape[1:])
        zeros = (0,) * len(per)
        return pl.BlockSpec((None,) + per, lambda b, l, zeros=zeros: (l,) + zeros)

    return pl.pallas_call(
        functools.partial(_decoder_blocks_kernel, num_heads=num_heads,
                          use_einshape=use_einshape),
        out_shape=jax.ShapeDtypeStruct((B, N, D), x.dtype),
        grid=(B // batch_tile, L),
        in_specs=[pl.BlockSpec((batch_tile, N, D), lambda b, l: (b, 0, 0))]
                 + [wspec(w) for w in weights],
        out_specs=pl.BlockSpec((batch_tile, N, D), lambda b, l: (b, 0, 0)),
        scratch_shapes=[pltpu.VMEM((batch_tile, N, D), jnp.float32)],
        compiler_params=pltpu.CompilerParams(
            dimension_semantics=("parallel", "arbitrary"),  # batch tiles / layers
            vmem_limit_bytes=vmem_limit),
    )(x, *weights)


def run_head(x_flat, kp, vmem_limit):
    R, D = x_flat.shape
    Cpad = kp["headw"].shape[1]
    TR = min(512, _round_up(R, 8))          # mem-bound: large lane-dense row tiles
    Rpad = _round_up(R, TR)
    if Rpad != R:
        x_flat = jnp.pad(x_flat, ((0, Rpad - R), (0, 0)))   # zero-padded tail rows
    vspec = pl.BlockSpec(memory_space=pltpu.MemorySpace.VMEM)
    out = pl.pallas_call(
        _head_kernel,
        out_shape=jax.ShapeDtypeStruct((Rpad, Cpad), jnp.float32),
        grid=(Rpad // TR,),
        in_specs=[pl.BlockSpec((TR, D), lambda r: (r, 0)), vspec, vspec, vspec, vspec],
        out_specs=pl.BlockSpec((TR, Cpad), lambda r: (r, 0)),
        compiler_params=pltpu.CompilerParams(
            dimension_semantics=("parallel",),
            vmem_limit_bytes=vmem_limit),
    )(x_flat, kp["normw"], kp["normb"], kp["headw"], kp["headb"])
    return out[:R]


def decoder_forward(x, kp, return_token_num, num_heads):
    B, N, D = x.shape
    bt = _pick_batch_tile(B, N)
    vmem_limit = _vmem_limit_bytes()
    try:
        y = jax.block_until_ready(
            run_blocks(x, kp, num_heads, bt, vmem_limit, use_einshape=True))
    except Exception:
        # TODO(synk): this Mosaic build rejected the einshape/reshape head relayout;
        # fall back to the slice+stack split (identical math, slower relayouts).
        y = run_blocks(x, kp, num_heads, bt, vmem_limit, use_einshape=False)
    if return_token_num > 0:
        y = y[:, -return_token_num:]          # glue: slicing stays in plain JAX
    B2, Nt, _ = y.shape
    out = run_head(y.reshape(B2 * Nt, D), kp, vmem_limit)
    C = kp["num_classes"]
    return out[:, :C].reshape(B2, Nt, C)


# ---------------------------------------------------------------------------
# parameters: torch-faithful f32 init, then kernel-layout prep (stack / fuse / cast)
# ---------------------------------------------------------------------------
def init_params(key, depth, D, num_heads, mlp_hidden, num_classes):
    def xavier(k, shape, fan_in, fan_out):
        a = math.sqrt(6.0 / (fan_in + fan_out))
        return jax.random.uniform(k, shape, jnp.float32, -a, a)

    ones = lambda n: jnp.ones((1, n), jnp.float32)
    zeros = lambda n: jnp.zeros((1, n), jnp.float32)

    blocks = []
    keys = jax.random.split(key, depth + 1)
    for i in range(depth):
        ks = jax.random.split(keys[i], 6)
        blocks.append(dict(
            ln1w=ones(D), ln1b=zeros(D),
            # chunks of the torch qkv Linear (3D x D, no bias): xavier over (D, 3D) fans
            wq=xavier(ks[0], (D, D), D, 3 * D),
            wk=xavier(ks[1], (D, D), D, 3 * D),
            wv=xavier(ks[2], (D, D), D, 3 * D),
            projw=xavier(ks[3], (D, D), D, D), projb=zeros(D),
            ln2w=ones(D), ln2b=zeros(D),
            fc1w=xavier(ks[4], (D, mlp_hidden), D, mlp_hidden), fc1b=zeros(mlp_hidden),
            fc2w=xavier(ks[5], (mlp_hidden, D), mlp_hidden, D), fc2b=zeros(D)))
    return dict(blocks=blocks,
                normw=ones(D), normb=zeros(D),
                headw=xavier(keys[depth], (D, num_classes), D, num_classes),
                headb=zeros(num_classes))


def prepare_params(raw, num_heads):
    """Stack per-layer weights on a leading layer axis, fuse QKV (+fold attention
    scale), cast matmul weights to bf16, pad the head to a 128-multiple lane width."""
    D = raw["blocks"][0]["wq"].shape[0]
    hd = D // num_heads
    scale = hd ** -0.5

    def stack(name):
        return jnp.stack([b[name] for b in raw["blocks"]], axis=0)

    wqkv = jnp.stack(
        [jnp.concatenate([b["wq"] * scale, b["wk"], b["wv"]], axis=1)
         for b in raw["blocks"]], axis=0)                         # (L, D, 3D)

    kp = dict(
        ln1w=stack("ln1w"), ln1b=stack("ln1b"),
        wqkv=wqkv.astype(jnp.bfloat16),
        projw=stack("projw").astype(jnp.bfloat16), projb=stack("projb"),
        ln2w=stack("ln2w"), ln2b=stack("ln2b"),
        fc1w=stack("fc1w").astype(jnp.bfloat16), fc1b=stack("fc1b"),
        fc2w=stack("fc2w").astype(jnp.bfloat16), fc2b=stack("fc2b"))

    C = raw["headw"].shape[1]
    Cpad = _round_up(C, 128)
    headw = jnp.zeros((D, Cpad), jnp.float32).at[:, :C].set(raw["headw"])
    headb = jnp.zeros((1, Cpad), jnp.float32).at[:, :C].set(raw["headb"])
    kp.update(normw=raw["normw"], normb=raw["normb"],
              headw=headw.astype(jnp.bfloat16), headb=headb, num_classes=C)
    return kp


# ---------------------------------------------------------------------------
# pure-JAX f32 reference (faithful to the PyTorch module) for correctness check
# ---------------------------------------------------------------------------
def ref_forward(x, raw, return_token_num, num_heads):
    HI = jax.lax.Precision.HIGHEST
    B, N, D = x.shape
    H = num_heads
    hd = D // H
    scale = hd ** -0.5
    for p in raw["blocks"]:
        xn = _layernorm(x, p["ln1w"], p["ln1b"])
        q = jnp.einsum("bnd,de->bne", xn, p["wq"], precision=HI).reshape(B, N, H, hd) * scale
        k = jnp.einsum("bnd,de->bne", xn, p["wk"], precision=HI).reshape(B, N, H, hd)
        v = jnp.einsum("bnd,de->bne", xn, p["wv"], precision=HI).reshape(B, N, H, hd)
        a = jax.nn.softmax(jnp.einsum("bnhe,bmhe->bhnm", q, k, precision=HI), axis=-1)
        o = jnp.einsum("bhnm,bmhe->bnhe", a, v, precision=HI).reshape(B, N, D)
        x = x + jnp.einsum("bnd,de->bne", o, p["projw"], precision=HI) + p["projb"]
        xn2 = _layernorm(x, p["ln2w"], p["ln2b"])
        h1 = jax.nn.gelu(jnp.einsum("bnd,dm->bnm", xn2, p["fc1w"], precision=HI) + p["fc1b"],
                         approximate=False)
        x = x + jnp.einsum("bnm,md->bnd", h1, p["fc2w"], precision=HI) + p["fc2b"]
    if return_token_num > 0:
        x = x[:, -return_token_num:]
    xn = _layernorm(x, raw["normw"], raw["normb"])
    return jnp.einsum("bnd,dc->bnc", xn, raw["headw"], precision=HI) + raw["headb"]


# ---------------------------------------------------------------------------
if __name__ == "__main__":
    # Small config consistent with the module's constraint:
    # num_classes == 3 * tubelet_size * patch_size**2
    patch_size, tubelet_size = 4, 2
    num_classes = 3 * tubelet_size * patch_size ** 2      # 96
    embed_dim, depth, num_heads, mlp_ratio = 128, 2, 4, 4.0   # D lane-dense (x128)
    B, N = 2, 8
    return_token_num = 4

    key = jax.random.PRNGKey(0)
    kx, kparam = jax.random.split(key)
    x = jax.random.normal(kx, (B, N, embed_dim), jnp.float32)
    raw_params = init_params(kparam, depth, embed_dim, num_heads,
                             int(embed_dim * mlp_ratio), num_classes)
    kernel_params = prepare_params(raw_params, num_heads)

    out = decoder_forward(x, kernel_params, return_token_num, num_heads)
    out = jax.block_until_ready(out)
    assert out.shape == (B, return_token_num, num_classes), out.shape

    ref = ref_forward(x, raw_params, return_token_num, num_heads)
    err = float(jnp.max(jnp.abs(out - ref)))
    ref_scale = float(jnp.max(jnp.abs(ref)))
    # tolerance budget for bf16 matmul operands / weights + approx EUP erf term;
    # a structural bug would produce errors on the order of ref_scale itself.
    tol = 4e-2 * ref_scale + 2e-2
    if not math.isfinite(err) or err > tol:
        raise SystemExit(f"mismatch vs reference: max abs err = {err} (tol {tol})")

    print("KERNEL_OK")
</pallas_src>

<mosaic_0001>
module attributes {stable_mosaic.version = 11 : i64} {
  func.func @_decoder_blocks_kernel(%arg0: i32, %arg1: i32, %arg2: memref<2x8x128xf32, #tpu.memory_space<vmem>>, %arg3: memref<1x1x128xf32, #tpu.memory_space<vmem>>, %arg4: memref<1x1x128xf32, #tpu.memory_space<vmem>>, %arg5: memref<1x128x384xbf16, #tpu.memory_space<vmem>>, %arg6: memref<1x128x128xbf16, #tpu.memory_space<vmem>>, %arg7: memref<1x1x128xf32, #tpu.memory_space<vmem>>, %arg8: memref<1x1x128xf32, #tpu.memory_space<vmem>>, %arg9: memref<1x1x128xf32, #tpu.memory_space<vmem>>, %arg10: memref<1x128x512xbf16, #tpu.memory_space<vmem>>, %arg11: memref<1x1x512xf32, #tpu.memory_space<vmem>>, %arg12: memref<1x512x128xbf16, #tpu.memory_space<vmem>>, %arg13: memref<1x1x128xf32, #tpu.memory_space<vmem>>, %arg14: memref<2x8x128xf32, #tpu.memory_space<vmem>>, %arg15: memref<2x8x128xf32, #tpu.memory_space<vmem>>) attributes {dimension_semantics = [#tpu.dimension_semantics<parallel>, #tpu.dimension_semantics<arbitrary>], iteration_bounds = array<i64: 1, 2>, scalar_prefetch = 0 : i64, scratch_operands = 1 : i64, tpu.core_type = #tpu.core_type<tc>, window_params = [{transform_indices = @transform_0, window_bounds = array<i64: 2, 8, 128>}, {transform_indices = @transform_1, window_bounds = array<i64: 1, 1, 128>}, {transform_indices = @transform_2, window_bounds = array<i64: 1, 1, 128>}, {transform_indices = @transform_3, window_bounds = array<i64: 1, 128, 384>}, {transform_indices = @transform_4, window_bounds = array<i64: 1, 128, 128>}, {transform_indices = @transform_5, window_bounds = array<i64: 1, 1, 128>}, {transform_indices = @transform_6, window_bounds = array<i64: 1, 1, 128>}, {transform_indices = @transform_7, window_bounds = array<i64: 1, 1, 128>}, {transform_indices = @transform_8, window_bounds = array<i64: 1, 128, 512>}, {transform_indices = @transform_9, window_bounds = array<i64: 1, 1, 512>}, {transform_indices = @transform_10, window_bounds = array<i64: 1, 512, 128>}, {transform_indices = @transform_11, window_bounds = array<i64: 1, 1, 128>}, {transform_indices = @transform_12, window_bounds = array<i64: 2, 8, 128>}]} {
    %c0_i32 = arith.constant 0 : i32
    %0 = arith.cmpi eq, %arg1, %c0_i32 : i32
    %1 = arith.extui %0 : i1 to i32
    %c0_i32_0 = arith.constant 0 : i32
    %2 = arith.cmpi ne, %1, %c0_i32_0 : i32
    scf.if %2 {
      %c0_73 = arith.constant 0 : index
      %c0_74 = arith.constant 0 : index
      %c0_75 = arith.constant 0 : index
      %162 = vector.load %arg2[%c0_73, %c0_74, %c0_75] : memref<2x8x128xf32, #tpu.memory_space<vmem>>, vector<2x8x128xf32>
      %c0_76 = arith.constant 0 : index
      %c0_77 = arith.constant 0 : index
      %c0_78 = arith.constant 0 : index
      %163 = vector.load %arg15[%c0_76, %c0_77, %c0_78] : memref<2x8x128xf32, #tpu.memory_space<vmem>>, vector<2x8x128xf32>
      tpu.vector_store %arg15[%c0_76, %c0_77, %c0_78], %162 {strides = array<i32>} : memref<2x8x128xf32, #tpu.memory_space<vmem>>, vector<2x8x128xf32>,
    } else {
    }
    %c0 = arith.constant 0 : index
    %c0_1 = arith.constant 0 : index
    %c0_2 = arith.constant 0 : index
    %3 = vector.load %arg15[%c0, %c0_1, %c0_2] : memref<2x8x128xf32, #tpu.memory_space<vmem>>, vector<2x8x128xf32>
    %4 = vector.shape_cast %3 : vector<2x8x128xf32> to vector<16x128xf32>
    %c0_3 = arith.constant 0 : index
    %c0_4 = arith.constant 0 : index
    %c0_5 = arith.constant 0 : index
    %5 = vector.load %arg3[%c0_3, %c0_4, %c0_5] : memref<1x1x128xf32, #tpu.memory_space<vmem>>, vector<1x1x128xf32>
    %6 = vector.shape_cast %5 : vector<1x1x128xf32> to vector<1x128xf32>
    %c0_6 = arith.constant 0 : index
    %c0_7 = arith.constant 0 : index
    %c0_8 = arith.constant 0 : index
    %7 = vector.load %arg4[%c0_6, %c0_7, %c0_8] : memref<1x1x128xf32, #tpu.memory_space<vmem>>, vector<1x1x128xf32>
    %8 = vector.shape_cast %7 : vector<1x1x128xf32> to vector<1x128xf32>
    %cst = arith.constant dense<0.000000e+00> : vector<16xf32>
    %9 = vector.multi_reduction <add>, %4, %cst [1] : vector<16x128xf32> to vector<16xf32>
    %10 = vector.shape_cast %9 : vector<16xf32> to vector<16x1xf32>
    %cst_9 = arith.constant 1.280000e+02 : f32
    %11 = vector.broadcast %cst_9 : f32 to vector<16x1xf32>
    %12 = arith.divf %10, %11 : vector<16x1xf32>
    %13 = vector.broadcast %12 : vector<16x1xf32> to vector<16x128xf32>
    %14 = arith.subf %4, %13 : vector<16x128xf32>
    %15 = arith.mulf %14, %14 : vector<16x128xf32>
    %cst_10 = arith.constant dense<0.000000e+00> : vector<16xf32>
    %16 = vector.multi_reduction <add>, %15, %cst_10 [1] : vector<16x128xf32> to vector<16xf32>
    %17 = vector.shape_cast %16 : vector<16xf32> to vector<16x1xf32>
    %cst_11 = arith.constant 1.280000e+02 : f32
    %18 = vector.broadcast %cst_11 : f32 to vector<16x1xf32>
    %19 = arith.divf %17, %18 : vector<16x1xf32>
    %20 = vector.broadcast %12 : vector<16x1xf32> to vector<16x128xf32>
    %21 = arith.subf %4, %20 : vector<16x128xf32>
    %cst_12 = arith.constant 9.99999974E-6 : f32
    %22 = vector.broadcast %cst_12 : f32 to vector<16x1xf32>
    %23 = arith.addf %19, %22 : vector<16x1xf32>
    %24 = math.rsqrt %23 : vector<16x1xf32>
    %25 = vector.broadcast %24 : vector<16x1xf32> to vector<16x128xf32>
    %26 = arith.mulf %21, %25 : vector<16x128xf32>
    %27 = vector.broadcast %6 : vector<1x128xf32> to vector<16x128xf32>
    %28 = arith.mulf %26, %27 : vector<16x128xf32>
    %29 = vector.broadcast %8 : vector<1x128xf32> to vector<16x128xf32>
    %30 = arith.addf %28, %29 : vector<16x128xf32>
    %31 = arith.truncf %30 : vector<16x128xf32> to vector<16x128xbf16>
    %c0_13 = arith.constant 0 : index
    %c0_14 = arith.constant 0 : index
    %c0_15 = arith.constant 0 : index
    %32 = vector.load %arg5[%c0_13, %c0_14, %c0_15] : memref<1x128x384xbf16, #tpu.memory_space<vmem>>, vector<1x128x384xbf16>
    %33 = vector.shape_cast %32 : vector<1x128x384xbf16> to vector<128x384xbf16>
    %cst_16 = arith.constant dense<0.000000e+00> : vector<16x384xf32>
    %34 = tpu.matmul %31, %33, %cst_16 {dimension_numbers = #tpu.dot_dimension_numbers<[1], [0], [0], [1], [0, 0, 1, 1], [], []>} : vector<16x128xbf16>, vector<128x384xbf16>, vector<16x384xf32> -> vector<16x384xf32>
    %35 = arith.truncf %34 : vector<16x384xf32> to vector<16x384xbf16>
    %36 = vector.extract_strided_slice %35 {offsets = [0, 0], sizes = [16, 128], strides = [1, 1]} : vector<16x384xbf16> to vector<16x128xbf16>
    %37 = vector.shape_cast %36 : vector<16x128xbf16> to vector<2x8x4x32xbf16>
    %38 = tpu.transpose %37, [0, 2, 1, 3] : vector<2x8x4x32xbf16> -> vector<2x4x8x32xbf16>
    %39 = vector.shape_cast %38 : vector<2x4x8x32xbf16> to vector<8x8x32xbf16>
    %40 = vector.extract_strided_slice %35 {offsets = [0, 128], sizes = [16, 128], strides = [1, 1]} : vector<16x384xbf16> to vector<16x128xbf16>
    %41 = vector.shape_cast %40 : vector<16x128xbf16> to vector<2x8x4x32xbf16>
    %42 = tpu.transpose %41, [0, 2, 1, 3] : vector<2x8x4x32xbf16> -> vector<2x4x8x32xbf16>
    %43 = vector.shape_cast %42 : vector<2x4x8x32xbf16> to vector<8x8x32xbf16>
    %44 = vector.extract_strided_slice %35 {offsets = [0, 256], sizes = [16, 128], strides = [1, 1]} : vector<16x384xbf16> to vector<16x128xbf16>
    %45 = vector.shape_cast %44 : vector<16x128xbf16> to vector<2x8x4x32xbf16>
    %46 = tpu.transpose %45, [0, 2, 1, 3] : vector<2x8x4x32xbf16> -> vector<2x4x8x32xbf16>
    %47 = vector.shape_cast %46 : vector<2x4x8x32xbf16> to vector<8x8x32xbf16>
    "tpu.trace_start"() <{level = 10 : i32, message = "hqe,hke->hqk"}> : () -> ()
    %cst_17 = arith.constant dense<0.000000e+00> : vector<8x8x8xf32>
    %48 = tpu.matmul %39, %43, %cst_17 {dimension_numbers = #tpu.dot_dimension_numbers<[2], [2], [1], [1], [0, 0, 0, 1, 1, 1], [0], [0]>} : vector<8x8x32xbf16>, vector<8x8x32xbf16>, vector<8x8x8xf32> -> vector<8x8x8xf32>
    "tpu.trace_stop"() : () -> ()
    %cst_18 = arith.constant dense<0xFF800000> : vector<8x8xf32>
    %49 = vector.multi_reduction <maximumf>, %48, %cst_18 [2] : vector<8x8x8xf32> to vector<8x8xf32>
    %50 = vector.shape_cast %49 : vector<8x8xf32> to vector<8x8x1xf32>
    %51 = vector.broadcast %50 : vector<8x8x1xf32> to vector<8x8x8xf32>
    %52 = arith.subf %48, %51 : vector<8x8x8xf32>
    %53 = math.exp %52 : vector<8x8x8xf32>
    %cst_19 = arith.constant dense<0.000000e+00> : vector<8x8xf32>
    %54 = vector.multi_reduction <add>, %53, %cst_19 [2] : vector<8x8x8xf32> to vector<8x8xf32>
    %55 = vector.shape_cast %54 : vector<8x8xf32> to vector<8x8x1xf32>
    %cst_20 = arith.constant 1.000000e+00 : f32
    %56 = vector.broadcast %cst_20 : f32 to vector<8x8x1xf32>
    %57 = arith.divf %56, %55 : vector<8x8x1xf32>
    %58 = vector.broadcast %57 : vector<8x8x1xf32> to vector<8x8x8xf32>
    %59 = arith.mulf %53, %58 : vector<8x8x8xf32>
    %60 = arith.truncf %59 : vector<8x8x8xf32> to vector<8x8x8xbf16>
    "tpu.trace_start"() <{level = 10 : i32, message = "hqk,hke->hqe"}> : () -> ()
    %cst_21 = arith.constant dense<0.000000e+00> : vector<8x8x32xf32>
    %61 = tpu.matmul %60, %47, %cst_21 {dimension_numbers = #tpu.dot_dimension_numbers<[2], [1], [1], [2], [0, 0, 0, 1, 1, 2], [0], [0]>} : vector<8x8x8xbf16>, vector<8x8x32xbf16>, vector<8x8x32xf32> -> vector<8x8x32xf32>
    "tpu.trace_stop"() : () -> ()
    %62 = vector.shape_cast %61 : vector<8x8x32xf32> to vector<2x4x8x32xf32>
    %63 = tpu.transpose %62, [0, 2, 1, 3] : vector<2x4x8x32xf32> -> vector<2x8x4x32xf32>
    %64 = vector.shape_cast %63 : vector<2x8x4x32xf32> to vector<16x128xf32>
    %65 = arith.truncf %64 : vector<16x128xf32> to vector<16x128xbf16>
    %c0_22 = arith.constant 0 : index
    %c0_23 = arith.constant 0 : index
    %c0_24 = arith.constant 0 : index
    %66 = vector.load %arg6[%c0_22, %c0_23, %c0_24] : memref<1x128x128xbf16, #tpu.memory_space<vmem>>, vector<1x128x128xbf16>
    %67 = vector.shape_cast %66 : vector<1x128x128xbf16> to vector<128x128xbf16>
    %cst_25 = arith.constant dense<0.000000e+00> : vector<16x128xf32>
    %68 = tpu.matmul %65, %67, %cst_25 {dimension_numbers = #tpu.dot_dimension_numbers<[1], [0], [0], [1], [0, 0, 1, 1], [], []>} : vector<16x128xbf16>, vector<128x128xbf16>, vector<16x128xf32> -> vector<16x128xf32>
    %c0_26 = arith.constant 0 : index
    %c0_27 = arith.constant 0 : index
    %c0_28 = arith.constant 0 : index
    %69 = vector.load %arg7[%c0_26, %c0_27, %c0_28] : memref<1x1x128xf32, #tpu.memory_space<vmem>>, vector<1x1x128xf32>
    %70 = vector.shape_cast %69 : vector<1x1x128xf32> to vector<1x128xf32>
    %71 = vector.broadcast %70 : vector<1x128xf32> to vector<16x128xf32>
    %72 = arith.addf %68, %71 : vector<16x128xf32>
    %73 = arith.addf %4, %72 : vector<16x128xf32>
    %c0_29 = arith.constant 0 : index
    %c0_30 = arith.constant 0 : index
    %c0_31 = arith.constant 0 : index
    %74 = vector.load %arg8[%c0_29, %c0_30, %c0_31] : memref<1x1x128xf32, #tpu.memory_space<vmem>>, vector<1x1x128xf32>
    %75 = vector.shape_cast %74 : vector<1x1x128xf32> to vector<1x128xf32>
    %c0_32 = arith.constant 0 : index
    %c0_33 = arith.constant 0 : index
    %c0_34 = arith.constant 0 : index
    %76 = vector.load %arg9[%c0_32, %c0_33, %c0_34] : memref<1x1x128xf32, #tpu.memory_space<vmem>>, vector<1x1x128xf32>
    %77 = vector.shape_cast %76 : vector<1x1x128xf32> to vector<1x128xf32>
    %cst_35 = arith.constant dense<0.000000e+00> : vector<16xf32>
    %78 = vector.multi_reduction <add>, %73, %cst_35 [1] : vector<16x128xf32> to vector<16xf32>
    %79 = vector.shape_cast %78 : vector<16xf32> to vector<16x1xf32>
    %cst_36 = arith.constant 1.280000e+02 : f32
    %80 = vector.broadcast %cst_36 : f32 to vector<16x1xf32>
    %81 = arith.divf %79, %80 : vector<16x1xf32>
    %82 = vector.broadcast %81 : vector<16x1xf32> to vector<16x128xf32>
    %83 = arith.subf %73, %82 : vector<16x128xf32>
    %84 = arith.mulf %83, %83 : vector<16x128xf32>
    %cst_37 = arith.constant dense<0.000000e+00> : vector<16xf32>
    %85 = vector.multi_reduction <add>, %84, %cst_37 [1] : vector<16x128xf32> to vector<16xf32>
    %86 = vector.shape_cast %85 : vector<16xf32> to vector<16x1xf32>
    %cst_38 = arith.constant 1.280000e+02 : f32
    %87 = vector.broadcast %cst_38 : f32 to vector<16x1xf32>
    %88 = arith.divf %86, %87 : vector<16x1xf32>
    %89 = vector.broadcast %81 : vector<16x1xf32> to vector<16x128xf32>
    %90 = arith.subf %73, %89 : vector<16x128xf32>
    %cst_39 = arith.constant 9.99999974E-6 : f32
    %91 = vector.broadcast %cst_39 : f32 to vector<16x1xf32>
    %92 = arith.addf %88, %91 : vector<16x1xf32>
    %93 = math.rsqrt %92 : vector<16x1xf32>
    %94 = vector.broadcast %93 : vector<16x1xf32> to vector<16x128xf32>
    %95 = arith.mulf %90, %94 : vector<16x128xf32>
    %96 = vector.broadcast %75 : vector<1x128xf32> to vector<16x128xf32>
    %97 = arith.mulf %95, %96 : vector<16x128xf32>
    %98 = vector.broadcast %77 : vector<1x128xf32> to vector<16x128xf32>
    %99 = arith.addf %97, %98 : vector<16x128xf32>
    %100 = arith.truncf %99 : vector<16x128xf32> to vector<16x128xbf16>
    %c0_40 = arith.constant 0 : index
    %c0_41 = arith.constant 0 : index
    %c0_42 = arith.constant 0 : index
    %101 = vector.load %arg10[%c0_40, %c0_41, %c0_42] : memref<1x128x512xbf16, #tpu.memory_space<vmem>>, vector<1x128x512xbf16>
    %102 = vector.shape_cast %101 : vector<1x128x512xbf16> to vector<128x512xbf16>
    %cst_43 = arith.constant dense<0.000000e+00> : vector<16x512xf32>
    %103 = tpu.matmul %100, %102, %cst_43 {dimension_numbers = #tpu.dot_dimension_numbers<[1], [0], [0], [1], [0, 0, 1, 1], [], []>} : vector<16x128xbf16>, vector<128x512xbf16>, vector<16x512xf32> -> vector<16x512xf32>
    %c0_44 = arith.constant 0 : index
    %c0_45 = arith.constant 0 : index
    %c0_46 = arith.constant 0 : index
    %104 = vector.load %arg11[%c0_44, %c0_45, %c0_46] : memref<1x1x512xf32, #tpu.memory_space<vmem>>, vector<1x1x512xf32>
    %105 = vector.shape_cast %104 : vector<1x1x512xf32> to vector<1x512xf32>
    %106 = vector.broadcast %105 : vector<1x512xf32> to vector<16x512xf32>
    %107 = arith.addf %103, %106 : vector<16x512xf32>
    %cst_47 = arith.constant 5.000000e-01 : f32
    %108 = vector.broadcast %cst_47 : f32 to vector<16x512xf32>
    %109 = arith.mulf %108, %107 : vector<16x512xf32>
    %cst_48 = arith.constant 0.707106769 : f32
    %110 = vector.broadcast %cst_48 : f32 to vector<16x512xf32>
    %111 = arith.mulf %107, %110 : vector<16x512xf32>
    %cst_49 = arith.constant 0.000000e+00 : f32
    %112 = vector.broadcast %cst_49 : f32 to vector<16x512xf32>
    %113 = arith.cmpf oge, %111, %112 : vector<16x512xf32>
    %cst_50 = arith.constant 1.000000e+00 : f32
    %cst_51 = arith.constant -1.000000e+00 : f32
    %114 = vector.broadcast %cst_50 : f32 to vector<16x512xf32>
    %115 = vector.broadcast %cst_51 : f32 to vector<16x512xf32>
    %116 = arith.select %113, %114, %115 : vector<16x512xi1>, vector<16x512xf32>
    %117 = math.absf %111 : vector<16x512xf32>
    %cst_52 = arith.constant 0.327591091 : f32
    %118 = vector.broadcast %cst_52 : f32 to vector<16x512xf32>
    %119 = arith.mulf %118, %117 : vector<16x512xf32>
    %cst_53 = arith.constant 1.000000e+00 : f32
    %120 = vector.broadcast %cst_53 : f32 to vector<16x512xf32>
    %121 = arith.addf %120, %119 : vector<16x512xf32>
    %122 = tpu.reciprocal %121 {approx = true} : vector<16x512xf32> -> vector<16x512xf32>
    %cst_54 = arith.constant 1.06140542 : f32
    %123 = vector.broadcast %cst_54 : f32 to vector<16x512xf32>
    %124 = arith.mulf %123, %122 : vector<16x512xf32>
    %cst_55 = arith.constant -1.45315206 : f32
    %125 = vector.broadcast %cst_55 : f32 to vector<16x512xf32>
    %126 = arith.addf %124, %125 : vector<16x512xf32>
    %127 = arith.mulf %126, %122 : vector<16x512xf32>
    %cst_56 = arith.constant 1.42141378 : f32
    %128 = vector.broadcast %cst_56 : f32 to vector<16x512xf32>
    %129 = arith.addf %127, %128 : vector<16x512xf32>
    %130 = arith.mulf %129, %122 : vector<16x512xf32>
    %cst_57 = arith.constant -0.284496725 : f32
    %131 = vector.broadcast %cst_57 : f32 to vector<16x512xf32>
    %132 = arith.addf %130, %131 : vector<16x512xf32>
    %133 = arith.mulf %132, %122 : vector<16x512xf32>
    %cst_58 = arith.constant 0.254829586 : f32
    %134 = vector.broadcast %cst_58 : f32 to vector<16x512xf32>
    %135 = arith.addf %133, %134 : vector<16x512xf32>
    %136 = arith.mulf %135, %122 : vector<16x512xf32>
    %cst_59 = arith.constant 0.000000e+00 : f32
    %137 = vector.broadcast %cst_59 : f32 to vector<16x512xf32>
    %138 = arith.subf %137, %117 : vector<16x512xf32>
    %139 = arith.mulf %138, %117 : vector<16x512xf32>
    %140 = math.exp %139 : vector<16x512xf32>
    %141 = arith.mulf %136, %140 : vector<16x512xf32>
    %cst_60 = arith.constant 1.000000e+00 : f32
    %142 = vector.broadcast %cst_60 : f32 to vector<16x512xf32>
    %143 = arith.subf %142, %141 : vector<16x512xf32>
    %144 = arith.mulf %116, %143 : vector<16x512xf32>
    %cst_61 = arith.constant 1.000000e+00 : f32
    %145 = vector.broadcast %cst_61 : f32 to vector<16x512xf32>
    %146 = arith.addf %145, %144 : vector<16x512xf32>
    %147 = arith.mulf %109, %146 : vector<16x512xf32>
    %148 = arith.truncf %147 : vector<16x512xf32> to vector<16x512xbf16>
    %c0_62 = arith.constant 0 : index
    %c0_63 = arith.constant 0 : index
    %c0_64 = arith.constant 0 : index
    %149 = vector.load %arg12[%c0_62, %c0_63, %c0_64] : memref<1x512x128xbf16, #tpu.memory_space<vmem>>, vector<1x512x128xbf16>
    %150 = vector.shape_cast %149 : vector<1x512x128xbf16> to vector<512x128xbf16>
    %cst_65 = arith.constant dense<0.000000e+00> : vector<16x128xf32>
    %151 = tpu.matmul %148, %150, %cst_65 {dimension_numbers = #tpu.dot_dimension_numbers<[1], [0], [0], [1], [0, 0, 1, 1], [], []>} : vector<16x512xbf16>, vector<512x128xbf16>, vector<16x128xf32> -> vector<16x128xf32>
    %c0_66 = arith.constant 0 : index
    %c0_67 = arith.constant 0 : index
    %c0_68 = arith.constant 0 : index
    %152 = vector.load %arg13[%c0_66, %c0_67, %c0_68] : memref<1x1x128xf32, #tpu.memory_space<vmem>>, vector<1x1x128xf32>
    %153 = vector.shape_cast %152 : vector<1x1x128xf32> to vector<1x128xf32>
    %154 = vector.broadcast %153 : vector<1x128xf32> to vector<16x128xf32>
    %155 = arith.addf %151, %154 : vector<16x128xf32>
    %156 = arith.addf %73, %155 : vector<16x128xf32>
    %157 = vector.shape_cast %156 : vector<16x128xf32> to vector<2x8x128xf32>
    %c0_69 = arith.constant 0 : index
    %c0_70 = arith.constant 0 : index
    %c0_71 = arith.constant 0 : index
    %158 = vector.load %arg15[%c0_69, %c0_70, %c0_71] : memref<2x8x128xf32, #tpu.memory_space<vmem>>, vector<2x8x128xf32>
    tpu.vector_store %arg15[%c0_69, %c0_70, %c0_71], %157 {strides = array<i32>} : memref<2x8x128xf32, #tpu.memory_space<vmem>>, vector<2x8x128xf32>,
    %c1_i32 = arith.constant 1 : i32
    %159 = arith.cmpi eq, %arg1, %c1_i32 : i32
    %160 = arith.extui %159 : i1 to i32
    %c0_i32_72 = arith.constant 0 : i32
    %161 = arith.cmpi ne, %160, %c0_i32_72 : i32
    scf.if %161 {
      %c0_73 = arith.constant 0 : index
      %c0_74 = arith.constant 0 : index
      %c0_75 = arith.constant 0 : index
      %162 = vector.load %arg14[%c0_73, %c0_74, %c0_75] : memref<2x8x128xf32, #tpu.memory_space<vmem>>, vector<2x8x128xf32>
      tpu.vector_store %arg14[%c0_73, %c0_74, %c0_75], %157 {strides = array<i32>} : memref<2x8x128xf32, #tpu.memory_space<vmem>>, vector<2x8x128xf32>,
    } else {
    }
    return
  }
  func.func @transform_0(%arg0: i32, %arg1: i32) -> (i32, i32, i32) {
    %c0_i32 = arith.constant 0 : i32
    %c0_i32_0 = arith.constant 0 : i32
    %c0_i32_1 = arith.constant 0 : i32
    return %arg0, %c0_i32, %c0_i32_0 : i32, i32, i32
  }
  func.func @transform_1(%arg0: i32, %arg1: i32) -> (i32, i32, i32) {
    %c0_i32 = arith.constant 0 : i32
    %c0_i32_0 = arith.constant 0 : i32
    %c0_i32_1 = arith.constant 0 : i32
    return %arg1, %c0_i32, %c0_i32_0 : i32, i32, i32
  }
  func.func @transform_2(%arg0: i32, %arg1: i32) -> (i32, i32, i32) {
    %c0_i32 = arith.constant 0 : i32
    %c0_i32_0 = arith.constant 0 : i32
    %c0_i32_1 = arith.constant 0 : i32
    return %arg1, %c0_i32, %c0_i32_0 : i32, i32, i32
  }
  func.func @transform_3(%arg0: i32, %arg1: i32) -> (i32, i32, i32) {
    %c0_i32 = arith.constant 0 : i32
    %c0_i32_0 = arith.constant 0 : i32
    %c0_i32_1 = arith.constant 0 : i32
    return %arg1, %c0_i32, %c0_i32_0 : i32, i32, i32
  }
  func.func @transform_4(%arg0: i32, %arg1: i32) -> (i32, i32, i32) {
    %c0_i32 = arith.constant 0 : i32
    %c0_i32_0 = arith.constant 0 : i32
    %c0_i32_1 = arith.constant 0 : i32
    return %arg1, %c0_i32, %c0_i32_0 : i32, i32, i32
  }
  func.func @transform_5(%arg0: i32, %arg1: i32) -> (i32, i32, i32) {
    %c0_i32 = arith.constant 0 : i32
    %c0_i32_0 = arith.constant 0 : i32
    %c0_i32_1 = arith.constant 0 : i32
    return %arg1, %c0_i32, %c0_i32_0 : i32, i32, i32
  }
  func.func @transform_6(%arg0: i32, %arg1: i32) -> (i32, i32, i32) {
    %c0_i32 = arith.constant 0 : i32
    %c0_i32_0 = arith.constant 0 : i32
    %c0_i32_1 = arith.constant 0 : i32
    return %arg1, %c0_i32, %c0_i32_0 : i32, i32, i32
  }
  func.func @transform_7(%arg0: i32, %arg1: i32) -> (i32, i32, i32) {
    %c0_i32 = arith.constant 0 : i32
    %c0_i32_0 = arith.constant 0 : i32
    %c0_i32_1 = arith.constant 0 : i32
    return %arg1, %c0_i32, %c0_i32_0 : i32, i32, i32
  }
  func.func @transform_8(%arg0: i32, %arg1: i32) -> (i32, i32, i32) {
    %c0_i32 = arith.constant 0 : i32
    %c0_i32_0 = arith.constant 0 : i32
    %c0_i32_1 = arith.constant 0 : i32
    return %arg1, %c0_i32, %c0_i32_0 : i32, i32, i32
  }
  func.func @transform_9(%arg0: i32, %arg1: i32) -> (i32, i32, i32) {
    %c0_i32 = arith.constant 0 : i32
    %c0_i32_0 = arith.constant 0 : i32
    %c0_i32_1 = arith.constant 0 : i32
    return %arg1, %c0_i32, %c0_i32_0 : i32, i32, i32
  }
  func.func @transform_10(%arg0: i32, %arg1: i32) -> (i32, i32, i32) {
    %c0_i32 = arith.constant 0 : i32
    %c0_i32_0 = arith.constant 0 : i32
    %c0_i32_1 = arith.constant 0 : i32
    return %arg1, %c0_i32, %c0_i32_0 : i32, i32, i32
  }
  func.func @transform_11(%arg0: i32, %arg1: i32) -> (i32, i32, i32) {
    %c0_i32 = arith.constant 0 : i32
    %c0_i32_0 = arith.constant 0 : i32
    %c0_i32_1 = arith.constant 0 : i32
    return %arg1, %c0_i32, %c0_i32_0 : i32, i32, i32
  }
  func.func @transform_12(%arg0: i32, %arg1: i32) -> (i32, i32, i32) {
    %c0_i32 = arith.constant 0 : i32
    %c0_i32_0 = arith.constant 0 : i32
    %c0_i32_1 = arith.constant 0 : i32
    return %arg0, %c0_i32, %c0_i32_0 : i32, i32, i32
  }
}

module attributes {stable_mosaic.version = 11 : i64} {
  func.func @_decoder_blocks_kernel(%arg0: i32, %arg1: i32, %arg2: memref<2x8x128xf32, #tpu.memory_space<vmem>>, %arg3: memref<1x1x128xf32, #tpu.memory_space<vmem>>, %arg4: memref<1x1x128xf32, #tpu.memory_space<vmem>>, %arg5: memref<1x128x384xbf16, #tpu.memory_space<vmem>>, %arg6: memref<1x128x128xbf16, #tpu.memory_space<vmem>>, %arg7: memref<1x1x128xf32, #tpu.memory_space<vmem>>, %arg8: memref<1x1x128xf32, #tpu.memory_space<vmem>>, %arg9: memref<1x1x128xf32, #tpu.memory_space<vmem>>, %arg10: memref<1x128x512xbf16, #tpu.memory_space<vmem>>, %arg11: memref<1x1x512xf32, #tpu.memory_space<vmem>>, %arg12: memref<1x512x128xbf16, #tpu.memory_space<vmem>>, %arg13: memref<1x1x128xf32, #tpu.memory_space<vmem>>, %arg14: memref<2x8x128xf32, #tpu.memory_space<vmem>>, %arg15: memref<2x8x128xf32, #tpu.memory_space<vmem>>) attributes {dimension_semantics = [#tpu.dimension_semantics<parallel>, #tpu.dimension_semantics<arbitrary>], iteration_bounds = array<i64: 1, 2>, scalar_prefetch = 0 : i64, scratch_operands = 1 : i64, tpu.core_type = #tpu.core_type<tc>, window_params = [{transform_indices = @transform_0, window_bounds = array<i64: 2, 8, 128>}, {transform_indices = @transform_1, window_bounds = array<i64: 1, 1, 128>}, {transform_indices = @transform_2, window_bounds = array<i64: 1, 1, 128>}, {transform_indices = @transform_3, window_bounds = array<i64: 1, 128, 384>}, {transform_indices = @transform_4, window_bounds = array<i64: 1, 128, 128>}, {transform_indices = @transform_5, window_bounds = array<i64: 1, 1, 128>}, {transform_indices = @transform_6, window_bounds = array<i64: 1, 1, 128>}, {transform_indices = @transform_7, window_bounds = array<i64: 1, 1, 128>}, {transform_indices = @transform_8, window_bounds = array<i64: 1, 128, 512>}, {transform_indices = @transform_9, window_bounds = array<i64: 1, 1, 512>}, {transform_indices = @transform_10, window_bounds = array<i64: 1, 512, 128>}, {transform_indices = @transform_11, window_bounds = array<i64: 1, 1, 128>}, {transform_indices = @transform_12, window_bounds = array<i64: 2, 8, 128>}]} {
    %c0_i32 = arith.constant 0 : i32
    %0 = arith.cmpi eq, %arg1, %c0_i32 : i32
    %1 = arith.extui %0 : i1 to i32
    %c0_i32_0 = arith.constant 0 : i32
    %2 = arith.cmpi ne, %1, %c0_i32_0 : i32
    scf.if %2 {
      %c0_73 = arith.constant 0 : index
      %c0_74 = arith.constant 0 : index
      %c0_75 = arith.constant 0 : index
      %220 = vector.load %arg2[%c0_73, %c0_74, %c0_75] : memref<2x8x128xf32, #tpu.memory_space<vmem>>, vector<2x8x128xf32>
      %c0_76 = arith.constant 0 : index
      %c0_77 = arith.constant 0 : index
      %c0_78 = arith.constant 0 : index
      %221 = vector.load %arg15[%c0_76, %c0_77, %c0_78] : memref<2x8x128xf32, #tpu.memory_space<vmem>>, vector<2x8x128xf32>
      tpu.vector_store %arg15[%c0_76, %c0_77, %c0_78], %220 {strides = array<i32>} : memref<2x8x128xf32, #tpu.memory_space<vmem>>, vector<2x8x128xf32>,
    } else {
    }
    %c0 = arith.constant 0 : index
    %c0_1 = arith.constant 0 : index
    %c0_2 = arith.constant 0 : index
    %3 = vector.load %arg15[%c0, %c0_1, %c0_2] : memref<2x8x128xf32, #tpu.memory_space<vmem>>, vector<2x8x128xf32>
    %4 = vector.shape_cast %3 : vector<2x8x128xf32> to vector<16x128xf32>
    %c0_3 = arith.constant 0 : index
    %c0_4 = arith.constant 0 : index
    %c0_5 = arith.constant 0 : index
    %5 = vector.load %arg3[%c0_3, %c0_4, %c0_5] : memref<1x1x128xf32, #tpu.memory_space<vmem>>, vector<1x1x128xf32>
    %6 = vector.shape_cast %5 : vector<1x1x128xf32> to vector<1x128xf32>
    %c0_6 = arith.constant 0 : index
    %c0_7 = arith.constant 0 : index
    %c0_8 = arith.constant 0 : index
    %7 = vector.load %arg4[%c0_6, %c0_7, %c0_8] : memref<1x1x128xf32, #tpu.memory_space<vmem>>, vector<1x1x128xf32>
    %8 = vector.shape_cast %7 : vector<1x1x128xf32> to vector<1x128xf32>
    %cst = arith.constant dense<0.000000e+00> : vector<16xf32>
    %9 = vector.multi_reduction <add>, %4, %cst [1] : vector<16x128xf32> to vector<16xf32>
    %10 = vector.shape_cast %9 : vector<16xf32> to vector<16x1xf32>
    %cst_9 = arith.constant 1.280000e+02 : f32
    %11 = vector.broadcast %cst_9 : f32 to vector<16x1xf32>
    %12 = arith.divf %10, %11 : vector<16x1xf32>
    %13 = vector.broadcast %12 : vector<16x1xf32> to vector<16x128xf32>
    %14 = arith.subf %4, %13 : vector<16x128xf32>
    %15 = arith.mulf %14, %14 : vector<16x128xf32>
    %cst_10 = arith.constant dense<0.000000e+00> : vector<16xf32>
    %16 = vector.multi_reduction <add>, %15, %cst_10 [1] : vector<16x128xf32> to vector<16xf32>
    %17 = vector.shape_cast %16 : vector<16xf32> to vector<16x1xf32>
    %cst_11 = arith.constant 1.280000e+02 : f32
    %18 = vector.broadcast %cst_11 : f32 to vector<16x1xf32>
    %19 = arith.divf %17, %18 : vector<16x1xf32>
    %20 = vector.broadcast %12 : vector<16x1xf32> to vector<16x128xf32>
    %21 = arith.subf %4, %20 : vector<16x128xf32>
    %cst_12 = arith.constant 9.99999974E-6 : f32
    %22 = vector.broadcast %cst_12 : f32 to vector<16x1xf32>
    %23 = arith.addf %19, %22 : vector<16x1xf32>
    %24 = math.rsqrt %23 : vector<16x1xf32>
    %25 = vector.broadcast %24 : vector<16x1xf32> to vector<16x128xf32>
    %26 = arith.mulf %21, %25 : vector<16x128xf32>
    %27 = vector.broadcast %6 : vector<1x128xf32> to vector<16x128xf32>
    %28 = arith.mulf %26, %27 : vector<16x128xf32>
    %29 = vector.broadcast %8 : vector<1x128xf32> to vector<16x128xf32>
    %30 = arith.addf %28, %29 : vector<16x128xf32>
    %31 = arith.truncf %30 : vector<16x128xf32> to vector<16x128xbf16>
    %c0_13 = arith.constant 0 : index
    %c0_14 = arith.constant 0 : index
    %c0_15 = arith.constant 0 : index
    %32 = vector.load %arg5[%c0_13, %c0_14, %c0_15] : memref<1x128x384xbf16, #tpu.memory_space<vmem>>, vector<1x128x384xbf16>
    %33 = vector.shape_cast %32 : vector<1x128x384xbf16> to vector<128x384xbf16>
    %cst_16 = arith.constant dense<0.000000e+00> : vector<16x384xf32>
    %34 = tpu.matmul %31, %33, %cst_16 {dimension_numbers = #tpu.dot_dimension_numbers<[1], [0], [0], [1], [0, 0, 1, 1], [], []>} : vector<16x128xbf16>, vector<128x384xbf16>, vector<16x384xf32> -> vector<16x384xf32>
    %35 = arith.truncf %34 : vector<16x384xf32> to vector<16x384xbf16>
    %36 = vector.extract_strided_slice %35 {offsets = [0, 0], sizes = [16, 128], strides = [1, 1]} : vector<16x384xbf16> to vector<16x128xbf16>
    %37 = vector.extract_strided_slice %36 {offsets = [0, 0], sizes = [8, 32], strides = [1, 1]} : vector<16x128xbf16> to vector<8x32xbf16>
    %38 = vector.extract_strided_slice %36 {offsets = [0, 32], sizes = [8, 32], strides = [1, 1]} : vector<16x128xbf16> to vector<8x32xbf16>
    %39 = vector.extract_strided_slice %36 {offsets = [0, 64], sizes = [8, 32], strides = [1, 1]} : vector<16x128xbf16> to vector<8x32xbf16>
    %40 = vector.extract_strided_slice %36 {offsets = [0, 96], sizes = [8, 32], strides = [1, 1]} : vector<16x128xbf16> to vector<8x32xbf16>
    %41 = vector.extract_strided_slice %36 {offsets = [8, 0], sizes = [8, 32], strides = [1, 1]} : vector<16x128xbf16> to vector<8x32xbf16>
    %42 = vector.extract_strided_slice %36 {offsets = [8, 32], sizes = [8, 32], strides = [1, 1]} : vector<16x128xbf16> to vector<8x32xbf16>
    %43 = vector.extract_strided_slice %36 {offsets = [8, 64], sizes = [8, 32], strides = [1, 1]} : vector<16x128xbf16> to vector<8x32xbf16>
    %44 = vector.extract_strided_slice %36 {offsets = [8, 96], sizes = [8, 32], strides = [1, 1]} : vector<16x128xbf16> to vector<8x32xbf16>
    %45 = vector.shape_cast %37 : vector<8x32xbf16> to vector<1x8x32xbf16>
    %46 = vector.shape_cast %38 : vector<8x32xbf16> to vector<1x8x32xbf16>
    %47 = vector.shape_cast %39 : vector<8x32xbf16> to vector<1x8x32xbf16>
    %48 = vector.shape_cast %40 : vector<8x32xbf16> to vector<1x8x32xbf16>
    %49 = vector.shape_cast %41 : vector<8x32xbf16> to vector<1x8x32xbf16>
    %50 = vector.shape_cast %42 : vector<8x32xbf16> to vector<1x8x32xbf16>
    %51 = vector.shape_cast %43 : vector<8x32xbf16> to vector<1x8x32xbf16>
    %52 = vector.shape_cast %44 : vector<8x32xbf16> to vector<1x8x32xbf16>
    %53 = tpu.concatenate %45, %46, %47, %48, %49, %50, %51, %52 in 0 : vector<1x8x32xbf16>, vector<1x8x32xbf16>, vector<1x8x32xbf16>, vector<1x8x32xbf16>, vector<1x8x32xbf16>, vector<1x8x32xbf16>, vector<1x8x32xbf16>, vector<1x8x32xbf16> -> vector<8x8x32xbf16>
    %54 = vector.extract_strided_slice %35 {offsets = [0, 128], sizes = [16, 128], strides = [1, 1]} : vector<16x384xbf16> to vector<16x128xbf16>
    %55 = vector.extract_strided_slice %54 {offsets = [0, 0], sizes = [8, 32], strides = [1, 1]} : vector<16x128xbf16> to vector<8x32xbf16>
    %56 = vector.extract_strided_slice %54 {offsets = [0, 32], sizes = [8, 32], strides = [1, 1]} : vector<16x128xbf16> to vector<8x32xbf16>
    %57 = vector.extract_strided_slice %54 {offsets = [0, 64], sizes = [8, 32], strides = [1, 1]} : vector<16x128xbf16> to vector<8x32xbf16>
    %58 = vector.extract_strided_slice %54 {offsets = [0, 96], sizes = [8, 32], strides = [1, 1]} : vector<16x128xbf16> to vector<8x32xbf16>
    %59 = vector.extract_strided_slice %54 {offsets = [8, 0], sizes = [8, 32], strides = [1, 1]} : vector<16x128xbf16> to vector<8x32xbf16>
    %60 = vector.extract_strided_slice %54 {offsets = [8, 32], sizes = [8, 32], strides = [1, 1]} : vector<16x128xbf16> to vector<8x32xbf16>
    %61 = vector.extract_strided_slice %54 {offsets = [8, 64], sizes = [8, 32], strides = [1, 1]} : vector<16x128xbf16> to vector<8x32xbf16>
    %62 = vector.extract_strided_slice %54 {offsets = [8, 96], sizes = [8, 32], strides = [1, 1]} : vector<16x128xbf16> to vector<8x32xbf16>
    %63 = vector.shape_cast %55 : vector<8x32xbf16> to vector<1x8x32xbf16>
    %64 = vector.shape_cast %56 : vector<8x32xbf16> to vector<1x8x32xbf16>
    %65 = vector.shape_cast %57 : vector<8x32xbf16> to vector<1x8x32xbf16>
    %66 = vector.shape_cast %58 : vector<8x32xbf16> to vector<1x8x32xbf16>
    %67 = vector.shape_cast %59 : vector<8x32xbf16> to vector<1x8x32xbf16>
    %68 = vector.shape_cast %60 : vector<8x32xbf16> to vector<1x8x32xbf16>
    %69 = vector.shape_cast %61 : vector<8x32xbf16> to vector<1x8x32xbf16>
    %70 = vector.shape_cast %62 : vector<8x32xbf16> to vector<1x8x32xbf16>
    %71 = tpu.concatenate %63, %64, %65, %66, %67, %68, %69, %70 in 0 : vector<1x8x32xbf16>, vector<1x8x32xbf16>, vector<1x8x32xbf16>, vector<1x8x32xbf16>, vector<1x8x32xbf16>, vector<1x8x32xbf16>, vector<1x8x32xbf16>, vector<1x8x32xbf16> -> vector<8x8x32xbf16>
    %72 = vector.extract_strided_slice %35 {offsets = [0, 256], sizes = [16, 128], strides = [1, 1]} : vector<16x384xbf16> to vector<16x128xbf16>
    %73 = vector.extract_strided_slice %72 {offsets = [0, 0], sizes = [8, 32], strides = [1, 1]} : vector<16x128xbf16> to vector<8x32xbf16>
    %74 = vector.extract_strided_slice %72 {offsets = [0, 32], sizes = [8, 32], strides = [1, 1]} : vector<16x128xbf16> to vector<8x32xbf16>
    %75 = vector.extract_strided_slice %72 {offsets = [0, 64], sizes = [8, 32], strides = [1, 1]} : vector<16x128xbf16> to vector<8x32xbf16>
    %76 = vector.extract_strided_slice %72 {offsets = [0, 96], sizes = [8, 32], strides = [1, 1]} : vector<16x128xbf16> to vector<8x32xbf16>
    %77 = vector.extract_strided_slice %72 {offsets = [8, 0], sizes = [8, 32], strides = [1, 1]} : vector<16x128xbf16> to vector<8x32xbf16>
    %78 = vector.extract_strided_slice %72 {offsets = [8, 32], sizes = [8, 32], strides = [1, 1]} : vector<16x128xbf16> to vector<8x32xbf16>
    %79 = vector.extract_strided_slice %72 {offsets = [8, 64], sizes = [8, 32], strides = [1, 1]} : vector<16x128xbf16> to vector<8x32xbf16>
    %80 = vector.extract_strided_slice %72 {offsets = [8, 96], sizes = [8, 32], strides = [1, 1]} : vector<16x128xbf16> to vector<8x32xbf16>
    %81 = vector.shape_cast %73 : vector<8x32xbf16> to vector<1x8x32xbf16>
    %82 = vector.shape_cast %74 : vector<8x32xbf16> to vector<1x8x32xbf16>
    %83 = vector.shape_cast %75 : vector<8x32xbf16> to vector<1x8x32xbf16>
    %84 = vector.shape_cast %76 : vector<8x32xbf16> to vector<1x8x32xbf16>
    %85 = vector.shape_cast %77 : vector<8x32xbf16> to vector<1x8x32xbf16>
    %86 = vector.shape_cast %78 : vector<8x32xbf16> to vector<1x8x32xbf16>
    %87 = vector.shape_cast %79 : vector<8x32xbf16> to vector<1x8x32xbf16>
    %88 = vector.shape_cast %80 : vector<8x32xbf16> to vector<1x8x32xbf16>
    %89 = tpu.concatenate %81, %82, %83, %84, %85, %86, %87, %88 in 0 : vector<1x8x32xbf16>, vector<1x8x32xbf16>, vector<1x8x32xbf16>, vector<1x8x32xbf16>, vector<1x8x32xbf16>, vector<1x8x32xbf16>, vector<1x8x32xbf16>, vector<1x8x32xbf16> -> vector<8x8x32xbf16>
    "tpu.trace_start"() <{level = 10 : i32, message = "hqe,hke->hqk"}> : () -> ()
    %cst_17 = arith.constant dense<0.000000e+00> : vector<8x8x8xf32>
    %90 = tpu.matmul %53, %71, %cst_17 {dimension_numbers = #tpu.dot_dimension_numbers<[2], [2], [1], [1], [0, 0, 0, 1, 1, 1], [0], [0]>} : vector<8x8x32xbf16>, vector<8x8x32xbf16>, vector<8x8x8xf32> -> vector<8x8x8xf32>
    "tpu.trace_stop"() : () -> ()
    %cst_18 = arith.constant dense<0xFF800000> : vector<8x8xf32>
    %91 = vector.multi_reduction <maximumf>, %90, %cst_18 [2] : vector<8x8x8xf32> to vector<8x8xf32>
    %92 = vector.shape_cast %91 : vector<8x8xf32> to vector<8x8x1xf32>
    %93 = vector.broadcast %92 : vector<8x8x1xf32> to vector<8x8x8xf32>
    %94 = arith.subf %90, %93 : vector<8x8x8xf32>
    %95 = math.exp %94 : vector<8x8x8xf32>
    %cst_19 = arith.constant dense<0.000000e+00> : vector<8x8xf32>
    %96 = vector.multi_reduction <add>, %95, %cst_19 [2] : vector<8x8x8xf32> to vector<8x8xf32>
    %97 = vector.shape_cast %96 : vector<8x8xf32> to vector<8x8x1xf32>
    %cst_20 = arith.constant 1.000000e+00 : f32
    %98 = vector.broadcast %cst_20 : f32 to vector<8x8x1xf32>
    %99 = arith.divf %98, %97 : vector<8x8x1xf32>
    %100 = vector.broadcast %99 : vector<8x8x1xf32> to vector<8x8x8xf32>
    %101 = arith.mulf %95, %100 : vector<8x8x8xf32>
    %102 = arith.truncf %101 : vector<8x8x8xf32> to vector<8x8x8xbf16>
    "tpu.trace_start"() <{level = 10 : i32, message = "hqk,hke->hqe"}> : () -> ()
    %cst_21 = arith.constant dense<0.000000e+00> : vector<8x8x32xf32>
    %103 = tpu.matmul %102, %89, %cst_21 {dimension_numbers = #tpu.dot_dimension_numbers<[2], [1], [1], [2], [0, 0, 0, 1, 1, 2], [0], [0]>} : vector<8x8x8xbf16>, vector<8x8x32xbf16>, vector<8x8x32xf32> -> vector<8x8x32xf32>
    "tpu.trace_stop"() : () -> ()
    %104 = vector.extract_strided_slice %103 {offsets = [0, 0, 0], sizes = [1, 8, 32], strides = [1, 1, 1]} : vector<8x8x32xf32> to vector<1x8x32xf32>
    %105 = vector.shape_cast %104 : vector<1x8x32xf32> to vector<8x32xf32>
    %106 = vector.extract_strided_slice %103 {offsets = [1, 0, 0], sizes = [1, 8, 32], strides = [1, 1, 1]} : vector<8x8x32xf32> to vector<1x8x32xf32>
    %107 = vector.shape_cast %106 : vector<1x8x32xf32> to vector<8x32xf32>
    %108 = vector.extract_strided_slice %103 {offsets = [2, 0, 0], sizes = [1, 8, 32], strides = [1, 1, 1]} : vector<8x8x32xf32> to vector<1x8x32xf32>
    %109 = vector.shape_cast %108 : vector<1x8x32xf32> to vector<8x32xf32>
    %110 = vector.extract_strided_slice %103 {offsets = [3, 0, 0], sizes = [1, 8, 32], strides = [1, 1, 1]} : vector<8x8x32xf32> to vector<1x8x32xf32>
    %111 = vector.shape_cast %110 : vector<1x8x32xf32> to vector<8x32xf32>
    %112 = tpu.concatenate %105, %107, %109, %111 in 1 : vector<8x32xf32>, vector<8x32xf32>, vector<8x32xf32>, vector<8x32xf32> -> vector<8x128xf32>
    %113 = vector.extract_strided_slice %103 {offsets = [4, 0, 0], sizes = [1, 8, 32], strides = [1, 1, 1]} : vector<8x8x32xf32> to vector<1x8x32xf32>
    %114 = vector.shape_cast %113 : vector<1x8x32xf32> to vector<8x32xf32>
    %115 = vector.extract_strided_slice %103 {offsets = [5, 0, 0], sizes = [1, 8, 32], strides = [1, 1, 1]} : vector<8x8x32xf32> to vector<1x8x32xf32>
    %116 = vector.shape_cast %115 : vector<1x8x32xf32> to vector<8x32xf32>
    %117 = vector.extract_strided_slice %103 {offsets = [6, 0, 0], sizes = [1, 8, 32], strides = [1, 1, 1]} : vector<8x8x32xf32> to vector<1x8x32xf32>
    %118 = vector.shape_cast %117 : vector<1x8x32xf32> to vector<8x32xf32>
    %119 = vector.extract_strided_slice %103 {offsets = [7, 0, 0], sizes = [1, 8, 32], strides = [1, 1, 1]} : vector<8x8x32xf32> to vector<1x8x32xf32>
    %120 = vector.shape_cast %119 : vector<1x8x32xf32> to vector<8x32xf32>
    %121 = tpu.concatenate %114, %116, %118, %120 in 1 : vector<8x32xf32>, vector<8x32xf32>, vector<8x32xf32>, vector<8x32xf32> -> vector<8x128xf32>
    %122 = tpu.concatenate %112, %121 in 0 : vector<8x128xf32>, vector<8x128xf32> -> vector<16x128xf32>
    %123 = arith.truncf %122 : vector<16x128xf32> to vector<16x128xbf16>
    %c0_22 = arith.constant 0 : index
    %c0_23 = arith.constant 0 : index
    %c0_24 = arith.constant 0 : index
    %124 = vector.load %arg6[%c0_22, %c0_23, %c0_24] : memref<1x128x128xbf16, #tpu.memory_space<vmem>>, vector<1x128x128xbf16>
    %125 = vector.shape_cast %124 : vector<1x128x128xbf16> to vector<128x128xbf16>
    %cst_25 = arith.constant dense<0.000000e+00> : vector<16x128xf32>
    %126 = tpu.matmul %123, %125, %cst_25 {dimension_numbers = #tpu.dot_dimension_numbers<[1], [0], [0], [1], [0, 0, 1, 1], [], []>} : vector<16x128xbf16>, vector<128x128xbf16>, vector<16x128xf32> -> vector<16x128xf32>
    %c0_26 = arith.constant 0 : index
    %c0_27 = arith.constant 0 : index
    %c0_28 = arith.constant 0 : index
    %127 = vector.load %arg7[%c0_26, %c0_27, %c0_28] : memref<1x1x128xf32, #tpu.memory_space<vmem>>, vector<1x1x128xf32>
    %128 = vector.shape_cast %127 : vector<1x1x128xf32> to vector<1x128xf32>
    %129 = vector.broadcast %128 : vector<1x128xf32> to vector<16x128xf32>
    %130 = arith.addf %126, %129 : vector<16x128xf32>
    %131 = arith.addf %4, %130 : vector<16x128xf32>
    %c0_29 = arith.constant 0 : index
    %c0_30 = arith.constant 0 : index
    %c0_31 = arith.constant 0 : index
    %132 = vector.load %arg8[%c0_29, %c0_30, %c0_31] : memref<1x1x128xf32, #tpu.memory_space<vmem>>, vector<1x1x128xf32>
    %133 = vector.shape_cast %132 : vector<1x1x128xf32> to vector<1x128xf32>
    %c0_32 = arith.constant 0 : index
    %c0_33 = arith.constant 0 : index
    %c0_34 = arith.constant 0 : index
    %134 = vector.load %arg9[%c0_32, %c0_33, %c0_34] : memref<1x1x128xf32, #tpu.memory_space<vmem>>, vector<1x1x128xf32>
    %135 = vector.shape_cast %134 : vector<1x1x128xf32> to vector<1x128xf32>
    %cst_35 = arith.constant dense<0.000000e+00> : vector<16xf32>
    %136 = vector.multi_reduction <add>, %131, %cst_35 [1] : vector<16x128xf32> to vector<16xf32>
    %137 = vector.shape_cast %136 : vector<16xf32> to vector<16x1xf32>
    %cst_36 = arith.constant 1.280000e+02 : f32
    %138 = vector.broadcast %cst_36 : f32 to vector<16x1xf32>
    %139 = arith.divf %137, %138 : vector<16x1xf32>
    %140 = vector.broadcast %139 : vector<16x1xf32> to vector<16x128xf32>
    %141 = arith.subf %131, %140 : vector<16x128xf32>
    %142 = arith.mulf %141, %141 : vector<16x128xf32>
    %cst_37 = arith.constant dense<0.000000e+00> : vector<16xf32>
    %143 = vector.multi_reduction <add>, %142, %cst_37 [1] : vector<16x128xf32> to vector<16xf32>
    %144 = vector.shape_cast %143 : vector<16xf32> to vector<16x1xf32>
    %cst_38 = arith.constant 1.280000e+02 : f32
    %145 = vector.broadcast %cst_38 : f32 to vector<16x1xf32>
    %146 = arith.divf %144, %145 : vector<16x1xf32>
    %147 = vector.broadcast %139 : vector<16x1xf32> to vector<16x128xf32>
    %148 = arith.subf %131, %147 : vector<16x128xf32>
    %cst_39 = arith.constant 9.99999974E-6 : f32
    %149 = vector.broadcast %cst_39 : f32 to vector<16x1xf32>
    %150 = arith.addf %146, %149 : vector<16x1xf32>
    %151 = math.rsqrt %150 : vector<16x1xf32>
    %152 = vector.broadcast %151 : vector<16x1xf32> to vector<16x128xf32>
    %153 = arith.mulf %148, %152 : vector<16x128xf32>
    %154 = vector.broadcast %133 : vector<1x128xf32> to vector<16x128xf32>
    %155 = arith.mulf %153, %154 : vector<16x128xf32>
    %156 = vector.broadcast %135 : vector<1x128xf32> to vector<16x128xf32>
    %157 = arith.addf %155, %156 : vector<16x128xf32>
    %158 = arith.truncf %157 : vector<16x128xf32> to vector<16x128xbf16>
    %c0_40 = arith.constant 0 : index
    %c0_41 = arith.constant 0 : index
    %c0_42 = arith.constant 0 : index
    %159 = vector.load %arg10[%c0_40, %c0_41, %c0_42] : memref<1x128x512xbf16, #tpu.memory_space<vmem>>, vector<1x128x512xbf16>
    %160 = vector.shape_cast %159 : vector<1x128x512xbf16> to vector<128x512xbf16>
    %cst_43 = arith.constant dense<0.000000e+00> : vector<16x512xf32>
    %161 = tpu.matmul %158, %160, %cst_43 {dimension_numbers = #tpu.dot_dimension_numbers<[1], [0], [0], [1], [0, 0, 1, 1], [], []>} : vector<16x128xbf16>, vector<128x512xbf16>, vector<16x512xf32> -> vector<16x512xf32>
    %c0_44 = arith.constant 0 : index
    %c0_45 = arith.constant 0 : index
    %c0_46 = arith.constant 0 : index
    %162 = vector.load %arg11[%c0_44, %c0_45, %c0_46] : memref<1x1x512xf32, #tpu.memory_space<vmem>>, vector<1x1x512xf32>
    %163 = vector.shape_cast %162 : vector<1x1x512xf32> to vector<1x512xf32>
    %164 = vector.broadcast %163 : vector<1x512xf32> to vector<16x512xf32>
    %165 = arith.addf %161, %164 : vector<16x512xf32>
    %cst_47 = arith.constant 5.000000e-01 : f32
    %166 = vector.broadcast %cst_47 : f32 to vector<16x512xf32>
    %167 = arith.mulf %166, %165 : vector<16x512xf32>
    %cst_48 = arith.constant 0.707106769 : f32
    %168 = vector.broadcast %cst_48 : f32 to vector<16x512xf32>
    %169 = arith.mulf %165, %168 : vector<16x512xf32>
    %cst_49 = arith.constant 0.000000e+00 : f32
    %170 = vector.broadcast %cst_49 : f32 to vector<16x512xf32>
    %171 = arith.cmpf oge, %169, %170 : vector<16x512xf32>
    %cst_50 = arith.constant 1.000000e+00 : f32
    %cst_51 = arith.constant -1.000000e+00 : f32
    %172 = vector.broadcast %cst_50 : f32 to vector<16x512xf32>
    %173 = vector.broadcast %cst_51 : f32 to vector<16x512xf32>
    %174 = arith.select %171, %172, %173 : vector<16x512xi1>, vector<16x512xf32>
    %175 = math.absf %169 : vector<16x512xf32>
    %cst_52 = arith.constant 0.327591091 : f32
    %176 = vector.broadcast %cst_52 : f32 to vector<16x512xf32>
    %177 = arith.mulf %176, %175 : vector<16x512xf32>
    %cst_53 = arith.constant 1.000000e+00 : f32
    %178 = vector.broadcast %cst_53 : f32 to vector<16x512xf32>
    %179 = arith.addf %178, %177 : vector<16x512xf32>
    %180 = tpu.reciprocal %179 {approx = true} : vector<16x512xf32> -> vector<16x512xf32>
    %cst_54 = arith.constant 1.06140542 : f32
    %181 = vector.broadcast %cst_54 : f32 to vector<16x512xf32>
    %182 = arith.mulf %181, %180 : vector<16x512xf32>
    %cst_55 = arith.constant -1.45315206 : f32
    %183 = vector.broadcast %cst_55 : f32 to vector<16x512xf32>
    %184 = arith.addf %182, %183 : vector<16x512xf32>
    %185 = arith.mulf %184, %180 : vector<16x512xf32>
    %cst_56 = arith.constant 1.42141378 : f32
    %186 = vector.broadcast %cst_56 : f32 to vector<16x512xf32>
    %187 = arith.addf %185, %186 : vector<16x512xf32>
    %188 = arith.mulf %187, %180 : vector<16x512xf32>
    %cst_57 = arith.constant -0.284496725 : f32
    %189 = vector.broadcast %cst_57 : f32 to vector<16x512xf32>
    %190 = arith.addf %188, %189 : vector<16x512xf32>
    %191 = arith.mulf %190, %180 : vector<16x512xf32>
    %cst_58 = arith.constant 0.254829586 : f32
    %192 = vector.broadcast %cst_58 : f32 to vector<16x512xf32>
    %193 = arith.addf %191, %192 : vector<16x512xf32>
    %194 = arith.mulf %193, %180 : vector<16x512xf32>
    %cst_59 = arith.constant 0.000000e+00 : f32
    %195 = vector.broadcast %cst_59 : f32 to vector<16x512xf32>
    %196 = arith.subf %195, %175 : vector<16x512xf32>
    %197 = arith.mulf %196, %175 : vector<16x512xf32>
    %198 = math.exp %197 : vector<16x512xf32>
    %199 = arith.mulf %194, %198 : vector<16x512xf32>
    %cst_60 = arith.constant 1.000000e+00 : f32
    %200 = vector.broadcast %cst_60 : f32 to vector<16x512xf32>
    %201 = arith.subf %200, %199 : vector<16x512xf32>
    %202 = arith.mulf %174, %201 : vector<16x512xf32>
    %cst_61 = arith.constant 1.000000e+00 : f32
    %203 = vector.broadcast %cst_61 : f32 to vector<16x512xf32>
    %204 = arith.addf %203, %202 : vector<16x512xf32>
    %205 = arith.mulf %167, %204 : vector<16x512xf32>
    %206 = arith.truncf %205 : vector<16x512xf32> to vector<16x512xbf16>
    %c0_62 = arith.constant 0 : index
    %c0_63 = arith.constant 0 : index
    %c0_64 = arith.constant 0 : index
    %207 = vector.load %arg12[%c0_62, %c0_63, %c0_64] : memref<1x512x128xbf16, #tpu.memory_space<vmem>>, vector<1x512x128xbf16>
    %208 = vector.shape_cast %207 : vector<1x512x128xbf16> to vector<512x128xbf16>
    %cst_65 = arith.constant dense<0.000000e+00> : vector<16x128xf32>
    %209 = tpu.matmul %206, %208, %cst_65 {dimension_numbers = #tpu.dot_dimension_numbers<[1], [0], [0], [1], [0, 0, 1, 1], [], []>} : vector<16x512xbf16>, vector<512x128xbf16>, vector<16x128xf32> -> vector<16x128xf32>
    %c0_66 = arith.constant 0 : index
    %c0_67 = arith.constant 0 : index
    %c0_68 = arith.constant 0 : index
    %210 = vector.load %arg13[%c0_66, %c0_67, %c0_68] : memref<1x1x128xf32, #tpu.memory_space<vmem>>, vector<1x1x128xf32>
    %211 = vector.shape_cast %210 : vector<1x1x128xf32> to vector<1x128xf32>
    %212 = vector.broadcast %211 : vector<1x128xf32> to vector<16x128xf32>
    %213 = arith.addf %209, %212 : vector<16x128xf32>
    %214 = arith.addf %131, %213 : vector<16x128xf32>
    %215 = vector.shape_cast %214 : vector<16x128xf32> to vector<2x8x128xf32>
    %c0_69 = arith.constant 0 : index
    %c0_70 = arith.constant 0 : index
    %c0_71 = arith.constant 0 : index
    %216 = vector.load %arg15[%c0_69, %c0_70, %c0_71] : memref<2x8x128xf32, #tpu.memory_space<vmem>>, vector<2x8x128xf32>
    tpu.vector_store %arg15[%c0_69, %c0_70, %c0_71], %215 {strides = array<i32>} : memref<2x8x128xf32, #tpu.memory_space<vmem>>, vector<2x8x128xf32>,
    %c1_i32 = arith.constant 1 : i32
    %217 = arith.cmpi eq, %arg1, %c1_i32 : i32
    %218 = arith.extui %217 : i1 to i32
    %c0_i32_72 = arith.constant 0 : i32
    %219 = arith.cmpi ne, %218, %c0_i32_72 : i32
    scf.if %219 {
      %c0_73 = arith.constant 0 : index
      %c0_74 = arith.constant 0 : index
      %c0_75 = arith.constant 0 : index
      %220 = vector.load %arg14[%c0_73, %c0_74, %c0_75] : memref<2x8x128xf32, #tpu.memory_space<vmem>>, vector<2x8x128xf32>
      tpu.vector_store %arg14[%c0_73, %c0_74, %c0_75], %215 {strides = array<i32>} : memref<2x8x128xf32, #tpu.memory_space<vmem>>, vector<2x8x128xf32>,
    } else {
    }
    return
  }
  func.func @transform_0(%arg0: i32, %arg1: i32) -> (i32, i32, i32) {
    %c0_i32 = arith.constant 0 : i32
    %c0_i32_0 = arith.constant 0 : i32
    %c0_i32_1 = arith.constant 0 : i32
    return %arg0, %c0_i32, %c0_i32_0 : i32, i32, i32
  }
  func.func @transform_1(%arg0: i32, %arg1: i32) -> (i32, i32, i32) {
    %c0_i32 = arith.constant 0 : i32
    %c0_i32_0 = arith.constant 0 : i32
    %c0_i32_1 = arith.constant 0 : i32
    return %arg1, %c0_i32, %c0_i32_0 : i32, i32, i32
  }
  func.func @transform_2(%arg0: i32, %arg1: i32) -> (i32, i32, i32) {
    %c0_i32 = arith.constant 0 : i32
    %c0_i32_0 = arith.constant 0 : i32
    %c0_i32_1 = arith.constant 0 : i32
    return %arg1, %c0_i32, %c0_i32_0 : i32, i32, i32
  }
  func.func @transform_3(%arg0: i32, %arg1: i32) -> (i32, i32, i32) {
    %c0_i32 = arith.constant 0 : i32
    %c0_i32_0 = arith.constant 0 : i32
    %c0_i32_1 = arith.constant 0 : i32
    return %arg1, %c0_i32, %c0_i32_0 : i32, i32, i32
  }
  func.func @transform_4(%arg0: i32, %arg1: i32) -> (i32, i32, i32) {
    %c0_i32 = arith.constant 0 : i32
    %c0_i32_0 = arith.constant 0 : i32
    %c0_i32_1 = arith.constant 0 : i32
    return %arg1, %c0_i32, %c0_i32_0 : i32, i32, i32
  }
  func.func @transform_5(%arg0: i32, %arg1: i32) -> (i32, i32, i32) {
    %c0_i32 = arith.constant 0 : i32
    %c0_i32_0 = arith.constant 0 : i32
    %c0_i32_1 = arith.constant 0 : i32
    return %arg1, %c0_i32, %c0_i32_0 : i32, i32, i32
  }
  func.func @transform_6(%arg0: i32, %arg1: i32) -> (i32, i32, i32) {
    %c0_i32 = arith.constant 0 : i32
    %c0_i32_0 = arith.constant 0 : i32
    %c0_i32_1 = arith.constant 0 : i32
    return %arg1, %c0_i32, %c0_i32_0 : i32, i32, i32
  }
  func.func @transform_7(%arg0: i32, %arg1: i32) -> (i32, i32, i32) {
    %c0_i32 = arith.constant 0 : i32
    %c0_i32_0 = arith.constant 0 : i32
    %c0_i32_1 = arith.constant 0 : i32
    return %arg1, %c0_i32, %c0_i32_0 : i32, i32, i32
  }
  func.func @transform_8(%arg0: i32, %arg1: i32) -> (i32, i32, i32) {
    %c0_i32 = arith.constant 0 : i32
    %c0_i32_0 = arith.constant 0 : i32
    %c0_i32_1 = arith.constant 0 : i32
    return %arg1, %c0_i32, %c0_i32_0 : i32, i32, i32
  }
  func.func @transform_9(%arg0: i32, %arg1: i32) -> (i32, i32, i32) {
    %c0_i32 = arith.constant 0 : i32
    %c0_i32_0 = arith.constant 0 : i32
    %c0_i32_1 = arith.constant 0 : i32
    return %arg1, %c0_i32, %c0_i32_0 : i32, i32, i32
  }
  func.func @transform_10(%arg0: i32, %arg1: i32) -> (i32, i32, i32) {
    %c0_i32 = arith.constant 0 : i32
    %c0_i32_0 = arith.constant 0 : i32
    %c0_i32_1 = arith.constant 0 : i32
    return %arg1, %c0_i32, %c0_i32_0 : i32, i32, i32
  }
  func.func @transform_11(%arg0: i32, %arg1: i32) -> (i32, i32, i32) {
    %c0_i32 = arith.constant 0 : i32
    %c0_i32_0 = arith.constant 0 : i32
    %c0_i32_1 = arith.constant 0 : i32
    return %arg1, %c0_i32, %c0_i32_0 : i32, i32, i32
  }
  func.func @transform_12(%arg0: i32, %arg1: i32) -> (i32, i32, i32) {
    %c0_i32 = arith.constant 0 : i32
    %c0_i32_0 = arith.constant 0 : i32
    %c0_i32_1 = arith.constant 0 : i32
    return %arg0, %c0_i32, %c0_i32_0 : i32, i32, i32
  }
}

</mosaic_0001>

<bundles_post_ra>
// kernel: tpu_custom_call.1
= control target key start
LH: loop header
LB: loop body
LE: loop exit
PB: predicated region body
PF: predicated region fallthrough
CT: control target
= control target key end

     0   :  { %s6262_s0 = inlined_call_operand.hbm [shape: f32[2,8,128], index: 0, kind: input, shape index: {}]   ;;  %s6263_s1 = inlined_call_operand.vmem [shape: f32[2,1,128], index: 1, kind: input, shape index: {}]   ;;  %s6264_s2 = inlined_call_operand.vmem [shape: f32[2,1,128], index: 2, kind: input, shape index: {}]   ;;  %s6265_s3 = inlined_call_operand.hbm [shape: bf16[2,128,384], index: 3, kind: input, shape index: {}]   ;;  %s6266_s4 = inlined_call_operand.hbm [shape: bf16[2,128,128], index: 4, kind: input, shape index: {}]   ;;  %s6267_s5 = inlined_call_operand.vmem [shape: f32[2,1,128], index: 5, kind: input, shape index: {}]   ;;  %s6268_s6 = inlined_call_operand.vmem [shape: f32[2,1,128], index: 6, kind: input, shape index: {}]   ;;  %s6269_s7 = inlined_call_operand.vmem [shape: f32[2,1,128], index: 7, kind: input, shape index: {}]   ;;  %s6270_s8 = inlined_call_operand.hbm [shape: bf16[2,128,512], index: 8, kind: input, shape index: {}]   ;;  %s6271_s9 = inlined_call_operand.vmem [shape: f32[2,1,512], index: 9, kind: input, shape index: {}]   ;;  %s6272_s10 = inlined_call_operand.hbm [shape: bf16[2,512,128], index: 10, kind: input, shape index: {}]   ;;  %s6273_s11 = inlined_call_operand.vmem [shape: f32[2,1,128], index: 11, kind: input, shape index: {}]   ;;  %s6274_s12 = inlined_call_operand.hbm [shape: f32[2,8,128], index: 12, kind: output, shape index: {}]  }
   0x1   :  { %6287 = sst [smem:[#allocation22_spill]] %s6262_s0 }
   0x2   :  { %6288 = sst [smem:[#allocation23_spill]] %s6265_s3 }
   0x3   :  { %6289 = sst [smem:[#allocation24_spill]] %s6266_s4 }
   0x4   :  { %6290 = sst [smem:[#allocation25_spill]] %s6268_s6 }
   0x5   :  { %6291 = sst [smem:[#allocation26_spill]] %s6269_s7 }
   0x6   :  { %6292 = sst [smem:[#allocation27_spill]] %s6270_s8 }
   0x7   :  { %6293 = sst [smem:[#allocation28_spill]] %s6271_s9 }
   0x8   :  { %6294 = sst [smem:[#allocation29_spill]] %s6272_s10 }
   0x9   :  { %6295 = sst [smem:[#allocation30_spill]] %s6273_s11 }
   0xa   :  { %6296 = sst [smem:[#allocation31_spill]] %s6274_s12 }
   0xb   :  { %17 = vsyncpa [#allocation4], 0 }
   0xc   :  { %18 = vsyncpa [#allocation7], 0 }
   0xd   :  { %20 = vsyncpa [#allocation7 + $0x1], 0 }
   0xe   :  { %21 = vsyncpa [#allocation10], 0 }
   0xf   :  { %23 = vsyncpa [#allocation10 + $0x1], 0 }
  0x10   :  { %24 = vsyncpa [#allocation5], 0  ;;  %s5246_s21 = smov 0   ;;  %s5248_s22 = smov 0  }
  0x11   :  { %s5250_s23 = smov 0   ;;  %s5252_s24 = smov 0  }
  0x12   :  { %s5254_s25 = smov 0   ;;  %s5256_s26 = smov 0  }
  0x13 LB: > { %6297 = sst [smem:[#allocation17_spill]] %s5142_s23  ;;  %s39_s27 = sadd.s32 1, %s5150_s25  ;;  %s5154_s26 = sphi %s5256_s26, %s30_s26   ;;  %s5150_s25 = sphi %s5254_s25, %s6334_s25   ;;  %s5146_s24 = sphi %s5252_s24, %s6333_s24   ;;  %s5142_s23 = sphi %s5250_s23, %s6332_s23   ;;  %s5138_s22 = sphi %s5248_s22, %s6336_s22   ;;  %s5134_s21 = sphi %s5246_s21, %s6335_s21  }
  0x14   : > { %6298 = sst [smem:[#allocation18_spill]] %s5150_s25  ;;  %s127_s28 = sadd.s32 1, %s5142_s23 }
  0x15   : > { %6299 = sst [smem:[#allocation19_spill]] %s5154_s26  ;;  %p40_p0 = scmp.ge.s32.totalorder %s39_s27, 2 }
  0x16   : > { %p134_p1 = scmp.ne.s32.totalorder %s5142_s23, %s5138_s22  ;;  %p135_p2 = scmp.eq.s32.totalorder %s5154_s26, 0 }
  0x17   : > { %s6338_s27 = smov (%p40_p0, %s39_s27), 0  ;;  %p4636_p4 = scmp.lt.s32.totalorder %s5154_s26, 2 }
  0x18   : > { %6300 = sst [smem:[#allocation20_spill]] %s6338_s27  ;;  %p136_p3 = por %p135_p2, %p134_p1 }
  0x19   : > { %s124_s29 = ssub.s32 %s5150_s25, %s6338_s27  ;;  %s5288_s13 = sand.u32 1, %s5142_s23  }
  0x1a   : > { %p125_p5 = scmp.eq.s32.totalorder %s124_s29, 0  ;;  %s4600_s14 = smul.u32 3072, %s5150_s25 }
  0x1b   : > { %s4599_s16 = smul.u32 192, %s5288_s13  ;;  %s6302_s3 = sld [smem:[#allocation23_spill]] }
  0x1c   : > { %s5292_s15 = scalar_select %p125_p5, %s5142_s23, %s127_s28  }
  0x1d   : > { %p5300_p6 = pnand %p4636_p4, %p136_p3  ;;  %s430_s29 = scalar_lea.vmem [#allocation6], %s4599_s16 }
  0x1e   : > { %6301 = sst [smem:[#allocation21_spill]] %s5292_s15  ;;  %s437_s30 = sshll.u32 %s430_s29, 4  ;;  %s5304_s30 = int_to_ptr.vmem [resolvable:$true] %s437_s30 }
  0x1f   : > { %s6303_s20 = scalar_select %p5300_p6, 1, 0 }
  0x20   : > { %s6304_s28 = sand.u32 1, %s5154_s26   ;;  %p5314_p8 = pneg %p5300_p6 }
  0x21   : > { %s5298_s19 = scalar_lea.hbm %s6302_s3, %s4600_s14  ;;  %s5308_s27 = scalar_lea.sflag [#allocation7], %s6304_s28 }
  0x22   : > { %s4918_s15 = scalar_lea.hbm %s5298_s19, 3072  ;;  %s4923_s16 = scalar_lea.hbm %s6302_s3, 6144 }
  0x23   : > { %p4919_p7 = scmp.ne.s32.totalorder %s5298_s19, %s4918_s15  ;;  %p4924_p11 = scmp.lt.u32.totalorder %s5298_s19, %s6302_s3 }
  0x24   : > { %s6305_s14 = scalar_select %p5314_p8, 1, 0 }
  0x25   : > { %p4921_p9 = pnand %p5314_p8, %p4919_p7  ;;  %p4925_p12 = scmp.lt.u32.totalorder %s4923_s16, %s4918_s15 }
  0x26   : > { %p4927_p0 = scmp.lt.u32.totalorder %s4918_s15, %s5298_s19 }
  0x27   : > { %p4922_p10 = pneg %p4921_p9  ;;  %p4926_p13 = por %p4925_p12, %p4924_p11 }
  0x29   : > { %p4928_p1 = por %p4927_p0, %p4926_p13 }
  0x2b   : > { %p4929_p2 = pnand %p4928_p1, %p4922_p10 }
  0x2d   : > { %4932 = shalt.err (!%p4929_p2)
}
  0x2e   : > { %s4933_s28 = scalar_lea.vmem %s5304_s30, 3072  ;;  %s5156_s17 = smov [#allocation6]  }
  0x2f   : > { %p4934_p3 = scmp.ne.s32.totalorder %s5304_s30, %s4933_s28  ;;  %s4938_s18 = sshll.u32 %s5156_s17, 4  ;;  %s4939_s18 = int_to_ptr.vmem [resolvable:$false] %s4938_s18 }
  0x30   : > { %s4940_s23 = scalar_lea.vmem %s4939_s18, 6144  ;;  %p4941_p7 = scmp.lt.s32.totalorder %s5304_s30, %s4939_s18 }
  0x31   : > { %p4936_p4 = pnand %p4934_p3, %p5314_p8  ;;  %p4942_p9 = scmp.lt.s32.totalorder %s4940_s23, %s4933_s28 }
  0x33   : > { %p4937_p5 = pneg %p4936_p4  ;;  %p4943_p11 = por %p4942_p9, %p4941_p7 }
  0x35   : > { %p4944_p12 = pnand %p4943_p11, %p4937_p5 }
  0x37   : > { %4947 = shalt.err (!%p4944_p12)
}
  0x38   : > { %s5157_s15 = smov 192   ;;  %s5158_s16 = smov 12  }
  0x39   : > { %4625 = dma.hbm_to_vmem [thread:$0]  (!%p5300_p6), %s5298_s19, 3072, %s5304_s30, %s5308_s27, %s5157_s15, %s5157_s15, %s5158_s16  }
  0x3a   : > { %s4214_s29 = sshll.u32 %s5288_s13, 8  ;;  %s4367_s17 = sshll.u32 %s5150_s25, 12 }
  0x3b   : > { %s6306_s8 = sld [smem:[#allocation27_spill]]  ;;  %s490_s3 = scalar_lea.vmem [#allocation9], %s4214_s29 }
  0x3c   : > { %s497_s12 = sshll.u32 %s490_s3, 4  ;;  %s6307_s11 = sand.u32 1, %s5154_s26   ;;  %s5349_s12 = int_to_ptr.vmem [resolvable:$true] %s497_s12 }
  0x3d   : > { %s5353_s9 = scalar_lea.sflag [#allocation10], %s6307_s11 }
  0x41   : > { %s5345_s23 = scalar_lea.hbm %s6306_s8, %s4367_s17  ;;  %s4953_s16 = scalar_lea.hbm %s6306_s8, 8192 }
  0x42   : > { %s4948_s30 = scalar_lea.hbm %s5345_s23, 4096  ;;  %p4954_p1 = scmp.lt.u32.totalorder %s5345_s23, %s6306_s8 }
  0x43   : > { %p4949_p10 = scmp.ne.s32.totalorder %s5345_s23, %s4948_s30  ;;  %p4955_p2 = scmp.lt.u32.totalorder %s4953_s16, %s4948_s30 }
  0x44   : > { %p4957_p4 = scmp.lt.u32.totalorder %s4948_s30, %s5345_s23 }
  0x45   : > { %p4951_p13 = pnand %p4949_p10, %p5314_p8  ;;  %p4956_p3 = por %p4955_p2, %p4954_p1 }
  0x47   : > { %p4952_p0 = pneg %p4951_p13  ;;  %p4958_p5 = por %p4957_p4, %p4956_p3 }
  0x49   : > { %p4959_p7 = pnand %p4958_p5, %p4952_p0 }
  0x4b   : > { %4962 = shalt.err (!%p4959_p7)
}
  0x4c   : > { %s4963_s3 = scalar_lea.vmem %s5349_s12, 4096  ;;  %s5159_s11 = smov [#allocation9]  }
  0x4d   : > { %p4964_p9 = scmp.ne.s32.totalorder %s5349_s12, %s4963_s3  ;;  %s4968_s19 = sshll.u32 %s5159_s11, 4  ;;  %s4969_s19 = int_to_ptr.vmem [resolvable:$false] %s4968_s19 }
  0x4e   : > { %s4970_s15 = scalar_lea.vmem %s4969_s19, 8192  ;;  %p4971_p10 = scmp.lt.s32.totalorder %s5349_s12, %s4969_s19 }
  0x4f   : > { %p4966_p11 = pnand %p4964_p9, %p5314_p8  ;;  %p4972_p13 = scmp.lt.s32.totalorder %s4970_s15, %s4963_s3 }
  0x51   : > { %p4967_p12 = pneg %p4966_p11  ;;  %p4973_p1 = por %p4972_p13, %p4971_p10 }
  0x53   : > { %p4974_p2 = pnand %p4973_p1, %p4967_p12 }
  0x55   : > { %4977 = shalt.err (!%p4974_p2)
}
  0x56   : > { %s5160_s30 = smov 256   ;;  %s5161_s16 = smov 16  }
  0x57   : > { %4631 = dma.hbm_to_vmem [thread:$0]  (!%p5300_p6), %s5345_s23, 4096, %s5349_s12, %s5353_s9, %s5160_s30, %s5160_s30, %s5161_s16  }
  0x58   : > { %s6308_s10 = sld [smem:[#allocation29_spill]]  ;;  %s518_s11 = scalar_lea.vmem [#allocation11], %s4214_s29 }
  0x59   : > { %s525_s19 = sshll.u32 %s518_s11, 4  ;;  %s5389_s15 = sadd.s32 4294967295, %s5154_s26   ;;  %s5386_s19 = int_to_ptr.vmem [resolvable:$true] %s525_s19 }
  0x5a   : > { %p140_p0 = scmp.ne.s32.totalorder %s5138_s22, %s5134_s21  ;;  %p6280_p3 = scmp.eq.s32.totalorder %s5389_s15, 0 }
  0x5b   : > { %p4207_p4 = scmp.ge.s32.totalorder %s5154_s26, 1  ;;  %p385_p5 = scmp.lt.s32.totalorder %s5154_s26, 3 }
  0x5c   : > { %p5398_p7 = por %p6280_p3, %p140_p0  ;;  %s5162_s29 = smov [#allocation3]  }
  0x5d   : > { %p5402_p9 = pnand %p4207_p4, %p385_p5  ;;  %s400_s23 = sshll.u32 %s5162_s29, 4  ;;  %s5406_s23 = int_to_ptr.vmem [resolvable:$true] %s400_s23 }
  0x5e   : > { %s5382_s3 = scalar_lea.hbm %s6308_s10, %s4367_s17  ;;  %s4211_s21 = sshll.u32 %s5288_s13, 6 }
  0x5f   : > { %s6309_s12 = scalar_select %p5398_p7, 1, 0 }
  0x60   : > { %s6310_s17 = scalar_select %p5402_p9, 1, 0 }
  0x61   : > { %p4618_p11 = pneg %p5402_p9  ;;  %s4366_s30 = sshll.u32 %s5150_s25, 10 }
  0x62   : > { %s6312_s4 = sld [smem:[#allocation24_spill]]  ;;  %s451_s8 = scalar_lea.vmem [#allocation8], %s4211_s21 }
  0x63   : > { %p5414_p12 = pnand %p4618_p11, %p6280_p3  ;;  %s458_s26 = sshll.u32 %s451_s8, 4  ;;  %s5423_s26 = int_to_ptr.vmem [resolvable:$true] %s458_s26 }
  0x64   : > { %s6313_s0 = sld [smem:[#allocation22_spill]] }
  0x65   : > { %p4980_p13 = pneg %p5414_p12 }
  0x68   : > { %s5421_s11 = scalar_lea.hbm %s6312_s4, %s4366_s30 }
  0x6a   : > { %s4978_s13 = scalar_lea.hbm %s6313_s0, 256 }
  0x6b   : > { %p4979_p10 = scmp.ne.s32.totalorder %s6313_s0, %s4978_s13  ;;  %p4985_p0 = scmp.lt.u32.totalorder %s4978_s13, %s6313_s0 }
  0x6d   : > { %p4981_p1 = pnand %p4980_p13, %p4979_p10 }
  0x6f   : > { %p4982_p2 = pneg %p4981_p1 }
  0x71   : > { %p4987_p4 = pnand %p4985_p0, %p4982_p2 }
  0x73   : > { %4990 = shalt.err (!%p4987_p4)
}
  0x74   : > { %s4991_s8 = scalar_lea.vmem %s5406_s23, 256  ;;  %p4999_p7 = scmp.lt.s32.totalorder %s5406_s23, %s5406_s23 }
  0x75   : > { %p4992_p5 = scmp.ne.s32.totalorder %s5406_s23, %s4991_s8  ;;  %p5000_p9 = scmp.lt.s32.totalorder %s4991_s8, %s4991_s8 }
  0x77   : > { %p4994_p11 = pnand %p4992_p5, %p4980_p13  ;;  %p5001_p6 = por %p5000_p9, %p4999_p7 }
  0x79   : > { %p4995_p3 = pneg %p4994_p11 }
  0x7b   : > { %p5002_p8 = pnand %p5001_p6, %p4995_p3 }
  0x7d   : > { %5005 = shalt.err (!%p5002_p8)
}
  0x7e   : > { %s5163_s6 = smov 128   ;;  %s5164_s7 = smov 8  }
  0x7f   : > { %4621 = dma.hbm_to_vmem [thread:$0]  (!%p5414_p12), %s6313_s0, 256, %s5406_s23, [#allocation4], %s5163_s6, %s5163_s6, %s5164_s7  }
  0x80   : > { %s5006_s30 = scalar_lea.hbm %s5421_s11, 1024  ;;  %p6314_p13 = scmp.ne.s32.totalorder %s6305_s14, 0 }
  0x81   : > { %p5007_p10 = scmp.ne.s32.totalorder %s5421_s11, %s5006_s30  ;;  %s5011_s28 = scalar_lea.hbm %s6312_s4, 2048 }
  0x82   : > { %p5012_p8 = scmp.lt.u32.totalorder %s5421_s11, %s6312_s4  ;;  %p5013_p3 = scmp.lt.u32.totalorder %s5011_s28, %s5006_s30 }
  0x83   : > { %p5009_p7 = pnand %p5007_p10, %p6314_p13  ;;  %p5015_p1 = scmp.lt.u32.totalorder %s5006_s30, %s5421_s11 }
  0x84   : > { %p5014_p9 = por %p5013_p3, %p5012_p8 }
  0x85   : > { %p5010_p6 = pneg %p5009_p7 }
  0x86   : > { %p5016_p2 = por %p5015_p1, %p5014_p9 }
  0x88   : > { %p5017_p0 = pnand %p5016_p2, %p5010_p6 }
  0x8a   : > { %5020 = shalt.err (!%p5017_p0)
}
  0x8b   : > { %s5021_s23 = scalar_lea.vmem %s5423_s26, 1024  ;;  %s5165_s16 = smov [#allocation8]  }
  0x8c   : > { %p5022_p12 = scmp.ne.s32.totalorder %s5423_s26, %s5021_s23  ;;  %s5026_s6 = sshll.u32 %s5165_s16, 4  ;;  %s5027_s6 = int_to_ptr.vmem [resolvable:$false] %s5026_s6 }
  0x8d   : > { %s5028_s7 = scalar_lea.vmem %s5027_s6, 2048  ;;  %p5029_p11 = scmp.lt.s32.totalorder %s5423_s26, %s5027_s6 }
  0x8e   : > { %p5024_p4 = pnand %p5022_p12, %p6314_p13  ;;  %p5030_p10 = scmp.lt.s32.totalorder %s5028_s7, %s5021_s23 }
  0x90   : > { %p5025_p5 = pneg %p5024_p4  ;;  %p5031_p7 = por %p5030_p10, %p5029_p11 }
  0x92   : > { %p5032_p8 = pnand %p5031_p7, %p5025_p5 }
  0x94   : > { %5035 = shalt.err (!%p5032_p8)
}
  0x95   : > { %s5166_s25 = smov 64   ;;  %s5167_s21 = smov 4  }
  0x96   : > { %p6315_p6 = scmp.ne.s32.totalorder %s6303_s20, 0  ;;  %s5036_s30 = scalar_lea.hbm %s5382_s3, 4096 }
  0x97   : > { %p5037_p3 = scmp.ne.s32.totalorder %s5382_s3, %s5036_s30  ;;  %s5041_s28 = scalar_lea.hbm %s6308_s10, 8192 }
  0x98   : > { %4628 = dma.hbm_to_vmem [thread:$0]  (!%p6315_p6), %s5421_s11, 1024, %s5423_s26, %s5308_s27, %s5166_s25, %s5166_s25, %s5167_s21  }
  0x99   : > { %p5039_p9 = pnand %p5037_p3, %p6314_p13  ;;  %p5042_p2 = scmp.lt.u32.totalorder %s5382_s3, %s6308_s10 }
  0x9a   : > { %p5043_p0 = scmp.lt.u32.totalorder %s5041_s28, %s5036_s30  ;;  %p5045_p4 = scmp.lt.u32.totalorder %s5036_s30, %s5382_s3 }
  0x9b   : > { %p5040_p1 = pneg %p5039_p9 }
  0x9c   : > { %p5044_p12 = por %p5043_p0, %p5042_p2 }
  0x9e   : > { %p5046_p5 = por %p5045_p4, %p5044_p12 }
  0xa0   : > { %p5047_p11 = pnand %p5046_p5, %p5040_p1 }
  0xa2   : > { %5050 = shalt.err (!%p5047_p11)
}
  0xa3   : > { %s5051_s26 = scalar_lea.vmem %s5386_s19, 4096  ;;  %s5168_s27 = smov [#allocation11]  }
  0xa4   : > { %p5052_p10 = scmp.ne.s32.totalorder %s5386_s19, %s5051_s26  ;;  %s5056_s11 = sshll.u32 %s5168_s27, 4  ;;  %s5057_s11 = int_to_ptr.vmem [resolvable:$false] %s5056_s11 }
  0xa5   : > { %s5058_s23 = scalar_lea.vmem %s5057_s11, 8192  ;;  %p5059_p3 = scmp.lt.s32.totalorder %s5386_s19, %s5057_s11 }
  0xa6   : > { %p5054_p7 = pnand %p5052_p10, %p6314_p13  ;;  %p5060_p9 = scmp.lt.s32.totalorder %s5058_s23, %s5051_s26 }
  0xa8   : > { %p5055_p8 = pneg %p5054_p7  ;;  %p5061_p2 = por %p5060_p9, %p5059_p3 }
  0xaa   : > { %p5062_p0 = pnand %p5061_p2, %p5055_p8 }
  0xac   : > { %5065 = shalt.err (!%p5062_p0)
}
  0xad   : > { %4634 = dma.hbm_to_vmem [thread:$0]  (!%p6315_p6), %s5382_s3, 4096, %s5386_s19, %s5353_s9, %s5166_s25, %s5166_s25, %s5167_s21  }
  0xae   : > { %p6316_p13 = scmp.ne.s32.totalorder %s6310_s17, 0 }
  0xaf   : > { %p6317_p1 = scmp.eq.s32.totalorder (!%p6316_p13), %s5389_s15, 0 }
  0xb0   : > { %543 = sbr.rel (%p6316_p13) target bundleno = 2923 (0xb6b), region = 68 }
  0xb7   : > { %5117 = dma.done.wait (%p6317_p1), [#allocation4], 256   ;;  %p6318_p12 = pmov %p6317_p1 }
  0xb8   : > { %s549_s20 = sand.u32 1, %s5389_s15   ;;  %s551_s14 = sand.u32 1, %s5138_s22  }
  0xb9   : > { %5119 = vsyncadd (%p6318_p12), [#allocation4], 4294967040  ;;  %s4601_s16 = smul.u32 192, %s551_s14  ;;  %s550_s6 = scalar_lea.sflag [#allocation7], %s549_s20 }
  0xba   : > { %p6319_p4 = scmp.ne.s32.totalorder %s6309_s12, 0 }
  0xbb   : > { %s5504_s7 = scalar_lea.vmem [#allocation6], %s4601_s16 }
  0xbc   : > { %5121 = dma.done.wait (%p6319_p4), %s550_s6, 4096  }
  0xbd   : > { %5123 = vsyncadd (%p6319_p4), %s550_s6, 4294963200  ;;  %s4222_s9 = sshll.u32 %s551_s14, 6  ;;  %s4223_s3 = sshll.u32 %s551_s14, 8 }
  0xbe   : > { %s5510_s19 = scalar_lea.vmem [#allocation8], %s4222_s9  ;;  %s568_s17 = scalar_lea.sflag [#allocation10], %s549_s20 }
  0xbf   : > { %s5512_s25 = scalar_lea.vmem [#allocation9], %s4223_s3 }
  0xc0   : > { %5125 = dma.done.wait (%p6319_p4), %s568_s17, 8192  }
  0xc1   : > { %5127 = vsyncadd (%p6319_p4), %s568_s17, 4294959104  ;;  %p654_p6 = scmp.lt.s32.totalorder %s5146_s24, 1  ;;  %s6320_s20 = sld [smem:[#allocation25_spill]] }
  0xc2   : > { %s6321_s9 = sld [smem:[#allocation26_spill]]  ;;  %s6322_s13 = sld [smem:[#allocation28_spill]] }
  0xc3   : > { %s5520_s21 = scalar_select %p654_p6, %s5146_s24, 1 }
  0xc4   : > { %s6323_s12 = sld [smem:[#allocation30_spill]]  ;;  %s5552_s8 = scalar_lea.vmem [#allocation11], %s4223_s3 }
  0xc5   : > { %s662_s27 = scalar_lea.vmem %s6267_s5, %s5520_s21  ;;  %s4225_s30 = sshll.u32 %s5520_s21, 2 }
  0xc6   : > { %p4226_p5 = scmp.ne.s32.totalorder %s5146_s24, 0 }
  0xc7   : > { %s665_s14 = scalar_lea.vmem %s6320_s20, %s5520_s21  ;;  %v682_v0 = vld [vmem:[#allocation3] sm:$0xff] (!%p4226_p5)  ;;  %v683_v1 = vld [vmem:[#allocation3 + $0x8] sm:$0xff] (!%p4226_p5) }
  0xc8   : > { %s668_s17 = scalar_lea.vmem %s6321_s9, %s5520_s21  ;;  %s5546_s4 = scalar_lea.vmem %s6322_s13, %s4225_s30  ;;  %684 = vst [vmem:[#allocation2] sm:$0xff] (!%p4226_p5), %v682_v0  ;;  %685 = vst [vmem:[#allocation2 + $0x8] sm:$0xff] (!%p4226_p5), %v683_v1 }
  0xc9   : > { %681 = sbr.rel (%p4226_p5) target bundleno = 208 (0xd0), region = 92 }
  0xca   : > { %s675_s10 = scalar_lea.vmem %s6323_s12, %s5520_s21 }
  0xd0 PF: > { %v686_v2 = vld [vmem:[#allocation2] sm:$0xff]  ;;  %v687_v3 = vld [vmem:[#allocation2 + $0x8] sm:$0xff]  ;;  %v5169_v6 = vmov 0.0   ;;  %v4734_v20 = vld [vmem:[%s5504_s7 + $0x30] ss:$12 sps:$4 sm:$0xff]   ;;  %v5170_v32 = vmov 0   ;;  %s6324_s3 = scalar_lea.vmem %s6263_s1, %s5520_s21  ;;  %s6325_s26 = scalar_lea.vmem %s6264_s2, %s5520_s21 }
  0xd1   : > { %690 = vadd.xlane.f32.xlu0 %v686_v2  ;;  %v4724_v4 = vld [vmem:[%s5504_s7 + $0x4] ss:$12 sps:$4 sm:$0xff]   ;;  %v4726_v5 = vld [vmem:[%s5504_s7] ss:$12 sps:$4 sm:$0xff]   ;;  %4463 = vmatprep.subr.bf16.mxu1 %v5169_v6  ;;  %v4727_v7 = vld [vmem:[%s5504_s7 + $0x8] ss:$12 sps:$4 sm:$0xff]  }
  0xd2   : > { %v4728_v8 = vld [vmem:[%s5504_s7 + $0x1c] ss:$12 sps:$4 sm:$0xff]   ;;  %890 = vmatprep.subr.bf16.mxu0 %v4724_v4  ;;  %4464 = vmatpush3.bf16.msra.mxu1 %v4727_v7  ;;  %v4730_v17 = vld [vmem:[%s5504_s7 + $0x18] ss:$12 sps:$4 sm:$0xff]   ;;  %v4731_v18 = vld [vmem:[%s5504_s7 + $0x20] ss:$12 sps:$4 sm:$0xff]   ;;  %v1010_v4 = vlaneseq }
  0xd3   : > { %891 = vmatpush1.bf16.msra.mxu0 %v4726_v5  ;;  %4465 = vmatprep.subr.bf16.mxu1 %v5169_v6  ;;  %v4732_v19 = vld [vmem:[%s5504_s7 + $0x34] ss:$12 sps:$4 sm:$0xff]   ;;  %v4735_v21 = vld [vmem:[%s5504_s7 + $0x38] ss:$12 sps:$4 sm:$0xff]   ;;  %v4739_v24 = vld [vmem:[%s5504_s7 + $0x50] ss:$12 sps:$4 sm:$0xff]  }
  0xd4   : > { %892 = vmatprep.subr.bf16.mxu0 %v4728_v8  ;;  %v4736_v22 = vld [vmem:[%s5504_s7 + $0x4c] ss:$12 sps:$4 sm:$0xff]   ;;  %v4738_v23 = vld [vmem:[%s5504_s7 + $0x48] ss:$12 sps:$4 sm:$0xff]   ;;  %v4740_v25 = vld [vmem:[%s5504_s7 + $0x64] ss:$12 sps:$4 sm:$0xff]   ;;  %922 = vmatprep.mubr.bf16.mxu0 %v5170_v32 }
  0xd5   : > { %692 = vadd.xlane.f32.xlu0 %v687_v3  ;;  %v4742_v26 = vld [vmem:[%s5504_s7 + $0x60] ss:$12 sps:$4 sm:$0xff]   ;;  %v4743_v27 = vld [vmem:[%s5504_s7 + $0x68] ss:$12 sps:$4 sm:$0xff]   ;;  %v4746_v29 = vld [vmem:[%s5504_s7 + $0x78] ss:$12 sps:$4 sm:$0xff]  }
  0xd6   : > { %4466 = vmatpush3.bf16.msra.mxu1 %v4731_v18  ;;  %v4744_v28 = vld [vmem:[%s5504_s7 + $0x7c] ss:$12 sps:$4 sm:$0xff]   ;;  %v4747_v30 = vld [vmem:[%s5504_s7 + $0x80] ss:$12 sps:$4 sm:$0xff]   ;;  %vm5171_vm0 = vmmov 0   ;;  %s5172_s11 = smov 64  }
  0xd7   : > { %893 = vmatpush1.bf16.msra.mxu0 %v4730_v17  ;;  %4467 = vmatprep.subr.bf16.mxu1 %v5169_v6  ;;  %v4748_v31 = vld [vmem:[%s5504_s7 + $0x94] ss:$12 sps:$4 sm:$0xff]   ;;  %v4750_v33 = vld [vmem:[%s5504_s7 + $0x90] ss:$12 sps:$4 sm:$0xff]   ;;  %v4751_v34 = vld [vmem:[%s5504_s7 + $0x98] ss:$12 sps:$4 sm:$0xff]  }
  0xd8   : > { %894 = vmatprep.subr.bf16.mxu0 %v4732_v19  ;;  %4479 = vmatprep.mubr.msk.bf16.mxu1 %vm5171_vm0, %v5169_v6  ;;  %v4752_v35 = vld [vmem:[%s5504_s7 + $0xac] ss:$12 sps:$4 sm:$0xff]   ;;  %v4754_v36 = vld [vmem:[%s5504_s7 + $0xa8] ss:$12 sps:$4 sm:$0xff]   ;;  %v4755_v37 = vld [vmem:[%s5504_s7 + $0xb0] ss:$12 sps:$4 sm:$0xff]  }
  0xd9   : > { %v4227_v46 = vld [vmem:[%s6324_s3] ss:$0 sm:$0xff]  ;;  %s5173_s23 = smov 96   ;;  %s5174_s20 = smov 32   ;;  %v5624_v7 = vshrl.u32 %v1010_v4, 7  ;;  %vm1820_vm1 = vcmask 261120  }
  0xda   : > { %4468 = vmatpush3.bf16.msra.mxu1 %v4735_v21  ;;  %v4228_v50 = vld [vmem:[%s6325_s26] ss:$0 sm:$0xff]  ;;  %v5176_v8 = vmov 1934713408   ;;  %vm2189_vm2 = vcmask 64512   ;;  %vm2297_vm3 = vcmask 1043456  }
  0xdb   : > { %895 = vmatpush1.bf16.msra.mxu0 %v4734_v20  ;;  %4469 = vmatprep.subr.bf16.mxu1 %v5169_v6  ;;  %vm2961_vm4 = vcmask 523264   ;;  %vm2964_vm5 = vcmask 785408   ;;  %p4361_p11 = scmp.ne.s32.totalorder %s5146_s24, 1 }
  0xdc   : > { %896 = vmatprep.subr.bf16.mxu0 %v4736_v22 }
  0xde   : > { %4470 = vmatpush3.bf16.msra.mxu1 %v4739_v24 }
  0xdf   : > { %897 = vmatpush1.bf16.msra.mxu0 %v4738_v23  ;;  %4471 = vmatprep.subr.bf16.mxu1 %v5169_v6 }
  0xe0   : > { %898 = vmatprep.subr.bf16.mxu0 %v4740_v25 }
  0xe2   : > { %4472 = vmatpush3.bf16.msra.mxu1 %v4743_v27 }
  0xe3   : > { %899 = vmatpush1.bf16.msra.mxu0 %v4742_v26  ;;  %4473 = vmatprep.subr.bf16.mxu1 %v5169_v6 }
  0xe4   : > { %900 = vmatprep.subr.bf16.mxu0 %v4744_v28 }
  0xe6   : > { %4474 = vmatpush3.bf16.msra.mxu1 %v4747_v30 }
  0xe7   : > { %901 = vmatpush1.bf16.msra.mxu0 %v4746_v29  ;;  %4475 = vmatprep.subr.bf16.mxu1 %v5169_v6 }
  0xe8   : > { %902 = vmatprep.subr.bf16.mxu0 %v4748_v31 }
  0xea   : > { %4476 = vmatpush3.bf16.msra.mxu1 %v4751_v34 }
  0xeb   : > { %903 = vmatpush1.bf16.msra.mxu0 %v4750_v33  ;;  %4477 = vmatprep.subr.bf16.mxu1 %v5169_v6 }
  0xec   : > { %904 = vmatprep.subr.bf16.mxu0 %v4752_v35 }
  0xee   : > { %4478 = vmatpush3.bf16.msra.mxu1 %v4755_v37 }
  0xef   : > { %905 = vmatpush1.bf16.msra.mxu0 %v4754_v36  ;;  %4483 = vmatprep.subr.bf16.mxu1 %v5169_v6 }
  0xf0   : > { %4507 = vmatprep.subr.bf16.mxu0 %v5169_v6 }
 0x15e   : > { %v691_v9 = vpop.xlane.xlu0 %690 }
 0x15f   : > { %v695_v10 = vmul.f32 0.0078125, %v691_v9  ;;  %v1039_v9 = vunpack.c.l.s4 %v5176_v8 }
 0x161   : > { %v5561_v11 = vsub.f32 %v686_v2, %v695_v10  ;;  %v5175_v2 = vmov 1983009808   ;;  %v1040_v18 = vunpack.c.0.s8 %v1039_v9 }
 0x162   : > { %v693_v12 = vpop.xlane.xlu0 %692 }
 0x163   : > { %v696_v13 = vmul.f32 0.0078125, %v693_v12  ;;  %v699_v14 = vmul.f32 %v5561_v11, %v5561_v11  ;;  %v5637_v26 = vsub.s32 %v1040_v18, %v5624_v7 }
 0x165   : > { %v5565_v15 = vsub.f32 %v687_v3, %v696_v13  ;;  %701 = vadd.xlane.f32.xlu1 %v699_v14  ;;  %v1008_v3 = vunpack.c.l.s4 %v5175_v2 }
 0x167   : > { %v700_v16 = vmul.f32 %v5565_v15, %v5565_v15  ;;  %v1009_v5 = vunpack.c.0.s8 %v1008_v3 }
 0x169   : > { %703 = vadd.xlane.f32.xlu1 %v700_v16  ;;  %v5631_v16 = vsub.s32 %v1009_v5, %v5624_v7 }
 0x1f2   : > { %v702_v38 = vpop.xlane.xlu1 %701 }
 0x1f3   : > { %v705_v39 = vmul.f32 0.0078125, %v702_v38 }
 0x1f5   : > { %v707_v40 = vadd.f32 1e-05, %v705_v39 }
 0x1f6   : > { %v704_v41 = vpop.xlane.xlu1 %703 }
 0x1f7   : > { %4844 = vrsqrt.f32 %v707_v40  ;;  %v706_v42 = vmul.f32 0.0078125, %v704_v41 }
 0x1f9   : > { %v708_v43 = vadd.f32 1e-05, %v706_v42 }
 0x1fb   : > { %4846 = vrsqrt.f32 %v708_v43 }
 0x201   : > { %v4845_v44 = vpop.eup %4844 }
 0x202   : > { %v711_v45 = vmul.f32 %v4845_v44, %v5561_v11  ;;  %v5628_v11 = vpack.i.b16 %v5170_v32, %v5170_v32 }
 0x204   : > { %v719_v49 = vmul.f32 %v4227_v46, %v711_v45 }
 0x205   : > { %v4847_v47 = vpop.eup %4846 }
 0x206   : > { %v712_v48 = vmul.f32 %v4847_v47, %v5565_v15  ;;  %v727_v52 = vadd.f32 %v4228_v50, %v719_v49 }
 0x208   : > { %v720_v51 = vmul.f32 %v4227_v46, %v712_v48 }
 0x20a   : > { %v728_v53 = vadd.f32 %v4228_v50, %v720_v51 }
 0x20c   : > { %v729_v54 = vpack.c.bf16 %v728_v53, %v727_v52 }
 0x20e   : > { %923 = vmatmul.mubr.bf16.vlgmr.msra.gmra.mrb[0].mxu0 %v729_v54  ;;  %4480 = vmatmul.mubr.bf16.vlgmr.msra.gmra.mrb[0].mxu1 %v729_v54 }
 0x20f   : > { %4485 = vmatprep.mubr.msk.bf16.mxu1 %vm5171_vm0, %v5169_v6  ;;  %4509 = vmatprep.mubr.msk.bf16.mxu0 %vm5171_vm0, %v5169_v6 }
 0x2e1   : > { %v924_v55 = vpop.f32.mrb[0].mxu0  ;;  %v967_v56 = vpop.f32.mrb[0].mxu1 }
 0x2e2   : > { %v926_v57 = vpop.f32.mrb[1].mxu0  ;;  %v4481_v58 = vpop.f32.mrb[1].mxu1 }
 0x2e3   : > { %v928_v59 = vpop.f32.mrb[2].mxu0  ;;  %v970_v60 = vpop.f32.mrb[2].mxu1 }
 0x2e4   : > { %v974_v61 = vpack.c.bf16 %v928_v59, %v924_v55  ;;  %v5616_v62 = vpack.c.bf16 %v970_v60, %v967_v56  ;;  %v930_v63 = vpop.f32.mrb[3].mxu0  ;;  %v4482_v0 = vpop.f32.mrb[3].mxu1 }
 0x2e5   : > { %v975_v1 = vpack.c.bf16 %v930_v63, %v926_v57 }
 0x2e6   : > { %v988_v33 = vshrl.u32 %v974_v61, 16 }
 0x2e7   : > { %1265 = vrot.lane.b32.xlu1 %v975_v1, %s5172_s11  ;;  %1263 = vrot.lane.b32.xlu0 %v975_v1, %s5173_s23  ;;  %v1273_v14 = vshrl.u32 %v975_v1, 16 }
 0x2eb   : > { %1267 = vrot.lane.b32.xlu1 %v975_v1, %s5174_s20  ;;  %980 = vrot.lane.b32.xlu0 %v974_v61, %s5172_s11 }
 0x2ef   : > { %978 = vrot.lane.b32.xlu1 %v974_v61, %s5173_s23 }
 0x2f3   : > { %982 = vrot.lane.b32.xlu1 %v974_v61, %s5174_s20 }
 0x359   : > { %v1266_v10 = vpop.permute.xlu1 %1265  ;;  %v1264_v12 = vpop.permute.xlu0 %1263 }
 0x35a   : > { %v1271_v13 = vpack.i.b16 %v1264_v12, %v975_v1  ;;  %v1274_v15 = vshrl.u32 %v1264_v12, 16  ;;  %v1281_v23 = vshrl.u32 %v1266_v10, 16 }
 0x35c   : > { %v1275_v17 = vpack.i.b16 %v1274_v15, %v1273_v14  ;;  %v1285_v19 = vcombine.high %v1271_v13, %v5628_v11  ;;  %v1292_v25 = vrot.slane %v1271_v13, %v5631_v16 }
 0x35d   : > { %v1268_v20 = vpop.permute.xlu1 %1267  ;;  %v981_v0 = vpop.permute.xlu0 %980 }
 0x35e   : > { %v1351_v21 = vcombine.high %v1275_v17, %v5628_v11  ;;  %v1279_v22 = vpack.i.b16 %v1268_v20, %v1266_v10  ;;  %v1282_v24 = vshrl.u32 %v1268_v20, 16  ;;  %v1299_v29 = vrot.slane %v1285_v19, %v5631_v16 }
 0x35f   : > { %v1358_v30 = vrot.slane %v1275_v17, %v5631_v16  ;;  %v996_v14 = vshrl.u32 %v981_v0, 16 }
 0x360   : > { %v1300_v27 = vcombine.high %v1279_v22, %v5628_v11  ;;  %v1307_v28 = vrot.slane %v1279_v22, %v5631_v16  ;;  %v1283_v31 = vpack.i.b16 %v1282_v24, %v1281_v23  ;;  %v1365_v35 = vrot.slane %v1351_v21, %v5631_v16 }
 0x361   : > { %v979_v34 = vpop.permute.xlu1 %978 }
 0x362   : > { %v1314_v36 = vrot.slane %v1300_v27, %v5631_v16  ;;  %v1315_v37 = vcombine.low %v1292_v25, %v1307_v28  ;;  %v1316_v38 = vcombine.high %v1292_v25, %v1307_v28  ;;  %v1366_v39 = vcombine.high %v1283_v31, %v5628_v11 }
 0x363   : > { %v1373_v40 = vrot.slane %v1283_v31, %v5631_v16  ;;  %v986_v41 = vpack.i.b16 %v979_v34, %v974_v61  ;;  %v989_v42 = vshrl.u32 %v979_v34, 16 }
 0x364   : > { %v1323_v43 = vrot.slane %v1315_v37, %v5637_v26  ;;  %v1330_v44 = vrot.slane %v1316_v38, %v5637_v26  ;;  %v1331_v45 = vcombine.low %v1299_v29, %v1314_v36  ;;  %v1332_v46 = vcombine.high %v1299_v29, %v1314_v36 }
 0x365   : > { %v1380_v47 = vrot.slane %v1366_v39, %v5631_v16  ;;  %v1381_v48 = vcombine.low %v1358_v30, %v1373_v40  ;;  %v1382_v49 = vcombine.high %v1358_v30, %v1373_v40  ;;  %v990_v50 = vpack.i.b16 %v989_v42, %v988_v33  ;;  %v983_v5 = vpop.permute.xlu1 %982 }
 0x366   : > { %v1339_v51 = vrot.slane %v1331_v45, %v5637_v26  ;;  %v1346_v52 = vrot.slane %v1332_v46, %v5637_v26  ;;  %v1417_v53 = vcombine.low %v1323_v43, %v1330_v44  ;;  %v4257_v54 = vcombine.high %v1323_v43, %v1330_v44 }
 0x367   : > { %v1389_v55 = vrot.slane %v1381_v48, %v5637_v26  ;;  %v1396_v56 = vrot.slane %v1382_v49, %v5637_v26  ;;  %v1397_v57 = vcombine.low %v1365_v35, %v1380_v47  ;;  %v1398_v58 = vcombine.high %v1365_v35, %v1380_v47 }
 0x368   : > { %v1424_v59 = vrot.slane %v1417_v53, %v5631_v16  ;;  %v1432_v60 = vrot.slane %v4257_v54, %v5631_v16  ;;  %v1467_v61 = vcombine.low %v1339_v51, %v1346_v52  ;;  %v4259_v63 = vcombine.high %v1339_v51, %v1346_v52 }
 0x369   : > { %v1405_v1 = vrot.slane %v1397_v57, %v5637_v26  ;;  %v1412_v2 = vrot.slane %v1398_v58, %v5637_v26  ;;  %v1442_v3 = vcombine.low %v1389_v55, %v1396_v56  ;;  %v4258_v4 = vcombine.high %v1389_v55, %v1396_v56 }
 0x36a   : > { %v5659_v8 = vrot.slane %v1467_v61, %v5631_v16  ;;  %v5662_v9 = vrot.slane %v4259_v63, %v5631_v16  ;;  %v1006_v10 = vcombine.high %v986_v41, %v5628_v11  ;;  %v1013_v15 = vrot.slane %v986_v41, %v5631_v16 }
 0x36b   : > { %v1449_v12 = vrot.slane %v1442_v3, %v5631_v16  ;;  %v1457_v13 = vrot.slane %v4258_v4, %v5631_v16  ;;  %v1492_v17 = vcombine.low %v1405_v1, %v1412_v2  ;;  %v4260_v18 = vcombine.high %v1405_v1, %v1412_v2 }
 0x36c   : > { %v1072_v19 = vcombine.high %v990_v50, %v5628_v11  ;;  %v994_v20 = vpack.i.b16 %v983_v5, %v981_v0  ;;  %v1020_v21 = vrot.slane %v1006_v10, %v5631_v16  ;;  %v997_v22 = vshrl.u32 %v983_v5, 16 }
 0x36d   : > { %v1433_v23 = vcombine.low %v1424_v59, %v1432_v60  ;;  %v1458_v24 = vcombine.low %v1449_v12, %v1457_v13  ;;  %v1079_v25 = vrot.slane %v990_v50, %v5631_v16  ;;  %v1483_v29 = vcombine.low %v5659_v8, %v5662_v9 }
 0x36e   : > { %v1021_v27 = vcombine.high %v994_v20, %v5628_v11  ;;  %v1028_v28 = vrot.slane %v994_v20, %v5631_v16  ;;  %v1086_v30 = vrot.slane %v1072_v19, %v5631_v16  ;;  %v998_v31 = vpack.i.b16 %v997_v22, %v996_v14 }
 0x36f   : > { %v5677_v33 = vrot.slane %v1433_v23, %v5637_v26  ;;  %v5680_v34 = vrot.slane %v1458_v24, %v5637_v26  ;;  %v1499_v38 = vrot.slane %v1492_v17, %v5631_v16  ;;  %v1507_v42 = vrot.slane %v4260_v18, %v5631_v16 }
 0x370   : > { %v1035_v35 = vrot.slane %v1021_v27, %v5631_v16  ;;  %v1036_v36 = vcombine.low %v1013_v15, %v1028_v28  ;;  %v1037_v37 = vcombine.high %v1013_v15, %v1028_v28  ;;  %v1087_v39 = vcombine.high %v998_v31, %v5628_v11 }
 0x371   : > { %v1094_v40 = vrot.slane %v998_v31, %v5631_v16  ;;  %v1519_v41 = vpack.i.b16 %v5680_v34, %v5677_v33  ;;  %v1508_v9 = vcombine.low %v1499_v38, %v1507_v42  ;;  %v5707_v15 = vrot.slane %v1483_v29, %v5637_v26 }
 0x372   : > { %v1044_v43 = vrot.slane %v1036_v36, %v5637_v26  ;;  %v1051_v44 = vrot.slane %v1037_v37, %v5637_v26  ;;  %v1052_v45 = vcombine.low %v1020_v21, %v1035_v35  ;;  %v1053_v46 = vcombine.high %v1020_v21, %v1035_v35 }
 0x373   : > { %v1101_v47 = vrot.slane %v1087_v39, %v5631_v16  ;;  %v1102_v48 = vcombine.low %v1079_v25, %v1094_v40  ;;  %v1103_v49 = vcombine.high %v1079_v25, %v1094_v40  ;;  %v1825_v50 = vsel %vm1820_vm1, %v1519_v41, 0 }
 0x374   : > { %v1060_v51 = vrot.slane %v1052_v45, %v5637_v26  ;;  %v1067_v52 = vrot.slane %v1053_v46, %v5637_v26  ;;  %v1138_v53 = vcombine.low %v1044_v43, %v1051_v44  ;;  %v4253_v54 = vcombine.high %v1044_v43, %v1051_v44  ;;  %4484 = vmatpush3.bf16.xpose.msra.mxu1 %v1825_v50 }
 0x375   : > { %v1110_v55 = vrot.slane %v1102_v48, %v5637_v26  ;;  %v1117_v56 = vrot.slane %v1103_v49, %v5637_v26  ;;  %v1118_v57 = vcombine.low %v1086_v30, %v1101_v47  ;;  %v1119_v58 = vcombine.high %v1086_v30, %v1101_v47  ;;  %4489 = vmatprep.subr.bf16.mxu1 %v5169_v6 }
 0x376   : > { %v1145_v59 = vrot.slane %v1138_v53, %v5631_v16  ;;  %v1153_v60 = vrot.slane %v4253_v54, %v5631_v16  ;;  %v1188_v61 = vcombine.low %v1060_v51, %v1067_v52  ;;  %v4255_v63 = vcombine.high %v1060_v51, %v1067_v52 }
 0x377   : > { %v1126_v0 = vrot.slane %v1118_v57, %v5637_v26  ;;  %v1133_v1 = vrot.slane %v1119_v58, %v5637_v26  ;;  %v1163_v2 = vcombine.low %v1110_v55, %v1117_v56  ;;  %v4254_v3 = vcombine.high %v1110_v55, %v1117_v56 }
 0x378   : > { %v1154_v4 = vcombine.low %v1145_v59, %v1153_v60  ;;  %v1195_v5 = vrot.slane %v1188_v61, %v5631_v16  ;;  %v1203_v8 = vrot.slane %v4255_v63, %v5631_v16  ;;  %v5710_v17 = vrot.slane %v1508_v9, %v5637_v26 }
 0x379   : > { %v1170_v10 = vrot.slane %v1163_v2, %v5631_v16  ;;  %v1178_v12 = vrot.slane %v4254_v3, %v5631_v16  ;;  %v1213_v13 = vcombine.low %v1126_v0, %v1133_v1  ;;  %v4256_v14 = vcombine.high %v1126_v0, %v1133_v1 }
 0x37a   : > { %v1521_v18 = vshrl.u32 %v5680_v34, 16  ;;  %v1520_v22 = vshrl.u32 %v5677_v33, 16  ;;  %v1204_v23 = vcombine.low %v1195_v5, %v1203_v8  ;;  %v1531_v24 = vpack.i.b16 %v5710_v17, %v5707_v15 }
 0x37b   : > { %v1179_v19 = vcombine.low %v1170_v10, %v1178_v12  ;;  %v1220_v20 = vrot.slane %v1213_v13, %v5631_v16  ;;  %v1228_v21 = vrot.slane %v4256_v14, %v5631_v16  ;;  %v1161_v25 = vrot.slane %v1154_v4, %v5637_v26 }
 0x37c   : > { %v1522_v29 = vpack.i.b16 %v1521_v18, %v1520_v22  ;;  %v2009_v30 = vsel %vm1820_vm1, %v1531_v24, 0  ;;  %v1516_v31 = vcombine.high %v5710_v17, %v5170_v32  ;;  %v1211_v37 = vrot.slane %v1204_v23, %v5637_v26 }
 0x37d   : > { %v1229_v27 = vcombine.low %v1220_v20, %v1228_v21  ;;  %v1186_v28 = vrot.slane %v1179_v19, %v5637_v26  ;;  %4508 = vmatpush3.bf16.xpose.msra.mxu0 %v2009_v30  ;;  %v1491_v38 = vcombine.high %v5707_v15, %v5170_v32  ;;  %v1466_v40 = vcombine.high %v5680_v34, %v5170_v32 }
 0x37e   : > { %4519 = vmatprep.subr.bf16.mxu0 %v5169_v6  ;;  %v1871_v39 = vsel %vm1820_vm1, %v1522_v29, 0  ;;  %v1441_v44 = vcombine.high %v5677_v33, %v5170_v32  ;;  %v1241_v45 = vshrl.u32 %v1161_v25, 16  ;;  %v1212_v50 = vcombine.high %v1211_v37, %v5170_v32 }
 0x37f   : > { %v1240_v35 = vpack.i.b16 %v1186_v28, %v1161_v25  ;;  %v1236_v36 = vrot.slane %v1229_v27, %v5637_v26  ;;  %v1537_v42 = vpack.i.b16 %v1516_v31, %v1491_v38  ;;  %v1242_v43 = vshrl.u32 %v1186_v28, 16 }
 0x380   : > { %v1525_v46 = vpack.i.b16 %v1466_v40, %v1441_v44  ;;  %v1527_v33 = vshrl.u32 %v1466_v40, 16  ;;  %v1187_v51 = vcombine.high %v1186_v28, %v5170_v32  ;;  %v1526_v52 = vshrl.u32 %v1441_v44, 16 }
 0x381   : > { %4486 = vmatmul.mubr.msk.bf16.vlgmr.msra.gmra.mrb[4].mxu1 %vm1820_vm1, %v1240_v35  ;;  %v1252_v41 = vpack.i.b16 %v1236_v36, %v1211_v37  ;;  %v2101_v47 = vsel %vm1820_vm1, %v1537_v42, 0  ;;  %v1243_v34 = vpack.i.b16 %v1242_v43, %v1241_v45  ;;  %v1237_v48 = vcombine.high %v1236_v36, %v5170_v32 }
 0x382   : > { %4490 = vmatpush3.bf16.xpose.msra.mxu1 %v1871_v39  ;;  %4491 = vmatprep.mubr.msk.bf16.mxu1 %vm5171_vm0, %v5169_v6  ;;  %v1917_v49 = vsel %vm1820_vm1, %v1525_v46, 0  ;;  %v1162_v54 = vcombine.high %v1161_v25, %v5170_v32  ;;  %v1528_v55 = vpack.i.b16 %v1527_v33, %v1526_v52  ;;  %v1533_v58 = vshrl.u32 %v5710_v17, 16 }
 0x383   : > { %4495 = vmatprep.subr.bf16.mxu1 %v5169_v6  ;;  %v1258_v53 = vpack.i.b16 %v1237_v48, %v1212_v50  ;;  %v1248_v59 = vshrl.u32 %v1187_v51, 16  ;;  %v1532_v60 = vshrl.u32 %v5707_v15, 16  ;;  %v1539_v2 = vshrl.u32 %v1516_v31, 16 }
 0x384   : > { %4510 = vmatmul.mubr.msk.bf16.vlgmr.msra.gmra.mrb[4].mxu0 %vm1820_vm1, %v1252_v41  ;;  %v1246_v56 = vpack.i.b16 %v1187_v51, %v1162_v54  ;;  %v1963_v57 = vsel %vm1820_vm1, %v1528_v55, 0  ;;  %v1247_v61 = vshrl.u32 %v1162_v54, 16  ;;  %v1254_v3 = vshrl.u32 %v1236_v36, 16 }
 0x385   : > { %4520 = vmatpush3.bf16.xpose.msra.mxu0 %v2101_v47  ;;  %4521 = vmatprep.mubr.msk.bf16.mxu0 %vm5171_vm0, %v5169_v6  ;;  %v1534_v63 = vpack.i.b16 %v1533_v58, %v1532_v60  ;;  %v1538_v4 = vshrl.u32 %v1491_v38, 16  ;;  %v1253_v5 = vshrl.u32 %v1211_v37, 16  ;;  %v1260_v12 = vshrl.u32 %v1237_v48, 16 }
 0x386   : > { %4531 = vmatprep.subr.bf16.mxu0 %v5169_v6  ;;  %v1249_v0 = vpack.i.b16 %v1248_v59, %v1247_v61  ;;  %v1259_v13 = vshrl.u32 %v1212_v50, 16 }
 0x387   : > { %v2055_v1 = vsel %vm1820_vm1, %v1534_v63, 0  ;;  %v1540_v8 = vpack.i.b16 %v1539_v2, %v1538_v4  ;;  %v1255_v9 = vpack.i.b16 %v1254_v3, %v1253_v5 }
 0x388   : > { %v1261_v14 = vpack.i.b16 %v1260_v12, %v1259_v13 }
 0x389   : > { %4492 = vmatmul.mubr.msk.bf16.vlgmr.msra.gmra.mrb[8].mxu1 %vm1820_vm1, %v1243_v34  ;;  %v2147_v10 = vsel %vm1820_vm1, %v1540_v8, 0 }
 0x38a   : > { %4496 = vmatpush3.bf16.xpose.msra.mxu1 %v1917_v49  ;;  %4497 = vmatprep.mubr.msk.bf16.mxu1 %vm5171_vm0, %v5169_v6 }
 0x38b   : > { %4501 = vmatprep.subr.bf16.mxu1 %v5169_v6 }
 0x38c   : > { %4522 = vmatmul.mubr.msk.bf16.vlgmr.msra.gmra.mrb[8].mxu0 %vm1820_vm1, %v1258_v53 }
 0x38d   : > { %4533 = vmatprep.mubr.msk.bf16.mxu0 %vm5171_vm0, %v5169_v6 }
 0x391   : > { %4498 = vmatmul.mubr.msk.bf16.vlgmr.msra.gmra.mrb[12].mxu1 %vm1820_vm1, %v1246_v56 }
 0x392   : > { %4502 = vmatpush3.bf16.xpose.msra.mxu1 %v1963_v57  ;;  %4503 = vmatprep.mubr.msk.bf16.mxu1 %vm5171_vm0, %v5169_v6 }
 0x393   : > { %4513 = vmatprep.subr.bf16.mxu1 %v5169_v6 }
 0x399   : > { %4504 = vmatmul.mubr.msk.bf16.vlgmr.msra.gmra.mrb[16].mxu1 %vm1820_vm1, %v1249_v0 }
 0x39a   : > { %4514 = vmatpush3.bf16.xpose.msra.mxu1 %v2055_v1  ;;  %4515 = vmatprep.mubr.msk.bf16.mxu1 %vm5171_vm0, %v5169_v6 }
 0x39b   : > { %4525 = vmatprep.subr.bf16.mxu1 %v5169_v6 }
 0x3a1   : > { %4516 = vmatmul.mubr.msk.bf16.vlgmr.msra.gmra.mrb[20].mxu1 %vm1820_vm1, %v1255_v9 }
 0x3a2   : > { %4526 = vmatpush3.bf16.xpose.msra.mxu1 %v2147_v10  ;;  %4527 = vmatprep.mubr.msk.bf16.mxu1 %vm5171_vm0, %v5169_v6 }
 0x3a3   : > { %4537 = vmatprep.subr.bf16.mxu1 %v5169_v6 }
 0x3a9   : > { %4528 = vmatmul.mubr.msk.bf16.vlgmr.msra.gmra.mrb[24].mxu1 %vm1820_vm1, %v1261_v14 }
 0x3aa   : > { %4539 = vmatprep.mubr.msk.bf16.mxu1 %vm5171_vm0, %v5169_v6 }
 0x454   : > { %v1861_v15 = vpop.f32.mrb[4].mxu1 }
 0x455   : > { %v4487_v17 = vpop.f32.mrb[5].mxu1  ;;  %v2190_v18 = vsel %vm2189_vm2, %v1861_v15, -inf }
 0x456   : > { %2191 = vmax.xlane.f32.xlu0 %v2190_v18  ;;  %v1864_v19 = vpop.f32.mrb[6].mxu1 }
 0x457   : > { %v4488_v20 = vpop.f32.mrb[7].mxu1  ;;  %v5775_v21 = vpop.f32.mrb[4].mxu0 }
 0x458   : > { %v4511_v22 = vpop.f32.mrb[5].mxu0  ;;  %v2202_v34 = vsel %vm2189_vm2, %v5775_v21, -inf }
 0x459   : > { %v2048_v23 = vpop.f32.mrb[6].mxu0 }
 0x45a   : > { %v4512_v24 = vpop.f32.mrb[7].mxu0 }
 0x45c   : > { %v1907_v25 = vpop.f32.mrb[8].mxu1 }
 0x45d   : > { %v4493_v27 = vpop.f32.mrb[9].mxu1  ;;  %v2193_v28 = vsel %vm2189_vm2, %v1907_v25, -inf }
 0x45e   : > { %2194 = vmax.xlane.f32.xlu1 %v2193_v28  ;;  %v1910_v29 = vpop.f32.mrb[10].mxu1 }
 0x45f   : > { %v4494_v30 = vpop.f32.mrb[11].mxu1  ;;  %v5778_v31 = vpop.f32.mrb[8].mxu0 }
 0x460   : > { %v4523_v35 = vpop.f32.mrb[9].mxu0  ;;  %v2208_v50 = vsel %vm2189_vm2, %v5778_v31, -inf }
 0x461   : > { %v2140_v36 = vpop.f32.mrb[10].mxu0 }
 0x462   : > { %v4524_v37 = vpop.f32.mrb[11].mxu0 }
 0x464   : > { %v1953_v38 = vpop.f32.mrb[12].mxu1 }
 0x465   : > { %v4499_v39 = vpop.f32.mrb[13].mxu1  ;;  %v2196_v40 = vsel %vm2189_vm2, %v1953_v38, -inf }
 0x466   : > { %2197 = vmax.xlane.f32.xlu0 %v2196_v40  ;;  %v1956_v41 = vpop.f32.mrb[14].mxu1 }
 0x467   : > { %v4500_v42 = vpop.f32.mrb[15].mxu1 }
 0x46c   : > { %v1999_v43 = vpop.f32.mrb[16].mxu1 }
 0x46d   : > { %v4505_v44 = vpop.f32.mrb[17].mxu1  ;;  %v2199_v45 = vsel %vm2189_vm2, %v1999_v43, -inf }
 0x46e   : > { %2200 = vmax.xlane.f32.xlu0 %v2199_v45  ;;  %v2002_v46 = vpop.f32.mrb[18].mxu1 }
 0x46f   : > { %v4506_v47 = vpop.f32.mrb[19].mxu1 }
 0x472   : > { %2203 = vmax.xlane.f32.xlu0 %v2202_v34 }
 0x474   : > { %v2091_v48 = vpop.f32.mrb[20].mxu1 }
 0x475   : > { %v4517_v49 = vpop.f32.mrb[21].mxu1  ;;  %v2205_v33 = vsel %vm2189_vm2, %v2091_v48, -inf }
 0x476   : > { %2206 = vmax.xlane.f32.xlu1 %v2205_v33  ;;  %v2094_v51 = vpop.f32.mrb[22].mxu1  ;;  %2209 = vmax.xlane.f32.xlu0 %v2208_v50 }
 0x477   : > { %v4518_v52 = vpop.f32.mrb[23].mxu1 }
 0x47c   : > { %v2183_v53 = vpop.f32.mrb[24].mxu1 }
 0x47d   : > { %v4529_v54 = vpop.f32.mrb[25].mxu1  ;;  %v2211_v55 = vsel %vm2189_vm2, %v2183_v53, -inf }
 0x47e   : > { %2212 = vmax.xlane.f32.xlu1 %v2211_v55  ;;  %v2186_v56 = vpop.f32.mrb[26].mxu1 }
 0x47f   : > { %v4530_v57 = vpop.f32.mrb[27].mxu1 }
 0x48f   : > { %1544 = vrot.lane.b32.xlu1 %v5616_v62, %s5172_s11 }
 0x4e3   : > { %v2192_v58 = vpop.xlane.xlu0 %2191 }
 0x4e4   : > { %v2214_v59 = vsub.f32 %v1861_v15, %v2192_v58 }
 0x4e6   : > { %v2222_v60 = vmul.f32 1.442695, %v2214_v59 }
 0x4e8   : > { %4848 = vpow2.f32 %v2222_v60 }
 0x4eb   : > { %v2195_v61 = vpop.xlane.xlu1 %2194 }
 0x4ec   : > { %v2215_v63 = vsub.f32 %v1907_v25, %v2195_v61 }
 0x4ee   : > { %v2224_v0 = vmul.f32 1.442695, %v2215_v63 }
 0x4f0   : > { %4850 = vpow2.f32 %v2224_v0 }
 0x4f2   : > { %v5790_v1 = vpop.eup %4848 }
 0x4f3   : > { %v2238_v2 = vsel %vm2189_vm2, %v5790_v1, 0.0  ;;  %v2198_v5 = vpop.xlane.xlu0 %2197 }
 0x4f4   : > { %2239 = vadd.xlane.f32.xlu0 %v2238_v2  ;;  %v2216_v15 = vsub.f32 %v1953_v38, %v2198_v5 }
 0x4f6   : > { %v2226_v22 = vmul.f32 1.442695, %v2216_v15 }
 0x4fa   : > { %v5794_v3 = vpop.eup %4850 }
 0x4fb   : > { %v2241_v4 = vsel %vm2189_vm2, %v5794_v3, 0.0  ;;  %v2201_v8 = vpop.xlane.xlu0 %2200 }
 0x4fc   : > { %2242 = vadd.xlane.f32.xlu1 %v2241_v4  ;;  %v2217_v9 = vsub.f32 %v1999_v43, %v2201_v8 }
 0x4fe   : > { %v2228_v12 = vmul.f32 1.442695, %v2217_v9 }
 0x4ff   : > { %v2204_v10 = vpop.xlane.xlu0 %2203 }
 0x500   : > { %v2218_v13 = vsub.f32 %v5775_v21, %v2204_v10  ;;  %4852 = vpow2.f32 %v2228_v12 }
 0x502   : > { %v2230_v17 = vmul.f32 1.442695, %v2218_v13 }
 0x503   : > { %v2207_v14 = vpop.xlane.xlu1 %2206  ;;  %v2210_v19 = vpop.xlane.xlu0 %2209 }
 0x504   : > { %v2219_v18 = vsub.f32 %v2091_v48, %v2207_v14  ;;  %v2220_v23 = vsub.f32 %v5778_v31, %v2210_v19  ;;  %4854 = vpow2.f32 %v2230_v17  ;;  %v1552_v48 = vshrl.u32 %v5616_v62, 16 }
 0x505   : > { %4856 = vpow2.f32 %v2226_v22 }
 0x506   : > { %v2232_v24 = vmul.f32 1.442695, %v2219_v18  ;;  %v2234_v27 = vmul.f32 1.442695, %v2220_v23 }
 0x508   : > { %4858 = vpow2.f32 %v2232_v24 }
 0x509   : > { %4860 = vpow2.f32 %v2234_v27 }
 0x50a   : > { %1542 = vrot.lane.b32.xlu0 %v5616_v62, %s5173_s23  ;;  %v5804_v29 = vpop.eup %4852 }
 0x50b   : > { %v2213_v20 = vpop.xlane.xlu1 %2212  ;;  %v2247_v21 = vsel %vm2189_vm2, %v5804_v29, 0.0 }
 0x50c   : > { %v2221_v25 = vsub.f32 %v2183_v53, %v2213_v20 }
 0x50d   : > { %1546 = vrot.lane.b32.xlu1 %v5616_v62, %s5174_s20 }
 0x50e   : > { %v2236_v28 = vmul.f32 1.442695, %v2221_v25  ;;  %v5808_v30 = vpop.eup %4854 }
 0x50f   : > { %v5810_v35 = vpop.eup %4856  ;;  %v2250_v31 = vsel %vm2189_vm2, %v5808_v30, 0.0  ;;  %v1545_v44 = vpop.permute.xlu1 %1544 }
 0x510   : > { %4862 = vpow2.f32 %v2236_v28  ;;  %v2244_v38 = vsel %vm2189_vm2, %v5810_v35, 0.0  ;;  %v1560_v33 = vshrl.u32 %v1545_v44, 16 }
 0x512   : > { %v5814_v36 = vpop.eup %4858 }
 0x513   : > { %v5816_v37 = vpop.eup %4860  ;;  %v2253_v39 = vsel %vm2189_vm2, %v5814_v36, 0.0 }
 0x514   : > { %v2256_v42 = vsel %vm2189_vm2, %v5816_v37, 0.0 }
 0x51a   : > { %v5822_v40 = vpop.eup %4862 }
 0x51b   : > { %v2259_v41 = vsel %vm2189_vm2, %v5822_v40, 0.0 }
 0x529   : > { %2248 = vadd.xlane.f32.xlu0 %v2247_v21 }
 0x52d   : > { %2251 = vadd.xlane.f32.xlu0 %v2250_v31 }
 0x531   : > { %2245 = vadd.xlane.f32.xlu1 %v2244_v38  ;;  %2254 = vadd.xlane.f32.xlu0 %v2253_v39 }
 0x535   : > { %2260 = vadd.xlane.f32.xlu0 %v2259_v41  ;;  %2257 = vadd.xlane.f32.xlu1 %v2256_v42 }
 0x581   : > { %v2240_v43 = vpop.xlane.xlu0 %2239 }
 0x582   : > { %4864 = vrcp.f32 %v2240_v43 }
 0x585   : > { %v1543_v45 = vpop.permute.xlu0 %1542 }
 0x586   : > { %v1553_v47 = vshrl.u32 %v1543_v45, 16  ;;  %v1550_v34 = vpack.i.b16 %v1543_v45, %v5616_v62 }
 0x588   : > { %v1554_v52 = vpack.i.b16 %v1553_v47, %v1552_v48  ;;  %v1571_v53 = vrot.slane %v1550_v34, %v5631_v16  ;;  %v1564_v41 = vcombine.high %v1550_v34, %v5628_v11 }
 0x589   : > { %v2243_v46 = vpop.xlane.xlu1 %2242 }
 0x58a   : > { %v1637_v58 = vrot.slane %v1554_v52, %v5631_v16  ;;  %4866 = vrcp.f32 %v2243_v46  ;;  %v1630_v27 = vcombine.high %v1554_v52, %v5628_v11 }
 0x58c   : > { %v4865_v18 = vpop.eup %4864  ;;  %v1644_v48 = vrot.slane %v1630_v27, %v5631_v16 }
 0x58d   : > { %v1547_v49 = vpop.permute.xlu1 %1546  ;;  %v2278_v25 = vmul.f32 %v4865_v18, %v5790_v1 }
 0x58e   : > { %v1558_v50 = vpack.i.b16 %v1547_v49, %v1545_v44  ;;  %v1561_v51 = vshrl.u32 %v1547_v49, 16 }
 0x590   : > { %v1562_v54 = vpack.i.b16 %v1561_v51, %v1560_v33  ;;  %v1586_v55 = vrot.slane %v1558_v50, %v5631_v16  ;;  %v1579_v28 = vcombine.high %v1558_v50, %v5628_v11  ;;  %v2286_v50 = vpack.c.bf16 %v2278_v25, %v2278_v25 }
 0x592   : > { %v1594_v56 = vcombine.low %v1571_v53, %v1586_v55  ;;  %v1595_v57 = vcombine.high %v1571_v53, %v1586_v55  ;;  %v1652_v59 = vrot.slane %v1562_v54, %v5631_v16  ;;  %v1645_v20 = vcombine.high %v1562_v54, %v5628_v11 }
 0x593   : > { %v1593_v49 = vrot.slane %v1579_v28, %v5631_v16 }
 0x594   : > { %v1602_v60 = vrot.slane %v1594_v56, %v5637_v26  ;;  %v1609_v62 = vrot.slane %v1595_v57, %v5637_v26  ;;  %v1660_v61 = vcombine.low %v1637_v58, %v1652_v59  ;;  %v1661_v63 = vcombine.high %v1637_v58, %v1652_v59  ;;  %v4867_v23 = vpop.eup %4866 }
 0x595   : > { %v2279_v42 = vmul.f32 %v4867_v23, %v5794_v3  ;;  %v1659_v43 = vrot.slane %v1645_v20, %v5631_v16  ;;  %v1578_v3 = vrot.slane %v1564_v41, %v5631_v16 }
 0x596   : > { %v1696_v0 = vcombine.low %v1602_v60, %v1609_v62  ;;  %v4261_v2 = vcombine.high %v1602_v60, %v1609_v62  ;;  %v1668_v4 = vrot.slane %v1660_v61, %v5637_v26  ;;  %v1675_v5 = vrot.slane %v1661_v63, %v5637_v26 }
 0x597   : > { %v1676_v34 = vcombine.low %v1644_v48, %v1659_v43  ;;  %v1677_v51 = vcombine.high %v1644_v48, %v1659_v43  ;;  %v2287_v53 = vpack.c.bf16 %v2279_v42, %v2279_v42  ;;  %v1610_v54 = vcombine.low %v1578_v3, %v1593_v49 }
 0x598   : > { %v1703_v8 = vrot.slane %v1696_v0, %v5631_v16  ;;  %v1711_v9 = vrot.slane %v4261_v2, %v5631_v16  ;;  %v1721_v10 = vcombine.low %v1668_v4, %v1675_v5  ;;  %v4262_v12 = vcombine.high %v1668_v4, %v1675_v5 }
 0x599   : > { %v1611_v55 = vcombine.high %v1578_v3, %v1593_v49  ;;  %v1684_v57 = vrot.slane %v1676_v34, %v5637_v26  ;;  %v1691_v58 = vrot.slane %v1677_v51, %v5637_v26  ;;  %v1618_v59 = vrot.slane %v1610_v54, %v5637_v26  ;;  %v4757_v54 = vld [vmem:[%s5510_s19 + $0x8] sm:$0xff]  }
 0x59a   : > { %v1712_v13 = vcombine.low %v1703_v8, %v1711_v9  ;;  %v1728_v14 = vrot.slane %v1721_v10, %v5631_v16  ;;  %v1736_v15 = vrot.slane %v4262_v12, %v5631_v16 }
 0x59b   : > { %v1625_v60 = vrot.slane %v1611_v55, %v5637_v26  ;;  %v1771_v62 = vcombine.low %v1684_v57, %v1691_v58  ;;  %v4264_v61 = vcombine.high %v1684_v57, %v1691_v58  ;;  %v4759_v55 = vld [vmem:[%s5510_s19 + $0x18] sm:$0xff]   ;;  %v4761_v57 = vld [vmem:[%s5510_s19 + $0x28] sm:$0xff]  }
 0x59c   : > { %v1719_v17 = vrot.slane %v1712_v13, %v5637_v26  ;;  %v1737_v19 = vcombine.low %v1728_v14, %v1736_v15 }
 0x59d   : > { %v1746_v63 = vcombine.low %v1618_v59, %v1625_v60  ;;  %v4263_v0 = vcombine.high %v1618_v59, %v1625_v60  ;;  %v1778_v2 = vrot.slane %v1771_v62, %v5631_v16  ;;  %v1786_v4 = vrot.slane %v4264_v61, %v5631_v16 }
 0x59e   : > { %v1720_v22 = vcombine.high %v1719_v17, %v5170_v32  ;;  %v1744_v24 = vrot.slane %v1737_v19, %v5637_v26  ;;  %v1799_v31 = vshrl.u32 %v1719_v17, 16 }
 0x59f   : > { %v1753_v5 = vrot.slane %v1746_v63, %v5631_v16  ;;  %v1761_v8 = vrot.slane %v4263_v0, %v5631_v16  ;;  %v1787_v10 = vcombine.low %v1778_v2, %v1786_v4 }
 0x5a0   : > { %v1798_v21 = vpack.i.b16 %v1744_v24, %v1719_v17  ;;  %v1800_v38 = vshrl.u32 %v1744_v24, 16  ;;  %v1745_v39 = vcombine.high %v1744_v24, %v5170_v32  ;;  %v1805_v44 = vshrl.u32 %v1720_v22, 16 }
 0x5a1   : > { %v1762_v12 = vcombine.low %v1753_v5, %v1761_v8  ;;  %v1794_v14 = vrot.slane %v1787_v10, %v5637_v26 }
 0x5a2   : > { %v2299_v45 = vsel %vm2297_vm3, %v1798_v21, 0  ;;  %v1801_v1 = vpack.i.b16 %v1800_v38, %v1799_v31  ;;  %v1804_v46 = vpack.i.b16 %v1745_v39, %v1720_v22  ;;  %v1806_v47 = vshrl.u32 %v1745_v39, 16 }
 0x5a3   : > { %4532 = vmatpush3.bf16.msra.mxu0 %v2299_v45  ;;  %v1769_v15 = vrot.slane %v1762_v12, %v5637_v26  ;;  %v1812_v19 = vshrl.u32 %v1794_v14, 16  ;;  %v1795_v27 = vcombine.high %v1794_v14, %v5170_v32 }
 0x5a4   : > { %v2345_v33 = vsel %vm2297_vm3, %v1801_v1, 0  ;;  %4543 = vmatprep.subr.bf16.mxu0 %v5169_v6  ;;  %v1807_v11 = vpack.i.b16 %v1806_v47, %v1805_v44  ;;  %v2391_v52 = vsel %vm2297_vm3, %v1804_v46, 0 }
 0x5a5   : > { %4538 = vmatpush3.bf16.msra.mxu1 %v2345_v33  ;;  %v1811_v20 = vshrl.u32 %v1769_v15, 16  ;;  %v1770_v21 = vcombine.high %v1769_v15, %v5170_v32  ;;  %v1818_v38 = vshrl.u32 %v1795_v27, 16  ;;  %v1810_v44 = vpack.i.b16 %v1794_v14, %v1769_v15 }
 0x5a6   : > { %4534 = vmatmul.mubr.msk.bf16.vlgmr.msra.gmra.mrb[12].mxu0 %vm2189_vm2, %v2286_v50  ;;  %4549 = vmatprep.subr.bf16.mxu1 %v5169_v6  ;;  %v2437_v56 = vsel %vm2297_vm3, %v1807_v11, 0 }
 0x5a7   : > { %4544 = vmatpush3.bf16.msra.mxu0 %v2391_v52  ;;  %4545 = vmatprep.mubr.msk.bf16.mxu0 %vm5171_vm0, %v5169_v6  ;;  %v1813_v25 = vpack.i.b16 %v1812_v19, %v1811_v20  ;;  %v1817_v41 = vshrl.u32 %v1770_v21, 16  ;;  %v2483_v33 = vsel %vm2297_vm3, %v1810_v44, 0  ;;  %v1816_v11 = vpack.i.b16 %v1795_v27, %v1770_v21 }
 0x5a8   : > { %4540 = vmatmul.mubr.msk.bf16.vlgmr.msra.gmra.mrb[28].mxu1 %vm2189_vm2, %v2287_v53  ;;  %4555 = vmatprep.subr.bf16.mxu0 %v5169_v6  ;;  %v4756_v53 = vld [vmem:[%s5510_s19] sm:$0xff]  }
 0x5a9   : > { %4550 = vmatpush3.bf16.msra.mxu1 %v2437_v56  ;;  %4551 = vmatprep.mubr.msk.bf16.mxu1 %vm5171_vm0, %v5169_v6  ;;  %v2529_v31 = vsel %vm2297_vm3, %v1813_v25, 0  ;;  %v1819_v1 = vpack.i.b16 %v1818_v38, %v1817_v41  ;;  %v4760_v56 = vld [vmem:[%s5510_s19 + $0x20] sm:$0xff]  }
 0x5aa   : > { %4561 = vmatprep.subr.bf16.mxu1 %v5169_v6 }
 0x5ab   : > { %v2621_v50 = vsel %vm2297_vm3, %v1819_v1, 0 }
 0x5b6   : > { %v2249_v9 = vpop.xlane.xlu0 %2248 }
 0x5b7   : > { %4868 = vrcp.f32 %v2249_v9 }
 0x5ba   : > { %v2252_v13 = vpop.xlane.xlu0 %2251 }
 0x5be   : > { %v2246_v17 = vpop.xlane.xlu1 %2245  ;;  %v2255_v18 = vpop.xlane.xlu0 %2254 }
 0x5bf   : > { %4870 = vrcp.f32 %v2246_v17 }
 0x5c0   : > { %4872 = vrcp.f32 %v2255_v18 }
 0x5c1   : > { %v4869_v22 = vpop.eup %4868  ;;  %4874 = vrcp.f32 %v2252_v13 }
 0x5c2   : > { %v2281_v23 = vmul.f32 %v4869_v22, %v5804_v29  ;;  %v2261_v24 = vpop.xlane.xlu0 %2260  ;;  %v2258_v39 = vpop.xlane.xlu1 %2257 }
 0x5c3   : > { %4876 = vrcp.f32 %v2261_v24 }
 0x5c4   : > { %v2289_v28 = vpack.c.bf16 %v2281_v23, %v2281_v23  ;;  %4878 = vrcp.f32 %v2258_v39 }
 0x5c6   : > { %4552 = vmatmul.mubr.msk.bf16.vlgmr.msra.gmra.mrb[32].mxu1 %vm2189_vm2, %v2289_v28 }
 0x5c7   : > { %4562 = vmatpush3.bf16.msra.mxu1 %v2529_v31  ;;  %4563 = vmatprep.mubr.msk.bf16.mxu1 %vm5171_vm0, %v5169_v6 }
 0x5c8   : > { %4573 = vmatprep.subr.bf16.mxu1 %v5169_v6 }
 0x5c9   : > { %v4871_v29 = vpop.eup %4870 }
 0x5ca   : > { %v4873_v42 = vpop.eup %4872  ;;  %v2280_v43 = vmul.f32 %v4871_v29, %v5810_v35 }
 0x5cb   : > { %v2283_v45 = vmul.f32 %v4873_v42, %v5814_v36  ;;  %v4875_v47 = vpop.eup %4874 }
 0x5cc   : > { %v2288_v46 = vpack.c.bf16 %v2280_v43, %v2280_v43  ;;  %v2282_v35 = vmul.f32 %v4875_v47, %v5808_v30  ;;  %v2575_v30 = vsel %vm2297_vm3, %v1816_v11, 0 }
 0x5cd   : > { %v2291_v48 = vpack.c.bf16 %v2283_v45, %v2283_v45  ;;  %v4877_v49 = vpop.eup %4876 }
 0x5ce   : > { %4546 = vmatmul.mubr.msk.bf16.vlgmr.msra.gmra.mrb[16].mxu0 %vm2189_vm2, %v2288_v46  ;;  %v2285_v36 = vmul.f32 %v4877_v49, %v5822_v40  ;;  %v2290_v3 = vpack.c.bf16 %v2282_v35, %v2282_v35  ;;  %v4879_v34 = vpop.eup %4878 }
 0x5cf   : > { %4556 = vmatpush3.bf16.msra.mxu0 %v2483_v33  ;;  %4564 = vmatmul.mubr.msk.bf16.vlgmr.msra.gmra.mrb[36].mxu1 %vm2189_vm2, %v2291_v48  ;;  %v2284_v40 = vmul.f32 %v4879_v34, %v5816_v37  ;;  %v4758_v37 = vld [vmem:[%s5510_s19 + $0x10] sm:$0xff]  }
 0x5d0   : > { %4574 = vmatpush3.bf16.msra.mxu1 %v2621_v50  ;;  %4557 = vmatprep.mubr.msk.bf16.mxu0 %vm5171_vm0, %v5169_v6  ;;  %v2293_v51 = vpack.c.bf16 %v2285_v36, %v2285_v36 }
 0x5d1   : > { %4567 = vmatprep.subr.bf16.mxu0 %v5169_v6  ;;  %4575 = vmatprep.mubr.msk.bf16.mxu1 %vm5171_vm0, %v5169_v6  ;;  %v2292_v52 = vpack.c.bf16 %v2284_v40, %v2284_v40 }
 0x5d6   : > { %4558 = vmatmul.mubr.msk.bf16.vlgmr.msra.gmra.mrb[20].mxu0 %vm2189_vm2, %v2290_v3 }
 0x5d7   : > { %4568 = vmatpush3.bf16.msra.mxu0 %v2575_v30  ;;  %4576 = vmatmul.mubr.msk.bf16.vlgmr.msra.gmra.mrb[40].mxu1 %vm2189_vm2, %v2293_v51 }
 0x5d8   : > { %4569 = vmatprep.mubr.msk.bf16.mxu0 %vm5171_vm0, %v5169_v6  ;;  %4579 = vmatprep.subr.bf16.mxu0 %v5169_v6 }
 0x5d9   : > { %3369 = vmatprep.mubr.bf16.mxu1 %v5170_v32 }
 0x5de   : > { %4570 = vmatmul.mubr.msk.bf16.vlgmr.msra.gmra.mrb[24].mxu0 %vm2189_vm2, %v2292_v52 }
 0x5df   : > { %4595 = vmatprep.mubr.msk.bf16.mxu0 %vm5171_vm0, %v5169_v6  ;;  %4580 = vmatpush3.bf16.msra.mxu0 %v4756_v53 }
 0x5e0   : > { %4581 = vmatprep.subr.bf16.mxu0 %v5169_v6 }
 0x5e3   : > { %4582 = vmatpush3.bf16.msra.mxu0 %v4757_v54 }
 0x5e4   : > { %4583 = vmatprep.subr.bf16.mxu0 %v5169_v6 }
 0x5e7   : > { %4584 = vmatpush3.bf16.msra.mxu0 %v4758_v37 }
 0x5e8   : > { %4585 = vmatprep.subr.bf16.mxu0 %v5169_v6 }
 0x5eb   : > { %4586 = vmatpush3.bf16.msra.mxu0 %v4759_v55 }
 0x5ec   : > { %4587 = vmatprep.subr.bf16.mxu0 %v5169_v6 }
 0x5ef   : > { %4588 = vmatpush3.bf16.msra.mxu0 %v4760_v56 }
 0x5f0   : > { %4589 = vmatprep.subr.bf16.mxu0 %v5169_v6 }
 0x5f3   : > { %4590 = vmatpush3.bf16.msra.mxu0 %v4761_v57 }
 0x5f4   : > { %4591 = vmatprep.subr.bf16.mxu0 %v5169_v6 }
 0x679   : > { %v2335_v58 = vpop.f32.mrb[12].mxu0 }
 0x67a   : > { %v4535_v59 = vpop.f32.mrb[13].mxu0 }
 0x67b   : > { %v2338_v60 = vpop.f32.mrb[14].mxu0  ;;  %v2381_v62 = vpop.f32.mrb[28].mxu1 }
 0x67c   : > { %v4536_v61 = vpop.f32.mrb[15].mxu0  ;;  %v4541_v63 = vpop.f32.mrb[29].mxu1 }
 0x67d   : > { %v2384_v0 = vpop.f32.mrb[30].mxu1 }
 0x67e   : > { %v4542_v2 = vpop.f32.mrb[31].mxu1 }
 0x699   : > { %v2473_v4 = vpop.f32.mrb[32].mxu1 }
 0x69a   : > { %v2679_v5 = vcombine.low %v2381_v62, %v2473_v4  ;;  %v2680_v8 = vcombine.high %v2381_v62, %v2473_v4  ;;  %v4553_v9 = vpop.f32.mrb[33].mxu1 }
 0x69b   : > { %v2476_v10 = vpop.f32.mrb[34].mxu1 }
 0x69c   : > { %v4554_v12 = vpop.f32.mrb[35].mxu1  ;;  %v2687_v22 = vrot.slane %v2679_v5, %v5631_v16  ;;  %v2694_v23 = vrot.slane %v2680_v8, %v5631_v16 }
 0x6a1   : > { %v2427_v13 = vpop.f32.mrb[16].mxu0 }
 0x6a2   : > { %v2663_v14 = vcombine.low %v2335_v58, %v2427_v13  ;;  %v2664_v15 = vcombine.high %v2335_v58, %v2427_v13  ;;  %v2565_v17 = vpop.f32.mrb[36].mxu1  ;;  %v4547_v18 = vpop.f32.mrb[17].mxu0 }
 0x6a3   : > { %v4565_v19 = vpop.f32.mrb[37].mxu1  ;;  %v2430_v20 = vpop.f32.mrb[18].mxu0 }
 0x6a4   : > { %v2671_v24 = vrot.slane %v2663_v14, %v5631_v16  ;;  %v2678_v25 = vrot.slane %v2664_v15, %v5631_v16  ;;  %v2568_v27 = vpop.f32.mrb[38].mxu1  ;;  %v4548_v28 = vpop.f32.mrb[19].mxu0 }
 0x6a5   : > { %v4566_v21 = vpop.f32.mrb[39].mxu1 }
 0x6a6   : > { %v2695_v31 = vcombine.low %v2671_v24, %v2687_v22  ;;  %v2696_v38 = vcombine.high %v2671_v24, %v2687_v22  ;;  %v2711_v39 = vcombine.low %v2678_v25, %v2694_v23  ;;  %v2712_v29 = vcombine.high %v2678_v25, %v2694_v23 }
 0x6a8   : > { %v2703_v41 = vrot.slane %v2695_v31, %v5637_v26  ;;  %v2710_v42 = vrot.slane %v2696_v38, %v5637_v26  ;;  %v2719_v43 = vrot.slane %v2711_v39, %v5637_v26  ;;  %v2726_v44 = vrot.slane %v2712_v29, %v5637_v26  ;;  %v4762_v38 = vld [vmem:[%s5510_s19 + $0x30] sm:$0xff]  }
 0x6a9   : > { %v2519_v45 = vpop.f32.mrb[20].mxu0  ;;  %4592 = vmatpush3.bf16.msra.mxu0 %v4762_v38 }
 0x6aa   : > { %v2799_v1 = vcombine.low %v2703_v41, %v2710_v42  ;;  %v4281_v46 = vcombine.high %v2703_v41, %v2710_v42  ;;  %v2815_v47 = vcombine.low %v2719_v43, %v2726_v44  ;;  %v4282_v48 = vcombine.high %v2719_v43, %v2726_v44  ;;  %v2657_v49 = vpop.f32.mrb[40].mxu1  ;;  %v4559_v33 = vpop.f32.mrb[21].mxu0  ;;  %4593 = vmatprep.subr.bf16.mxu0 %v5169_v6 }
 0x6ab   : > { %v2747_v50 = vcombine.low %v2565_v17, %v2657_v49  ;;  %v2748_v35 = vcombine.high %v2565_v17, %v2657_v49  ;;  %v4577_v36 = vpop.f32.mrb[41].mxu1  ;;  %v2522_v11 = vpop.f32.mrb[22].mxu0  ;;  %v4763_v33 = vld [vmem:[%s5510_s19 + $0x38] sm:$0xff]  }
 0x6ac   : > { %v2806_v3 = vrot.slane %v2799_v1, %v5631_v16  ;;  %v2814_v34 = vrot.slane %v4281_v46, %v5631_v16  ;;  %v2822_v51 = vrot.slane %v2815_v47, %v5631_v16  ;;  %v2830_v30 = vrot.slane %v4282_v48, %v5631_v16  ;;  %v2660_v40 = vpop.f32.mrb[42].mxu1  ;;  %v4560_v52 = vpop.f32.mrb[23].mxu0 }
 0x6ad   : > { %v4578_v53 = vpop.f32.mrb[43].mxu1  ;;  %v2755_v10 = vrot.slane %v2747_v50, %v5631_v16  ;;  %v2762_v12 = vrot.slane %v2748_v35, %v5631_v16  ;;  %4594 = vmatpush3.bf16.msra.mxu0 %v4763_v33  ;;  %v4796_v33 = vld [vmem:[%s5512_s25 + $0xa4] ss:$16 sps:$4 sm:$0xff]  }
 0x6ae   : > { %v2832_v54 = vcombine.high %v2806_v3, %v2814_v34  ;;  %v2848_v37 = vcombine.high %v2822_v51, %v2830_v30  ;;  %v2831_v55 = vcombine.low %v2806_v3, %v2814_v34  ;;  %v2847_v56 = vcombine.low %v2822_v51, %v2830_v30 }
 0x6b0   : > { %v2846_v57 = vrot.slane %v2832_v54, %v5637_v26  ;;  %v2862_v58 = vrot.slane %v2848_v37, %v5637_v26  ;;  %v5939_v59 = vrot.slane %v2831_v55, %v5637_v26  ;;  %v2855_v60 = vrot.slane %v2847_v56, %v5637_v26 }
 0x6b1   : > { %v2611_v62 = vpop.f32.mrb[24].mxu0 }
 0x6b2   : > { %v2731_v61 = vcombine.low %v2519_v45, %v2611_v62  ;;  %v2732_v63 = vcombine.high %v2519_v45, %v2611_v62  ;;  %v4571_v0 = vpop.f32.mrb[25].mxu0  ;;  %v2865_v2 = vcombine.low %v2846_v57, %v2862_v58  ;;  %v2863_v4 = vcombine.low %v5939_v59, %v2855_v60 }
 0x6b3   : > { %v2614_v5 = vpop.f32.mrb[26].mxu0  ;;  %v2864_v8 = vcombine.high %v5939_v59, %v2855_v60  ;;  %v2866_v9 = vcombine.high %v2846_v57, %v2862_v58 }
 0x6b4   : > { %v2739_v13 = vrot.slane %v2731_v61, %v5631_v16  ;;  %v2746_v14 = vrot.slane %v2732_v63, %v5631_v16  ;;  %v4572_v15 = vpop.f32.mrb[27].mxu0  ;;  %v4285_v61 = vld [vmem:[%s662_s27] ss:$0 sm:$0xff] }
 0x6b5   : > { %v4916_v5 = vld [vmem:[#allocation2] sm:$0xff]  ;;  %v4767_v15 = vld [vmem:[%s5512_s25 + $0x8] ss:$16 sps:$4 sm:$0xff]  }
 0x6b6   : > { %v2763_v17 = vcombine.low %v2739_v13, %v2755_v10  ;;  %v2764_v18 = vcombine.high %v2739_v13, %v2755_v10  ;;  %v2779_v19 = vcombine.low %v2746_v14, %v2762_v12  ;;  %v2780_v20 = vcombine.high %v2746_v14, %v2762_v12  ;;  %v4764_v13 = vld [vmem:[%s5512_s25] ss:$16 sps:$4 sm:$0xff]   ;;  %v4766_v14 = vld [vmem:[%s5512_s25 + $0x4] ss:$16 sps:$4 sm:$0xff]  }
 0x6b7   : > { %3337 = vmatprep.subr.bf16.mxu1 %v4766_v14  ;;  %v4817_v14 = vld [vmem:[%s5552_s8 + $0xc8] sm:$0xff]  }
 0x6b8   : > { %v2771_v22 = vrot.slane %v2763_v17, %v5637_v26  ;;  %v2778_v23 = vrot.slane %v2764_v18, %v5637_v26  ;;  %v2787_v24 = vrot.slane %v2779_v19, %v5637_v26  ;;  %v2794_v25 = vrot.slane %v2780_v20, %v5637_v26  ;;  %v4769_v17 = vld [vmem:[%s5512_s25 + $0xc] ss:$16 sps:$4 sm:$0xff]   ;;  %v4772_v18 = vld [vmem:[%s5512_s25 + $0x24] ss:$16 sps:$4 sm:$0xff]   ;;  %3338 = vmatpush1.bf16.msra.mxu1 %v4764_v13  ;;  %v4770_v20 = vld [vmem:[%s5512_s25 + $0x20] ss:$16 sps:$4 sm:$0xff]  }
 0x6b9   : > { %v4775_v19 = vld [vmem:[%s5512_s25 + $0x2c] ss:$16 sps:$4 sm:$0xff]   ;;  %3380 = vmatprep.subr.bf16.mxu0 %v4769_v17  ;;  %3339 = vmatprep.subr.bf16.mxu1 %v4772_v18  ;;  %v4820_v18 = vld [vmem:[%s5552_s8 + $0x50] sm:$0xff]  }
 0x6ba   : > { %v2867_v27 = vcombine.low %v2771_v22, %v2778_v23  ;;  %v4283_v28 = vcombine.high %v2771_v22, %v2778_v23  ;;  %v2883_v21 = vcombine.low %v2787_v24, %v2794_v25  ;;  %v4284_v31 = vcombine.high %v2787_v24, %v2794_v25  ;;  %v4773_v22 = vld [vmem:[%s5512_s25 + $0x28] ss:$16 sps:$4 sm:$0xff]  }
 0x6bb   : > { %v4816_v13 = vld [vmem:[%s5552_s8 + $0x48] sm:$0xff]  }
 0x6bc   : > { %v2874_v39 = vrot.slane %v2867_v27, %v5631_v16  ;;  %v2882_v29 = vrot.slane %v4283_v28, %v5631_v16  ;;  %v2890_v41 = vrot.slane %v2883_v21, %v5631_v16  ;;  %v2898_v42 = vrot.slane %v4284_v31, %v5631_v16  ;;  %3340 = vmatpush1.bf16.msra.mxu1 %v4770_v20  ;;  %v4819_v17 = vld [vmem:[%s5552_s8 + $0x88] sm:$0xff]   ;;  %v4822_v20 = vld [vmem:[%s5552_s8 + $0x10] sm:$0xff]  }
 0x6be   : > { %v2900_v43 = vcombine.high %v2874_v39, %v2882_v29  ;;  %v2916_v44 = vcombine.high %v2890_v41, %v2898_v42  ;;  %v2899_v45 = vcombine.low %v2874_v39, %v2882_v29  ;;  %v2915_v1 = vcombine.low %v2890_v41, %v2898_v42  ;;  %v4778_v39 = vld [vmem:[%s5512_s25 + $0x44] ss:$16 sps:$4 sm:$0xff]   ;;  %v4781_v29 = vld [vmem:[%s5512_s25 + $0x4c] ss:$16 sps:$4 sm:$0xff]   ;;  %v4776_v41 = vld [vmem:[%s5512_s25 + $0x40] ss:$16 sps:$4 sm:$0xff]  }
 0x6bf   : > { %v4779_v42 = vld [vmem:[%s5512_s25 + $0x48] ss:$16 sps:$4 sm:$0xff]   ;;  %3341 = vmatprep.subr.bf16.mxu1 %v4778_v39 }
 0x6c0   : > { %v2914_v46 = vrot.slane %v2900_v43, %v5637_v26  ;;  %v2930_v47 = vrot.slane %v2916_v44, %v5637_v26  ;;  %v2907_v48 = vrot.slane %v2899_v45, %v5637_v26  ;;  %v2923_v49 = vrot.slane %v2915_v1, %v5637_v26  ;;  %3342 = vmatpush1.bf16.msra.mxu1 %v4776_v41  ;;  %v4784_v43 = vld [vmem:[%s5512_s25 + $0x64] ss:$16 sps:$4 sm:$0xff]   ;;  %v4787_v44 = vld [vmem:[%s5512_s25 + $0x6c] ss:$16 sps:$4 sm:$0xff]   ;;  %v4782_v45 = vld [vmem:[%s5512_s25 + $0x60] ss:$16 sps:$4 sm:$0xff]  }
 0x6c1   : > { %v4785_v1 = vld [vmem:[%s5512_s25 + $0x68] ss:$16 sps:$4 sm:$0xff]   ;;  %3343 = vmatprep.subr.bf16.mxu1 %v4784_v43  ;;  %v4836_v43 = vld [vmem:[%s5552_s8 + $0x70] sm:$0xff]  }
 0x6c2   : > { %v2933_v50 = vcombine.low %v2914_v46, %v2930_v47  ;;  %v2932_v35 = vcombine.high %v2907_v48, %v2923_v49  ;;  %v2931_v36 = vcombine.low %v2907_v48, %v2923_v49  ;;  %v2934_v16 = vcombine.high %v2914_v46, %v2930_v47  ;;  %v4790_v46 = vld [vmem:[%s5512_s25 + $0x84] ss:$16 sps:$4 sm:$0xff]   ;;  %v4788_v47 = vld [vmem:[%s5512_s25 + $0x80] ss:$16 sps:$4 sm:$0xff]   ;;  %v4791_v48 = vld [vmem:[%s5512_s25 + $0x88] ss:$16 sps:$4 sm:$0xff]  }
 0x6c3   : > { %v4793_v49 = vld [vmem:[%s5512_s25 + $0x8c] ss:$16 sps:$4 sm:$0xff]  }
 0x6c4   : > { %v4714_v11 = vpack.i.bf16 %v2933_v50, %v2865_v2  ;;  %v4709_v3 = vpack.i.bf16 %v2932_v35, %v2864_v8  ;;  %v4719_v34 = vpack.i.bf16 %v2934_v16, %v2866_v9  ;;  %3344 = vmatpush1.bf16.msra.mxu1 %v4782_v45  ;;  %v4799_v50 = vld [vmem:[%s5512_s25 + $0xac] ss:$16 sps:$4 sm:$0xff]   ;;  %v4794_v35 = vld [vmem:[%s5512_s25 + $0xa0] ss:$16 sps:$4 sm:$0xff]   ;;  %v4802_v16 = vld [vmem:[%s5512_s25 + $0xc4] ss:$16 sps:$4 sm:$0xff]  }
 0x6c5   : > { %3345 = vmatprep.subr.bf16.mxu1 %v4790_v46  ;;  %v4832_v39 = vld [vmem:[%s5552_s8 + $0x68] sm:$0xff]   ;;  %v4838_v45 = vld [vmem:[%s5552_s8 + $0x30] sm:$0xff]   ;;  %v4840_v46 = vld [vmem:[%s5552_s8 + $0x78] sm:$0xff]  }
 0x6c6   : > { %4715 = vrot.lane.b32.xlu0 %v4714_v11, %s5172_s11  ;;  %4710 = vrot.lane.b32.xlu1 %v4709_v3, %s5174_s20  ;;  %v4805_v11 = vld [vmem:[%s5512_s25 + $0xcc] ss:$16 sps:$4 sm:$0xff]   ;;  %v4800_v3 = vld [vmem:[%s5512_s25 + $0xc0] ss:$16 sps:$4 sm:$0xff]  }
 0x6c7   : > { %v4834_v41 = vld [vmem:[%s5552_s8 + $0x28] sm:$0xff]  }
 0x6c8   : > { %3346 = vmatpush1.bf16.msra.mxu1 %v4788_v47  ;;  %v4841_v47 = vld [vmem:[%s5552_s8 + $0xf8] sm:$0xff]  }
 0x6c9   : > { %3347 = vmatprep.subr.bf16.mxu1 %v4796_v33  ;;  %v3159_v33 = vsub.s32 0, %v5624_v7 }
 0x6ca   : > { %4720 = vrot.lane.b32.xlu1 %v4719_v34, %s5173_s23  ;;  %v4803_v34 = vld [vmem:[%s5512_s25 + $0xc8] ss:$16 sps:$4 sm:$0xff]  }
 0x6cc   : > { %3348 = vmatpush1.bf16.msra.mxu1 %v4794_v35  ;;  %v3155_v35 = vld [vmem:[%s5546_s4] sm:$0xf] }
 0x6cd   : > { %3349 = vmatprep.subr.bf16.mxu1 %v4802_v16  ;;  %v3171_v16 = vsub.s32 3, %v5624_v7 }
 0x6d0   : > { %3350 = vmatpush1.bf16.msra.mxu1 %v4800_v3 }
 0x738   : > { %v4716_v6 = vpop.permute.xlu0 %4715  ;;  %v4711_v51 = vpop.permute.xlu1 %4710 }
 0x739   : > { %v4713_v30 = vunpack.i.h.bf16 %v4711_v51  ;;  %v4712_v40 = vunpack.i.l.bf16 %v4711_v51  ;;  %v4718_v26 = vunpack.i.h.bf16 %v4716_v6  ;;  %v4717_v52 = vunpack.i.l.bf16 %v4716_v6  ;;  %v4808_v6 = vld [vmem:[%s5512_s25 + $0xe4] ss:$16 sps:$4 sm:$0xff]   ;;  %v4811_v51 = vld [vmem:[%s5512_s25 + $0xec] ss:$16 sps:$4 sm:$0xff]  }
 0x73a   : > { %3351 = vmatprep.subr.bf16.mxu1 %v4808_v6  ;;  %v3172_v6 = vrot.slane %v3155_v35, %v3171_v16 }
 0x73b   : > { %v2959_v53 = vsel %vm1820_vm1, %v2863_v4, %v4712_v40  ;;  %v2960_v54 = vsel %vm1820_vm1, %v2931_v36, %v4713_v30  ;;  %v4797_v36 = vld [vmem:[%s5512_s25 + $0xa8] ss:$16 sps:$4 sm:$0xff]   ;;  %v4806_v30 = vld [vmem:[%s5512_s25 + $0xe0] ss:$16 sps:$4 sm:$0xff]  }
 0x73c   : > { %v4721_v37 = vpop.permute.xlu1 %4720  ;;  %v2962_v57 = vsel %vm2961_vm4, %v2959_v53, %v4717_v52  ;;  %v2963_v58 = vsel %vm2961_vm4, %v2960_v54, %v4718_v26  ;;  %v4809_v40 = vld [vmem:[%s5512_s25 + $0xe8] ss:$16 sps:$4 sm:$0xff]   ;;  %3352 = vmatpush1.bf16.msra.mxu1 %v4806_v30 }
 0x73d   : > { %v4723_v55 = vunpack.i.h.bf16 %v4721_v37  ;;  %v4722_v56 = vunpack.i.l.bf16 %v4721_v37 }
 0x73f   : > { %v2965_v59 = vsel %vm2964_vm5, %v2962_v57, %v4722_v56  ;;  %v2966_v60 = vsel %vm2964_vm5, %v2963_v58, %v4723_v55  ;;  %v4294_v57 = vld [vmem:[%s665_s14] ss:$0 sm:$0xff] }
 0x740   : > { %v2967_v62 = vpack.c.bf16 %v2966_v60, %v2965_v59 }
 0x742   : > { %4596 = vmatmul.mubr.bf16.vlgmr.msra.gmra.mrb[28].mxu0 %v2967_v62 }
 0x743   : > { %3412 = vmatprep.mubr.bf16.mxu0 %v5170_v32  ;;  %v4917_v32 = vld [vmem:[#allocation2 + $0x8] sm:$0xff]  ;;  %3381 = vmatpush1.bf16.msra.mxu0 %v4767_v15 }
 0x744   : > { %3382 = vmatprep.subr.bf16.mxu0 %v4775_v19  ;;  %v4818_v15 = vld [vmem:[%s5552_s8 + $0x8] sm:$0xff]   ;;  %v4821_v19 = vld [vmem:[%s5552_s8 + $0xd0] sm:$0xff]  }
 0x747   : > { %3383 = vmatpush1.bf16.msra.mxu0 %v4773_v22  ;;  %v4823_v22 = vld [vmem:[%s5552_s8 + $0x90] sm:$0xff]  }
 0x748   : > { %3384 = vmatprep.subr.bf16.mxu0 %v4781_v29  ;;  %v4833_v29 = vld [vmem:[%s5552_s8 + $0xe8] sm:$0xff]  }
 0x74b   : > { %3385 = vmatpush1.bf16.msra.mxu0 %v4779_v42  ;;  %v4835_v42 = vld [vmem:[%s5552_s8 + $0xa8] sm:$0xff]  }
 0x74c   : > { %3386 = vmatprep.subr.bf16.mxu0 %v4787_v44  ;;  %v4837_v44 = vld [vmem:[%s5552_s8 + $0xf0] sm:$0xff]  }
 0x74f   : > { %3387 = vmatpush1.bf16.msra.mxu0 %v4785_v1  ;;  %v4839_v1 = vld [vmem:[%s5552_s8 + $0xb0] sm:$0xff]  }
 0x750   : > { %3388 = vmatprep.subr.bf16.mxu0 %v4793_v49  ;;  %v4843_v49 = vld [vmem:[%s5552_s8 + $0xb8] sm:$0xff]  }
 0x753   : > { %3389 = vmatpush1.bf16.msra.mxu0 %v4791_v48  ;;  %v4842_v48 = vld [vmem:[%s5552_s8 + $0x38] sm:$0xff]  }
 0x754   : > { %3390 = vmatprep.subr.bf16.mxu0 %v4799_v50  ;;  %v3167_v50 = vsub.s32 2, %v5624_v7 }
 0x756   : > { %v3168_v3 = vrot.slane %v3155_v35, %v3167_v50 }
 0x757   : > { %3391 = vmatpush1.bf16.msra.mxu0 %v4797_v36  ;;  %v3163_v36 = vsub.s32 1, %v5624_v7 }
 0x758   : > { %3392 = vmatprep.subr.bf16.mxu0 %v4805_v11  ;;  %v3160_v11 = vrot.slane %v3155_v35, %v3159_v33 }
 0x75b   : > { %3393 = vmatpush1.bf16.msra.mxu0 %v4803_v34  ;;  %v3164_v34 = vrot.slane %v3155_v35, %v3163_v36 }
 0x75c   : > { %3394 = vmatprep.subr.bf16.mxu0 %v4811_v51 }
 0x75f   : > { %3395 = vmatpush1.bf16.msra.mxu0 %v4809_v40 }
 0x815   : > { %v3073_v63 = vpop.f32.mrb[28].mxu0 }
 0x816   : > { %v3074_v0 = vadd.f32 %v4285_v61, %v3073_v63  ;;  %v4597_v2 = vpop.f32.mrb[29].mxu0 }
 0x817   : > { %v3076_v4 = vpop.f32.mrb[30].mxu0 }
 0x818   : > { %v5974_v8 = vadd.f32 %v4916_v5, %v3074_v0  ;;  %v3077_v9 = vadd.f32 %v4285_v61, %v3076_v4  ;;  %v4598_v10 = vpop.f32.mrb[31].mxu0  ;;  %v4295_v61 = vld [vmem:[%s668_s17] ss:$0 sm:$0xff] }
 0x819   : > { %v4812_v5 = vld [vmem:[%s5552_s8 + $0x40] sm:$0xff]  }
 0x81a   : > { %v5976_v12 = vadd.f32 %v4917_v32, %v3077_v9  ;;  %3084 = vadd.xlane.f32.xlu1 %v5974_v8  ;;  %v4813_v9 = vld [vmem:[%s5552_s8 + $0xc0] sm:$0xff]   ;;  %4419 = vmatprep.subr.bf16.mxu1 %v4812_v5 }
 0x81b   : > { %v4814_v10 = vld [vmem:[%s5552_s8] sm:$0xff]   ;;  %4441 = vmatprep.subr.bf16.mxu0 %v4813_v9 }
 0x81c   : > { %3086 = vadd.xlane.f32.xlu0 %v5976_v12  ;;  %v4815_v32 = vld [vmem:[%s5552_s8 + $0x80] sm:$0xff]  }
 0x8a7   : > { %v3085_v23 = vpop.xlane.xlu1 %3084 }
 0x8a8   : > { %v3088_v24 = vmul.f32 0.0078125, %v3085_v23  ;;  %v4824_v23 = vld [vmem:[%s5552_s8 + $0x58] sm:$0xff]  }
 0x8a9   : > { %v3087_v25 = vpop.xlane.xlu0 %3086 }
 0x8aa   : > { %v5989_v27 = vsub.f32 %v5974_v8, %v3088_v24  ;;  %v3089_v28 = vmul.f32 0.0078125, %v3087_v25  ;;  %v4825_v24 = vld [vmem:[%s5552_s8 + $0xd8] sm:$0xff]  }
 0x8ab   : > { %v4826_v25 = vld [vmem:[%s5552_s8 + $0x18] sm:$0xff]  }
 0x8ac   : > { %v5992_v21 = vsub.f32 %v5976_v12, %v3089_v28  ;;  %v3092_v31 = vmul.f32 %v5989_v27, %v5989_v27  ;;  %v4828_v28 = vld [vmem:[%s5552_s8 + $0x60] sm:$0xff]  }
 0x8ae   : > { %3094 = vadd.xlane.f32.xlu0 %v3092_v31  ;;  %v3093_v38 = vmul.f32 %v5992_v21, %v5992_v21  ;;  %v4830_v31 = vld [vmem:[%s5552_s8 + $0x20] sm:$0xff]  }
 0x8b0   : > { %3096 = vadd.xlane.f32.xlu1 %v3093_v38  ;;  %v4831_v38 = vld [vmem:[%s5552_s8 + $0xa0] sm:$0xff]  }
 0x93b   : > { %v3095_v26 = vpop.xlane.xlu0 %3094 }
 0x93c   : > { %v3098_v52 = vmul.f32 0.0078125, %v3095_v26 }
 0x93d   : > { %v3097_v53 = vpop.xlane.xlu1 %3096 }
 0x93e   : > { %v3100_v54 = vadd.f32 1e-05, %v3098_v52  ;;  %v3099_v37 = vmul.f32 0.0078125, %v3097_v53 }
 0x940   : > { %4880 = vrsqrt.f32 %v3100_v54  ;;  %v3101_v55 = vadd.f32 1e-05, %v3099_v37 }
 0x942   : > { %4882 = vrsqrt.f32 %v3101_v55 }
 0x94a   : > { %v4881_v56 = vpop.eup %4880 }
 0x94b   : > { %v3104_v58 = vmul.f32 %v4881_v56, %v5989_v27  ;;  %v4827_v27 = vld [vmem:[%s5552_s8 + $0x98] sm:$0xff]  }
 0x94c   : > { %v4883_v59 = vpop.eup %4882 }
 0x94d   : > { %v3105_v60 = vmul.f32 %v4883_v59, %v5992_v21  ;;  %v3112_v62 = vmul.f32 %v4294_v57, %v3104_v58  ;;  %v4829_v21 = vld [vmem:[%s5552_s8 + $0xe0] sm:$0xff]  }
 0x94f   : > { %v3113_v63 = vmul.f32 %v4294_v57, %v3105_v60  ;;  %v3120_v0 = vadd.f32 %v4295_v61, %v3112_v62 }
 0x951   : > { %v3121_v2 = vadd.f32 %v4295_v61, %v3113_v63 }
 0x953   : > { %v3122_v4 = vpack.c.bf16 %v3121_v2, %v3120_v0 }
 0x955   : > { %3370 = vmatmul.mubr.bf16.vlgmr.msra.gmra.mrb[44].mxu1 %v3122_v4  ;;  %3413 = vmatmul.mubr.bf16.vlgmr.msra.gmra.mrb[32].mxu0 %v3122_v4 }
 0x956   : > { %4420 = vmatpush3.bf16.msra.mxu1 %v4814_v10  ;;  %4442 = vmatpush3.bf16.msra.mxu0 %v4815_v32 }
 0x957   : > { %4421 = vmatprep.subr.bf16.mxu1 %v4816_v13  ;;  %4443 = vmatprep.subr.bf16.mxu0 %v4817_v14 }
 0x95a   : > { %4422 = vmatpush3.bf16.msra.mxu1 %v4818_v15  ;;  %4444 = vmatpush3.bf16.msra.mxu0 %v4819_v17 }
 0x95b   : > { %4423 = vmatprep.subr.bf16.mxu1 %v4820_v18  ;;  %4445 = vmatprep.subr.bf16.mxu0 %v4821_v19 }
 0x95e   : > { %4424 = vmatpush3.bf16.msra.mxu1 %v4822_v20  ;;  %4446 = vmatpush3.bf16.msra.mxu0 %v4823_v22 }
 0x95f   : > { %4425 = vmatprep.subr.bf16.mxu1 %v4824_v23  ;;  %4447 = vmatprep.subr.bf16.mxu0 %v4825_v24 }
 0x962   : > { %4426 = vmatpush3.bf16.msra.mxu1 %v4826_v25  ;;  %4448 = vmatpush3.bf16.msra.mxu0 %v4827_v27 }
 0x963   : > { %4427 = vmatprep.subr.bf16.mxu1 %v4828_v28  ;;  %4449 = vmatprep.subr.bf16.mxu0 %v4829_v21 }
 0x966   : > { %4428 = vmatpush3.bf16.msra.mxu1 %v4830_v31  ;;  %4450 = vmatpush3.bf16.msra.mxu0 %v4831_v38 }
 0x967   : > { %4429 = vmatprep.subr.bf16.mxu1 %v4832_v39  ;;  %4451 = vmatprep.subr.bf16.mxu0 %v4833_v29 }
 0x96a   : > { %4430 = vmatpush3.bf16.msra.mxu1 %v4834_v41  ;;  %4452 = vmatpush3.bf16.msra.mxu0 %v4835_v42 }
 0x96b   : > { %4431 = vmatprep.subr.bf16.mxu1 %v4836_v43  ;;  %4453 = vmatprep.subr.bf16.mxu0 %v4837_v44 }
 0x96e   : > { %4432 = vmatpush3.bf16.msra.mxu1 %v4838_v45  ;;  %4454 = vmatpush3.bf16.msra.mxu0 %v4839_v1 }
 0x96f   : > { %4433 = vmatprep.subr.bf16.mxu1 %v4840_v46  ;;  %4455 = vmatprep.subr.bf16.mxu0 %v4841_v47 }
 0x972   : > { %4434 = vmatpush3.bf16.msra.mxu1 %v4842_v48  ;;  %4456 = vmatpush3.bf16.msra.mxu0 %v4843_v49 }
 0xa28   : > { %v3371_v51 = vpop.f32.mrb[44].mxu1  ;;  %v3414_v30 = vpop.f32.mrb[32].mxu0 }
 0xa29   : > { %v3372_v40 = vadd.f32 %v3371_v51, %v3160_v11  ;;  %v3415_v26 = vadd.f32 %v3414_v30, %v3168_v3  ;;  %v3373_v52 = vpop.f32.mrb[45].mxu1  ;;  %v3416_v53 = vpop.f32.mrb[33].mxu0 }
 0xa2a   : > { %v6071_v54 = vadd.f32 %v3373_v52, %v3164_v34  ;;  %v6073_v37 = vadd.f32 %v3416_v53, %v3172_v6  ;;  %v3375_v55 = vpop.f32.mrb[46].mxu1  ;;  %v3418_v56 = vpop.f32.mrb[34].mxu0 }
 0xa2b   : > { %v6075_v57 = vmul.f32 0.70710677, %v3372_v40  ;;  %v6077_v58 = vmul.f32 0.70710677, %v3415_v26  ;;  %v3377_v63 = vpop.f32.mrb[47].mxu1  ;;  %v3420_v5 = vpop.f32.mrb[35].mxu0  ;;  %v6089_v14 = vadd.f32 %v3375_v55, %v3160_v11  ;;  %v6094_v18 = vadd.f32 %v3418_v56, %v3168_v3 }
 0xa2c   : > { %v6080_v7 = vmul.f32 0.70710677, %v6071_v54  ;;  %v6086_v61 = vmul.f32 0.70710677, %v6073_v37  ;;  %v6096_v20 = vadd.f32 %v3377_v63, %v3164_v34  ;;  %v6106_v39 = vadd.f32 %v3420_v5, %v3172_v6 }
 0xa2d   : > { %v3455_v59 = vand.u32 2147483647, %v6075_v57  ;;  %v3457_v60 = vand.u32 2147483647, %v6077_v58  ;;  %v6092_v17 = vmul.f32 0.70710677, %v6089_v14 }
 0xa2e   : > { %v3456_v62 = vand.u32 2147483647, %v6080_v7  ;;  %v3458_v32 = vand.u32 2147483647, %v6086_v61  ;;  %v6100_v24 = vmul.f32 0.70710677, %v6094_v18 }
 0xa2f   : > { %v3463_v0 = vmul.f32 0.3275911, %v3455_v59  ;;  %v3465_v2 = vmul.f32 0.3275911, %v3457_v60  ;;  %v3459_v22 = vand.u32 2147483647, %v6092_v17 }
 0xa30   : > { %v3464_v4 = vmul.f32 0.3275911, %v3456_v62  ;;  %v3466_v15 = vmul.f32 0.3275911, %v3458_v32  ;;  %v3559_v23 = vsub.f32 0.0, %v3455_v59  ;;  %v3561_v25 = vsub.f32 0.0, %v3457_v60 }
 0xa31   : > { %v3471_v9 = vadd.f32 1.0, %v3463_v0  ;;  %v3473_v10 = vadd.f32 1.0, %v3465_v2  ;;  %v3467_v27 = vmul.f32 0.3275911, %v3459_v22  ;;  %v3560_v28 = vsub.f32 0.0, %v3456_v62 }
 0xa32   : > { %v3472_v13 = vadd.f32 1.0, %v3464_v4  ;;  %v3474_v19 = vadd.f32 1.0, %v3466_v15  ;;  %v3461_v21 = vand.u32 2147483647, %v6100_v24  ;;  %v6104_v31 = vmul.f32 0.70710677, %v6096_v20 }
 0xa33   : > { %4884 = vrcp.f32 %v3471_v9  ;;  %v3475_v38 = vadd.f32 1.0, %v3467_v27  ;;  %v3567_v29 = vmul.f32 %v3559_v23, %v3455_v59  ;;  %v3569_v44 = vmul.f32 %v3561_v25, %v3457_v60 }
 0xa34   : > { %4886 = vrcp.f32 %v3473_v10  ;;  %v3469_v41 = vmul.f32 0.3275911, %v3461_v21  ;;  %v6109_v42 = vand.u32 2147483647, %v6104_v31  ;;  %v3562_v45 = vsub.f32 0.0, %v3458_v32 }
 0xa35   : > { %4888 = vrcp.f32 %v3472_v13  ;;  %v3568_v47 = vmul.f32 %v3560_v28, %v3456_v62  ;;  %v6117_v33 = vmul.f32 0.5, %v3372_v40  ;;  %v6119_v50 = vmul.f32 0.5, %v3415_v26 }
 0xa36   : > { %4890 = vrcp.f32 %v3474_v19  ;;  %v3477_v48 = vadd.f32 1.0, %v3469_v41  ;;  %v3468_v49 = vmul.f32 0.3275911, %v6109_v42  ;;  %v6123_v36 = vmul.f32 0.70710677, %v6106_v39 }
 0xa37   : > { %4892 = vrcp.f32 %v3475_v38  ;;  %v3575_v11 = vmul.f32 1.442695, %v3567_v29  ;;  %v3579_v51 = vmul.f32 1.442695, %v3569_v44  ;;  %v3570_v30 = vmul.f32 %v3562_v45, %v3458_v32 }
 0xa38   : > { %4894 = vrcp.f32 %v3477_v48  ;;  %v3476_v3 = vadd.f32 1.0, %v3468_v49  ;;  %v6128_v52 = vand.u32 2147483647, %v6123_v36  ;;  %v3577_v53 = vmul.f32 1.442695, %v3568_v47 }
 0xa39   : > { %v3563_v55 = vsub.f32 0.0, %v3459_v22  ;;  %v3565_v60 = vsub.f32 0.0, %v3461_v21  ;;  %v3581_v5 = vmul.f32 1.442695, %v3570_v30  ;;  %vm3439_vm6 = vcmp.ge.f32.partialorder %v6075_v57, 0.0 }
 0xa3a   : > { %4896 = vrcp.f32 %v3476_v3  ;;  %v3470_v62 = vmul.f32 0.3275911, %v6128_v52  ;;  %v3564_v44 = vsub.f32 0.0, %v6109_v42  ;;  %vm3441_vm7 = vcmp.ge.f32.partialorder %v6077_v58, 0.0 }
 0xa3b   : > { %4898 = vpow2.f32 %v3575_v11  ;;  %v3571_v23 = vmul.f32 %v3563_v55, %v3459_v22  ;;  %v3573_v25 = vmul.f32 %v3565_v60, %v3461_v21  ;;  %v3566_v55 = vsub.f32 0.0, %v6128_v52 }
 0xa3c   : > { %4900 = vpow2.f32 %v3579_v51  ;;  %v3478_v9 = vadd.f32 1.0, %v3470_v62  ;;  %vm3440_vm8 = vcmp.ge.f32.partialorder %v6080_v7, 0.0  ;;  %vm3443_vm9 = vcmp.ge.f32.partialorder %v6092_v17, 0.0 }
 0xa3d   : > { %v6111_v43 = vpop.eup %4884  ;;  %4902 = vpow2.f32 %v3577_v53  ;;  %v3583_v49 = vmul.f32 1.442695, %v3571_v23  ;;  %v3572_v53 = vmul.f32 %v3564_v44, %v6109_v42  ;;  %vm3445_vm10 = vcmp.ge.f32.partialorder %v6100_v24, 0.0 }
 0xa3e   : > { %v6113_v1 = vpop.eup %4886  ;;  %v3487_v46 = vmul.f32 1.0614054, %v6111_v43  ;;  %4904 = vrcp.f32 %v3478_v9  ;;  %vm3442_vm11 = vcmp.ge.f32.partialorder %v6086_v61, 0.0  ;;  %vm3444_vm12 = vcmp.ge.f32.partialorder %v6104_v31, 0.0 }
 0xa3f   : > { %v3489_v35 = vmul.f32 1.0614054, %v6113_v1  ;;  %v6125_v34 = vpop.eup %4888  ;;  %4906 = vpow2.f32 %v3581_v5  ;;  %vm3446_vm13 = vcmp.ge.f32.partialorder %v6123_v36, 0.0  ;;  %v3426_v36 = vmul.f32 0.5, %v6073_v37 }
 0xa40   : > { %v3495_v16 = vadd.f32 -1.4531521, %v3487_v46  ;;  %v3488_v26 = vmul.f32 1.0614054, %v6125_v34  ;;  %v6132_v56 = vpop.eup %4890  ;;  %4908 = vpow2.f32 %v3583_v49 }
 0xa41   : > { %v3497_v6 = vadd.f32 -1.4531521, %v3489_v35  ;;  %v3490_v2 = vmul.f32 1.0614054, %v6132_v56  ;;  %v6139_v15 = vpop.eup %4892 }
 0xa42   : > { %v3503_v40 = vmul.f32 %v6111_v43, %v3495_v16  ;;  %v3496_v0 = vadd.f32 -1.4531521, %v3488_v26  ;;  %v3491_v29 = vmul.f32 1.0614054, %v6139_v15  ;;  %v6146_v45 = vpop.eup %4894  ;;  %v3587_v16 = vmul.f32 1.442695, %v3573_v25 }
 0xa43   : > { %v3505_v59 = vmul.f32 %v6113_v1, %v3497_v6  ;;  %v3498_v13 = vadd.f32 -1.4531521, %v3490_v2  ;;  %v3493_v35 = vmul.f32 1.0614054, %v6146_v45 }
 0xa44   : > { %v3511_v63 = vadd.f32 1.4214138, %v3503_v40  ;;  %v3504_v32 = vmul.f32 %v6125_v34, %v3496_v0  ;;  %v3499_v47 = vadd.f32 -1.4531521, %v3491_v29  ;;  %v6154_v30 = vpop.eup %4896  ;;  %4910 = vpow2.f32 %v3587_v16 }
 0xa45   : > { %v3513_v4 = vadd.f32 1.4214138, %v3505_v59  ;;  %v3506_v38 = vmul.f32 %v6132_v56, %v3498_v13  ;;  %v3501_v26 = vadd.f32 -1.4531521, %v3493_v35  ;;  %v4899_v59 = vpop.eup %4898  ;;  %v3492_v5 = vmul.f32 1.0614054, %v6154_v30 }
 0xa46   : > { %v3519_v10 = vmul.f32 %v6111_v43, %v3511_v63  ;;  %v3512_v28 = vadd.f32 1.4214138, %v3504_v32  ;;  %v3507_v51 = vmul.f32 %v6139_v15, %v3499_v47  ;;  %v4901_v2 = vpop.eup %4900  ;;  %v3585_v29 = vmul.f32 1.442695, %v3572_v53 }
 0xa47   : > { %v3521_v19 = vmul.f32 %v6113_v1, %v3513_v4  ;;  %v3514_v21 = vadd.f32 1.4214138, %v3506_v38  ;;  %v3509_v4 = vmul.f32 %v6146_v45, %v3501_v26  ;;  %v4903_v9 = vpop.eup %4902 }
 0xa48   : > { %v3527_v27 = vadd.f32 -0.28449672, %v3519_v10  ;;  %v3520_v22 = vmul.f32 %v6125_v34, %v3512_v28  ;;  %v3515_v0 = vadd.f32 1.4214138, %v3507_v51  ;;  %v6166_v13 = vpop.eup %4904  ;;  %4912 = vpow2.f32 %v3585_v29 }
 0xa49   : > { %v3529_v41 = vadd.f32 -0.28449672, %v3521_v19  ;;  %v3522_v6 = vmul.f32 %v6132_v56, %v3514_v21  ;;  %v5177_v19 = vmov -1.0   ;;  %v3517_v25 = vadd.f32 1.4214138, %v3509_v4 }
 0xa4a   : > { %v3535_v46 = vmul.f32 %v6111_v43, %v3527_v27  ;;  %v3528_v3 = vadd.f32 -0.28449672, %v3520_v22  ;;  %v3447_v23 = vsel %vm3439_vm6, 1.0, %v5177_v19  ;;  %v3500_v27 = vadd.f32 -1.4531521, %v3492_v5 }
 0xa4b   : > { %v3537_v48 = vmul.f32 %v6113_v1, %v3529_v41  ;;  %v3530_v63 = vadd.f32 -0.28449672, %v3522_v6  ;;  %v4907_v41 = vpop.eup %4906  ;;  %v3449_v44 = vsel %vm3441_vm7, 1.0, %v5177_v19  ;;  %v3494_v57 = vmul.f32 1.0614054, %v6166_v13 }
 0xa4c   : > { %v3543_v11 = vadd.f32 0.2548296, %v3535_v46  ;;  %v3536_v62 = vmul.f32 %v6125_v34, %v3528_v3  ;;  %v3525_v46 = vmul.f32 %v6146_v45, %v3517_v25  ;;  %v3508_v22 = vmul.f32 %v6154_v30, %v3500_v27 }
 0xa4d   : > { %v3545_v40 = vadd.f32 0.2548296, %v3537_v48  ;;  %v3538_v32 = vmul.f32 %v6132_v56, %v3530_v63  ;;  %v3448_v7 = vsel %vm3440_vm8, 1.0, %v5177_v19  ;;  %v3451_v5 = vsel %vm3443_vm9, 1.0, %v5177_v19 }
 0xa4e   : > { %v3551_v60 = vmul.f32 %v6111_v43, %v3543_v11  ;;  %v3544_v10 = vadd.f32 0.2548296, %v3536_v62  ;;  %v3523_v43 = vmul.f32 %v6139_v15, %v3515_v0  ;;  %v3533_v35 = vadd.f32 -0.28449672, %v3525_v46 }
 0xa4f   : > { %v3553_v42 = vmul.f32 %v6113_v1, %v3545_v40  ;;  %v3574_v1 = vmul.f32 %v3566_v55, %v6128_v52  ;;  %v3546_v48 = vadd.f32 0.2548296, %v3538_v32  ;;  %v3516_v16 = vadd.f32 1.4214138, %v3508_v22  ;;  %v4909_v55 = vpop.eup %4908 }
 0xa50   : > { %v3591_v28 = vmul.f32 %v4899_v59, %v3551_v60  ;;  %v3531_v38 = vadd.f32 -0.28449672, %v3523_v43  ;;  %v3552_v47 = vmul.f32 %v6125_v34, %v3544_v10  ;;  %v3502_v52 = vadd.f32 -1.4531521, %v3494_v57  ;;  %v4911_v4 = vpop.eup %4910 }
 0xa51   : > { %v3593_v21 = vmul.f32 %v4901_v2, %v3553_v42  ;;  %v3589_v58 = vmul.f32 1.442695, %v3574_v1  ;;  %v3541_v6 = vmul.f32 %v6146_v45, %v3533_v35  ;;  %v3524_v51 = vmul.f32 %v6154_v30, %v3516_v16 }
 0xa52   : > { %v3539_v49 = vmul.f32 %v6139_v15, %v3531_v38  ;;  %v3599_v11 = vsub.f32 1.0, %v3591_v28  ;;  %v3510_v40 = vmul.f32 %v6166_v13, %v3502_v52  ;;  %v3592_v34 = vmul.f32 %v4903_v9, %v3552_v47  ;;  %v4913_v46 = vpop.eup %4912 }
 0xa53   : > { %v3601_v26 = vsub.f32 1.0, %v3593_v21  ;;  %v3554_v59 = vmul.f32 %v6132_v56, %v3546_v48  ;;  %v3549_v60 = vadd.f32 0.2548296, %v3541_v6  ;;  %v3532_v62 = vadd.f32 -0.28449672, %v3524_v51 }
 0xa54   : > { %v3547_v3 = vadd.f32 0.2548296, %v3539_v49  ;;  %v3518_v63 = vadd.f32 1.4214138, %v3510_v40  ;;  %v3607_v0 = vmul.f32 %v3599_v11, %v3447_v23  ;;  %4914 = vpow2.f32 %v3589_v58 }
 0xa55   : > { %v3557_v9 = vmul.f32 %v6146_v45, %v3549_v60  ;;  %v3540_v17 = vmul.f32 %v6154_v30, %v3532_v62  ;;  %v3609_v42 = vmul.f32 %v3601_v26, %v3449_v44  ;;  %v3600_v10 = vsub.f32 1.0, %v3592_v34 }
 0xa56   : > { %v3555_v53 = vmul.f32 %v6139_v15, %v3547_v3  ;;  %v3526_v15 = vmul.f32 %v6166_v13, %v3518_v63  ;;  %v3594_v32 = vmul.f32 %v4907_v41, %v3554_v59  ;;  %v3615_v27 = vadd.f32 1.0, %v3607_v0 }
 0xa57   : > { %v3597_v43 = vmul.f32 %v4911_v4, %v3557_v9  ;;  %v3548_v23 = vadd.f32 0.2548296, %v3540_v17  ;;  %v3427_v28 = vmul.f32 0.5, %v6089_v14  ;;  %v3453_v45 = vsel %vm3445_vm10, 1.0, %v5177_v19 }
 0xa58   : > { %v3595_v2 = vmul.f32 %v4909_v55, %v3555_v53  ;;  %v3534_v25 = vadd.f32 -0.28449672, %v3526_v15  ;;  %v3617_v22 = vadd.f32 1.0, %v3609_v42  ;;  %v3608_v24 = vmul.f32 %v3600_v10, %v3448_v7 }
 0xa59   : > { %v3605_v29 = vsub.f32 1.0, %v3597_v43  ;;  %v3556_v1 = vmul.f32 %v6154_v30, %v3548_v23  ;;  %v3602_v57 = vsub.f32 1.0, %v3594_v32  ;;  %v3623_v14 = vmul.f32 %v3615_v27, %v6117_v33 }
 0xa5a   : > { %v3603_v56 = vsub.f32 1.0, %v3595_v2  ;;  %v3542_v44 = vmul.f32 %v6166_v13, %v3534_v25  ;;  %v3450_v49 = vsel %vm3442_vm11, 1.0, %v5177_v19  ;;  %v3429_v30 = vmul.f32 0.5, %v6094_v18 }
 0xa5b   : > { %v3613_v21 = vmul.f32 %v3605_v29, %v3453_v45  ;;  %v3596_v47 = vmul.f32 %v4913_v46, %v3556_v1  ;;  %v3452_v52 = vsel %vm3444_vm12, 1.0, %v5177_v19  ;;  %v3625_v58 = vmul.f32 %v3617_v22, %v6119_v50 }
 0xa5c   : > { %v3611_v38 = vmul.f32 %v3603_v56, %v3451_v5  ;;  %v3550_v48 = vadd.f32 0.2548296, %v3542_v44  ;;  %v3616_v6 = vadd.f32 1.0, %v3608_v24  ;;  %v3610_v33 = vmul.f32 %v3602_v57, %v3450_v49 }
 0xa5d   : > { %v3621_v16 = vadd.f32 1.0, %v3613_v21  ;;  %v3604_v11 = vsub.f32 1.0, %v3596_v47  ;;  %v3424_v34 = vmul.f32 0.5, %v6071_v54  ;;  %v3428_v53 = vmul.f32 0.5, %v6096_v20 }
 0xa5e   : > { %v3619_v41 = vadd.f32 1.0, %v3611_v38  ;;  %v3558_v3 = vmul.f32 %v6166_v13, %v3550_v48  ;;  %v4915_v31 = vpop.eup %4914  ;;  %v3454_v13 = vsel %vm3446_vm13, 1.0, %v5177_v19  ;;  %v3618_v50 = vadd.f32 1.0, %v3610_v33  ;;  %v4328_v19 = vld [vmem:[%s675_s10] ss:$0 sm:$0xff] }
 0xa5f   : > { %v3629_v40 = vmul.f32 %v3621_v16, %v3429_v30  ;;  %v3612_v61 = vmul.f32 %v3604_v11, %v3452_v52  ;;  %v3624_v60 = vmul.f32 %v3616_v6, %v3424_v34  ;;  %v3430_v0 = vmul.f32 0.5, %v6106_v39 }
 0xa60   : > { %v3627_v35 = vmul.f32 %v3619_v41, %v3427_v28  ;;  %v3598_v26 = vmul.f32 %v4915_v31, %v3558_v3  ;;  %v3626_v4 = vmul.f32 %v3618_v50, %v3426_v36 }
 0xa61   : > { %v3633_v18 = vpack.c.bf16 %v3629_v40, %v3625_v58  ;;  %v3620_v55 = vadd.f32 1.0, %v3612_v61 }
 0xa62   : > { %v3631_v51 = vpack.c.bf16 %v3627_v35, %v3623_v14  ;;  %v3606_v59 = vsub.f32 1.0, %v3598_v26 }
 0xa63   : > { %v3628_v62 = vmul.f32 %v3620_v55, %v3428_v53 }
 0xa64   : > { %v3614_v63 = vmul.f32 %v3606_v59, %v3454_v13 }
 0xa65   : > { %v3632_v2 = vpack.c.bf16 %v3628_v62, %v3624_v60 }
 0xa66   : > { %v3622_v7 = vadd.f32 1.0, %v3614_v63 }
 0xa67   : > { %3930 = vmatprep.mubr.bf16.mxu1 %v3632_v2 }
 0xa68   : > { %v3630_v54 = vmul.f32 %v3622_v7, %v3430_v0  ;;  %3931 = vmatmul.mubr.bf16.vlgmr.msra.gmra.mrb[48].mxu1 %v3631_v51 }
 0xa6a   : > { %v3634_v20 = vpack.c.bf16 %v3630_v54, %v3626_v4 }
 0xa6c   : > { %3971 = vmatprep.mubr.bf16.mxu0 %v3634_v20 }
 0xa6d   : > { %3972 = vmatmul.mubr.bf16.vlgmr.msra.gmra.mrb[36].mxu0 %v3633_v18 }
 0xb3b   : > { %v4435_v5 = vpop.f32.mrb[48].mxu1 }
 0xb3c   : > { %v4436_v9 = vpop.f32.mrb[49].mxu1 }
 0xb3d   : > { %v4437_v17 = vadd.f32 %v4436_v9, %v4435_v5  ;;  %v4438_v37 = vpop.f32.mrb[50].mxu1 }
 0xb3e   : > { %v4439_v15 = vpop.f32.mrb[51].mxu1 }
 0xb3f   : > { %v3933_v42 = vadd.f32 %v4437_v17, %v4328_v19  ;;  %v4440_v10 = vadd.f32 %v4439_v15, %v4438_v37 }
 0xb40   : > { %v4457_v39 = vpop.f32.mrb[36].mxu0 }
 0xb41   : > { %v4458_v56 = vpop.f32.mrb[37].mxu0  ;;  %v3936_v23 = vadd.f32 %v4440_v10, %v4328_v19 }
 0xb42   : > { %v4459_v32 = vadd.f32 %v4458_v56, %v4457_v39  ;;  %v4460_v43 = vpop.f32.mrb[38].mxu0 }
 0xb43   : > { %v4461_v25 = vpop.f32.mrb[39].mxu0 }
 0xb44   : > { %v3974_v27 = vadd.f32 %v4459_v32, %v3933_v42  ;;  %v4462_v28 = vadd.f32 %v4461_v25, %v4460_v43  ;;  %3987 = sbr.rel (%p4361_p11) target bundleno = 2891 (0xb4b), region = 96 }
 0xb46   : > { %v3980_v38 = vadd.f32 %v3974_v27, %v5974_v8  ;;  %v3977_v45 = vadd.f32 %v4462_v28, %v3936_v23 }
 0xb48   : > { %3982 = vst [vmem:[#allocation2] sm:$0xff] %v3980_v38  ;;  %v3981_v29 = vadd.f32 %v3977_v45, %v5976_v12  ;;  %3988 = vst [vmem:[#allocation12] sm:$0xff] (!%p4361_p11), %v3980_v38 }
 0xb4a   : > { %3983 = vst [vmem:[#allocation2 + $0x8] sm:$0xff] %v3981_v29  ;;  %3989 = vst [vmem:[#allocation12 + $0x8] sm:$0xff] (!%p4361_p11), %v3981_v29 }
 0xb4b PF: > { %p4638_p10 = scmp.eq.s32.totalorder %s5389_s15, 1  ;;  %s5178_s10 = smov [#allocation12]  }
 0xb4c   : > { %s3999_s21 = sshll.u32 %s5178_s10, 4  ;;  %s4000_s21 = int_to_ptr.vmem [resolvable:$true] %s3999_s21 }
 0xb4d   : > { %s5066_s28 = scalar_lea.vmem %s4000_s21, 256  ;;  %p5073_p9 = scmp.lt.s32.totalorder %s4000_s21, %s4000_s21 }
 0xb4e   : > { %p5067_p7 = scmp.ne.s32.totalorder %s4000_s21, %s5066_s28  ;;  %p5074_p2 = scmp.lt.s32.totalorder %s5066_s28, %s5066_s28 }
 0xb50   : > { %p5068_p8 = pnand %p5067_p7, %p4638_p10  ;;  %p5075_p0 = por %p5074_p2, %p5073_p9 }
 0xb52   : > { %p5069_p3 = pneg %p5068_p8 }
 0xb54   : > { %p5076_p13 = pnand %p5075_p0, %p5069_p3 }
 0xb56   : > { %5079 = shalt.err (!%p5076_p13)
}
 0xb57   : > { %s6329_s8 = sld [smem:[#allocation31_spill]] }
 0xb5d   : > { %s5080_s0 = scalar_lea.hbm %s6329_s8, 256 }
 0xb5e   : > { %p5081_p1 = scmp.ne.s32.totalorder %s6329_s8, %s5080_s0  ;;  %p5086_p6 = scmp.lt.u32.totalorder %s5080_s0, %s6329_s8 }
 0xb60   : > { %p5082_p12 = pnand %p5081_p1, %p4638_p10 }
 0xb62   : > { %p5083_p4 = pneg %p5082_p12 }
 0xb64   : > { %p5088_p5 = pnand %p5086_p6, %p5083_p4 }
 0xb66   : > { %5091 = shalt.err (!%p5088_p5)
}
 0xb67   : > { %s5179_s26 = smov 128   ;;  %s5180_s11 = smov 8  }
 0xb68   : > { %4615 = dma.vmem_to_hbm [thread:$0]  (%p4638_p10), %s4000_s21, 256, %s6329_s8, [#allocation5], %s5179_s26, %s5179_s26, %s5180_s11  }
 0xb69   : > { %5129 = dma.done.wait (%p4638_p10), [#allocation5], 256  }
 0xb6a   : > { %5131 = vsyncadd (%p4638_p10), [#allocation5], 4294967040 }
 0xb6b PF: > { %s6330_s19 = sld [smem:[#allocation19_spill]]  ;;  %s6331_s16 = sld [smem:[#allocation17_spill]] }
 0xb6c   : > { %s6332_s23 = sld [smem:[#allocation21_spill]]  ;;  %s6333_s24 = sld [smem:[#allocation18_spill]] }
 0xb6d   : > { %s6334_s25 = sld [smem:[#allocation20_spill]]  ;;  %s6335_s21 = smov %s5138_s22 }
 0xb71   : > { %s30_s26 = sadd.s32 1, %s6330_s19   ;;  %s6336_s22 = smov %s6331_s16 }
 0xb72   : > { %p27_p11 = scmp.ge.s32.totalorder %s30_s26, 4  }
 0xb74   :  { %29 = sbr.rel (!%p27_p11) target bundleno = 19 (0x13), region = 176 }
 0xb7b   :  { %4015 = vsyncpa [#allocation4], 1 }
 0xb7c   :  { %4017 = vsyncpa [#allocation4 + $0x1], 1 }
 0xb7d   :  { %4018 = vsyncpa [#allocation7], 1 }
 0xb7e   :  { %4020 = vsyncpa [#allocation7 + $0x1], 1 }
 0xb7f   :  { %4021 = vsyncpa [#allocation10], 1 }
 0xb80   :  { %4023 = vsyncpa [#allocation10 + $0x1], 1 }
 0xb81   :  { %4024 = vsyncpa [#allocation5], 1 }
 0xb82   :  { %4026 = vsyncpa [#allocation5 + $0x1], 1 }

// kernel: tpu_custom_call.1
= control target key start
LH: loop header
LB: loop body
LE: loop exit
PB: predicated region body
PF: predicated region fallthrough
CT: control target
= control target key end

     0   :  { %s4993_s0 = inlined_call_operand.hbm [shape: f32[2,8,128], index: 0, kind: input, shape index: {}]   ;;  %s4994_s1 = inlined_call_operand.vmem [shape: f32[2,1,128], index: 1, kind: input, shape index: {}]   ;;  %s4995_s2 = inlined_call_operand.vmem [shape: f32[2,1,128], index: 2, kind: input, shape index: {}]   ;;  %s4996_s3 = inlined_call_operand.hbm [shape: bf16[2,128,384], index: 3, kind: input, shape index: {}]   ;;  %s4997_s4 = inlined_call_operand.hbm [shape: bf16[2,128,128], index: 4, kind: input, shape index: {}]   ;;  %s4998_s5 = inlined_call_operand.vmem [shape: f32[2,1,128], index: 5, kind: input, shape index: {}]   ;;  %s4999_s6 = inlined_call_operand.vmem [shape: f32[2,1,128], index: 6, kind: input, shape index: {}]   ;;  %s5000_s7 = inlined_call_operand.vmem [shape: f32[2,1,128], index: 7, kind: input, shape index: {}]   ;;  %s5001_s8 = inlined_call_operand.hbm [shape: bf16[2,128,512], index: 8, kind: input, shape index: {}]   ;;  %s5002_s9 = inlined_call_operand.vmem [shape: f32[2,1,512], index: 9, kind: input, shape index: {}]   ;;  %s5003_s10 = inlined_call_operand.hbm [shape: bf16[2,512,128], index: 10, kind: input, shape index: {}]   ;;  %s5004_s11 = inlined_call_operand.vmem [shape: f32[2,1,128], index: 11, kind: input, shape index: {}]   ;;  %s5005_s12 = inlined_call_operand.hbm [shape: f32[2,8,128], index: 12, kind: output, shape index: {}]  }
   0x1   :  { %5018 = sst [smem:[#allocation22_spill]] %s4993_s0 }
   0x2   :  { %5019 = sst [smem:[#allocation23_spill]] %s4996_s3 }
   0x3   :  { %5020 = sst [smem:[#allocation24_spill]] %s4997_s4 }
   0x4   :  { %5021 = sst [smem:[#allocation25_spill]] %s4999_s6 }
   0x5   :  { %5022 = sst [smem:[#allocation26_spill]] %s5000_s7 }
   0x6   :  { %5023 = sst [smem:[#allocation27_spill]] %s5001_s8 }
   0x7   :  { %5024 = sst [smem:[#allocation28_spill]] %s5002_s9 }
   0x8   :  { %5025 = sst [smem:[#allocation29_spill]] %s5003_s10 }
   0x9   :  { %5026 = sst [smem:[#allocation30_spill]] %s5004_s11 }
   0xa   :  { %5027 = sst [smem:[#allocation31_spill]] %s5005_s12 }
   0xb   :  { %17 = vsyncpa [#allocation4], 0 }
   0xc   :  { %18 = vsyncpa [#allocation7], 0 }
   0xd   :  { %20 = vsyncpa [#allocation7 + $0x1], 0 }
   0xe   :  { %21 = vsyncpa [#allocation10], 0 }
   0xf   :  { %23 = vsyncpa [#allocation10 + $0x1], 0 }
  0x10   :  { %24 = vsyncpa [#allocation5], 0  ;;  %s4153_s21 = smov 0   ;;  %s4155_s22 = smov 0  }
  0x11   :  { %s4157_s23 = smov 0   ;;  %s4159_s24 = smov 0  }
  0x12   :  { %s4161_s25 = smov 0   ;;  %s4163_s26 = smov 0  }
  0x13 LB: > { %5028 = sst [smem:[#allocation17_spill]] %s4051_s23  ;;  %s39_s27 = sadd.s32 1, %s4059_s25  ;;  %s4063_s26 = sphi %s4163_s26, %s30_s26   ;;  %s4059_s25 = sphi %s4161_s25, %s5065_s25   ;;  %s4055_s24 = sphi %s4159_s24, %s5064_s24   ;;  %s4051_s23 = sphi %s4157_s23, %s5063_s23   ;;  %s4047_s22 = sphi %s4155_s22, %s5067_s22   ;;  %s4043_s21 = sphi %s4153_s21, %s5066_s21  }
  0x14   : > { %5029 = sst [smem:[#allocation18_spill]] %s4059_s25  ;;  %s127_s28 = sadd.s32 1, %s4051_s23 }
  0x15   : > { %5030 = sst [smem:[#allocation19_spill]] %s4063_s26  ;;  %p40_p0 = scmp.ge.s32.totalorder %s39_s27, 2 }
  0x16   : > { %p134_p1 = scmp.ne.s32.totalorder %s4051_s23, %s4047_s22  ;;  %p135_p2 = scmp.eq.s32.totalorder %s4063_s26, 0 }
  0x17   : > { %s5069_s27 = smov (%p40_p0, %s39_s27), 0  ;;  %p3547_p4 = scmp.lt.s32.totalorder %s4063_s26, 2 }
  0x18   : > { %5031 = sst [smem:[#allocation20_spill]] %s5069_s27  ;;  %p136_p3 = por %p135_p2, %p134_p1 }
  0x19   : > { %s124_s29 = ssub.s32 %s4059_s25, %s5069_s27  ;;  %s4195_s13 = sand.u32 1, %s4051_s23  }
  0x1a   : > { %p125_p5 = scmp.eq.s32.totalorder %s124_s29, 0  ;;  %s3511_s14 = smul.u32 3072, %s4059_s25 }
  0x1b   : > { %s3510_s16 = smul.u32 192, %s4195_s13  ;;  %s5033_s3 = sld [smem:[#allocation23_spill]] }
  0x1c   : > { %s4199_s15 = scalar_select %p125_p5, %s4051_s23, %s127_s28  }
  0x1d   : > { %p4207_p6 = pnand %p3547_p4, %p136_p3  ;;  %s430_s29 = scalar_lea.vmem [#allocation6], %s3510_s16 }
  0x1e   : > { %5032 = sst [smem:[#allocation21_spill]] %s4199_s15  ;;  %s437_s30 = sshll.u32 %s430_s29, 4  ;;  %s4211_s30 = int_to_ptr.vmem [resolvable:$true] %s437_s30 }
  0x1f   : > { %s5034_s20 = scalar_select %p4207_p6, 1, 0 }
  0x20   : > { %s5035_s28 = sand.u32 1, %s4063_s26   ;;  %p4221_p8 = pneg %p4207_p6 }
  0x21   : > { %s4205_s19 = scalar_lea.hbm %s5033_s3, %s3511_s14  ;;  %s4215_s27 = scalar_lea.sflag [#allocation7], %s5035_s28 }
  0x22   : > { %s3827_s15 = scalar_lea.hbm %s4205_s19, 3072  ;;  %s3832_s16 = scalar_lea.hbm %s5033_s3, 6144 }
  0x23   : > { %p3828_p7 = scmp.ne.s32.totalorder %s4205_s19, %s3827_s15  ;;  %p3833_p11 = scmp.lt.u32.totalorder %s4205_s19, %s5033_s3 }
  0x24   : > { %s5036_s14 = scalar_select %p4221_p8, 1, 0 }
  0x25   : > { %p3830_p9 = pnand %p4221_p8, %p3828_p7  ;;  %p3834_p12 = scmp.lt.u32.totalorder %s3832_s16, %s3827_s15 }
  0x26   : > { %p3836_p0 = scmp.lt.u32.totalorder %s3827_s15, %s4205_s19 }
  0x27   : > { %p3831_p10 = pneg %p3830_p9  ;;  %p3835_p13 = por %p3834_p12, %p3833_p11 }
  0x29   : > { %p3837_p1 = por %p3836_p0, %p3835_p13 }
  0x2b   : > { %p3838_p2 = pnand %p3837_p1, %p3831_p10 }
  0x2d   : > { %3841 = shalt.err (!%p3838_p2)
}
  0x2e   : > { %s3842_s28 = scalar_lea.vmem %s4211_s30, 3072  ;;  %s4065_s17 = smov [#allocation6]  }
  0x2f   : > { %p3843_p3 = scmp.ne.s32.totalorder %s4211_s30, %s3842_s28  ;;  %s3847_s18 = sshll.u32 %s4065_s17, 4  ;;  %s3848_s18 = int_to_ptr.vmem [resolvable:$false] %s3847_s18 }
  0x30   : > { %s3849_s23 = scalar_lea.vmem %s3848_s18, 6144  ;;  %p3850_p7 = scmp.lt.s32.totalorder %s4211_s30, %s3848_s18 }
  0x31   : > { %p3845_p4 = pnand %p3843_p3, %p4221_p8  ;;  %p3851_p9 = scmp.lt.s32.totalorder %s3849_s23, %s3842_s28 }
  0x33   : > { %p3846_p5 = pneg %p3845_p4  ;;  %p3852_p11 = por %p3851_p9, %p3850_p7 }
  0x35   : > { %p3853_p12 = pnand %p3852_p11, %p3846_p5 }
  0x37   : > { %3856 = shalt.err (!%p3853_p12)
}
  0x38   : > { %s4066_s15 = smov 192   ;;  %s4067_s16 = smov 12  }
  0x39   : > { %3536 = dma.hbm_to_vmem [thread:$0]  (!%p4207_p6), %s4205_s19, 3072, %s4211_s30, %s4215_s27, %s4066_s15, %s4066_s15, %s4067_s16  }
  0x3a   : > { %s3141_s29 = sshll.u32 %s4195_s13, 8  ;;  %s3278_s17 = sshll.u32 %s4059_s25, 12 }
  0x3b   : > { %s5037_s8 = sld [smem:[#allocation27_spill]]  ;;  %s490_s3 = scalar_lea.vmem [#allocation9], %s3141_s29 }
  0x3c   : > { %s497_s12 = sshll.u32 %s490_s3, 4  ;;  %s5038_s11 = sand.u32 1, %s4063_s26   ;;  %s4256_s12 = int_to_ptr.vmem [resolvable:$true] %s497_s12 }
  0x3d   : > { %s4260_s9 = scalar_lea.sflag [#allocation10], %s5038_s11 }
  0x41   : > { %s4252_s23 = scalar_lea.hbm %s5037_s8, %s3278_s17  ;;  %s3862_s16 = scalar_lea.hbm %s5037_s8, 8192 }
  0x42   : > { %s3857_s30 = scalar_lea.hbm %s4252_s23, 4096  ;;  %p3863_p1 = scmp.lt.u32.totalorder %s4252_s23, %s5037_s8 }
  0x43   : > { %p3858_p10 = scmp.ne.s32.totalorder %s4252_s23, %s3857_s30  ;;  %p3864_p2 = scmp.lt.u32.totalorder %s3862_s16, %s3857_s30 }
  0x44   : > { %p3866_p4 = scmp.lt.u32.totalorder %s3857_s30, %s4252_s23 }
  0x45   : > { %p3860_p13 = pnand %p3858_p10, %p4221_p8  ;;  %p3865_p3 = por %p3864_p2, %p3863_p1 }
  0x47   : > { %p3861_p0 = pneg %p3860_p13  ;;  %p3867_p5 = por %p3866_p4, %p3865_p3 }
  0x49   : > { %p3868_p7 = pnand %p3867_p5, %p3861_p0 }
  0x4b   : > { %3871 = shalt.err (!%p3868_p7)
}
  0x4c   : > { %s3872_s3 = scalar_lea.vmem %s4256_s12, 4096  ;;  %s4068_s11 = smov [#allocation9]  }
  0x4d   : > { %p3873_p9 = scmp.ne.s32.totalorder %s4256_s12, %s3872_s3  ;;  %s3877_s19 = sshll.u32 %s4068_s11, 4  ;;  %s3878_s19 = int_to_ptr.vmem [resolvable:$false] %s3877_s19 }
  0x4e   : > { %s3879_s15 = scalar_lea.vmem %s3878_s19, 8192  ;;  %p3880_p10 = scmp.lt.s32.totalorder %s4256_s12, %s3878_s19 }
  0x4f   : > { %p3875_p11 = pnand %p3873_p9, %p4221_p8  ;;  %p3881_p13 = scmp.lt.s32.totalorder %s3879_s15, %s3872_s3 }
  0x51   : > { %p3876_p12 = pneg %p3875_p11  ;;  %p3882_p1 = por %p3881_p13, %p3880_p10 }
  0x53   : > { %p3883_p2 = pnand %p3882_p1, %p3876_p12 }
  0x55   : > { %3886 = shalt.err (!%p3883_p2)
}
  0x56   : > { %s4069_s30 = smov 256   ;;  %s4070_s16 = smov 16  }
  0x57   : > { %3542 = dma.hbm_to_vmem [thread:$0]  (!%p4207_p6), %s4252_s23, 4096, %s4256_s12, %s4260_s9, %s4069_s30, %s4069_s30, %s4070_s16  }
  0x58   : > { %s5039_s10 = sld [smem:[#allocation29_spill]]  ;;  %s518_s11 = scalar_lea.vmem [#allocation11], %s3141_s29 }
  0x59   : > { %s525_s19 = sshll.u32 %s518_s11, 4  ;;  %s4296_s15 = sadd.s32 4294967295, %s4063_s26   ;;  %s4293_s19 = int_to_ptr.vmem [resolvable:$true] %s525_s19 }
  0x5a   : > { %p140_p0 = scmp.ne.s32.totalorder %s4047_s22, %s4043_s21  ;;  %p5011_p3 = scmp.eq.s32.totalorder %s4296_s15, 0 }
  0x5b   : > { %p3134_p4 = scmp.ge.s32.totalorder %s4063_s26, 1  ;;  %p385_p5 = scmp.lt.s32.totalorder %s4063_s26, 3 }
  0x5c   : > { %p4305_p7 = por %p5011_p3, %p140_p0  ;;  %s4071_s29 = smov [#allocation3]  }
  0x5d   : > { %p4309_p9 = pnand %p3134_p4, %p385_p5  ;;  %s400_s23 = sshll.u32 %s4071_s29, 4  ;;  %s4313_s23 = int_to_ptr.vmem [resolvable:$true] %s400_s23 }
  0x5e   : > { %s4289_s3 = scalar_lea.hbm %s5039_s10, %s3278_s17  ;;  %s3138_s21 = sshll.u32 %s4195_s13, 6 }
  0x5f   : > { %s5040_s12 = scalar_select %p4305_p7, 1, 0 }
  0x60   : > { %s5041_s17 = scalar_select %p4309_p9, 1, 0 }
  0x61   : > { %p3529_p11 = pneg %p4309_p9  ;;  %s3277_s30 = sshll.u32 %s4059_s25, 10 }
  0x62   : > { %s5043_s4 = sld [smem:[#allocation24_spill]]  ;;  %s451_s8 = scalar_lea.vmem [#allocation8], %s3138_s21 }
  0x63   : > { %p4321_p12 = pnand %p3529_p11, %p5011_p3  ;;  %s458_s26 = sshll.u32 %s451_s8, 4  ;;  %s4330_s26 = int_to_ptr.vmem [resolvable:$true] %s458_s26 }
  0x64   : > { %s5044_s0 = sld [smem:[#allocation22_spill]] }
  0x65   : > { %p3889_p13 = pneg %p4321_p12 }
  0x68   : > { %s4328_s11 = scalar_lea.hbm %s5043_s4, %s3277_s30 }
  0x6a   : > { %s3887_s13 = scalar_lea.hbm %s5044_s0, 256 }
  0x6b   : > { %p3888_p10 = scmp.ne.s32.totalorder %s5044_s0, %s3887_s13  ;;  %p3894_p0 = scmp.lt.u32.totalorder %s3887_s13, %s5044_s0 }
  0x6d   : > { %p3890_p1 = pnand %p3889_p13, %p3888_p10 }
  0x6f   : > { %p3891_p2 = pneg %p3890_p1 }
  0x71   : > { %p3896_p4 = pnand %p3894_p0, %p3891_p2 }
  0x73   : > { %3899 = shalt.err (!%p3896_p4)
}
  0x74   : > { %s3900_s8 = scalar_lea.vmem %s4313_s23, 256  ;;  %p3908_p7 = scmp.lt.s32.totalorder %s4313_s23, %s4313_s23 }
  0x75   : > { %p3901_p5 = scmp.ne.s32.totalorder %s4313_s23, %s3900_s8  ;;  %p3909_p9 = scmp.lt.s32.totalorder %s3900_s8, %s3900_s8 }
  0x77   : > { %p3903_p11 = pnand %p3901_p5, %p3889_p13  ;;  %p3910_p6 = por %p3909_p9, %p3908_p7 }
  0x79   : > { %p3904_p3 = pneg %p3903_p11 }
  0x7b   : > { %p3911_p8 = pnand %p3910_p6, %p3904_p3 }
  0x7d   : > { %3914 = shalt.err (!%p3911_p8)
}
  0x7e   : > { %s4072_s6 = smov 128   ;;  %s4073_s7 = smov 8  }
  0x7f   : > { %3532 = dma.hbm_to_vmem [thread:$0]  (!%p4321_p12), %s5044_s0, 256, %s4313_s23, [#allocation4], %s4072_s6, %s4072_s6, %s4073_s7  }
  0x80   : > { %s3915_s30 = scalar_lea.hbm %s4328_s11, 1024  ;;  %p5045_p13 = scmp.ne.s32.totalorder %s5036_s14, 0 }
  0x81   : > { %p3916_p10 = scmp.ne.s32.totalorder %s4328_s11, %s3915_s30  ;;  %s3920_s28 = scalar_lea.hbm %s5043_s4, 2048 }
  0x82   : > { %p3921_p8 = scmp.lt.u32.totalorder %s4328_s11, %s5043_s4  ;;  %p3922_p3 = scmp.lt.u32.totalorder %s3920_s28, %s3915_s30 }
  0x83   : > { %p3918_p7 = pnand %p3916_p10, %p5045_p13  ;;  %p3924_p1 = scmp.lt.u32.totalorder %s3915_s30, %s4328_s11 }
  0x84   : > { %p3923_p9 = por %p3922_p3, %p3921_p8 }
  0x85   : > { %p3919_p6 = pneg %p3918_p7 }
  0x86   : > { %p3925_p2 = por %p3924_p1, %p3923_p9 }
  0x88   : > { %p3926_p0 = pnand %p3925_p2, %p3919_p6 }
  0x8a   : > { %3929 = shalt.err (!%p3926_p0)
}
  0x8b   : > { %s3930_s23 = scalar_lea.vmem %s4330_s26, 1024  ;;  %s4074_s16 = smov [#allocation8]  }
  0x8c   : > { %p3931_p12 = scmp.ne.s32.totalorder %s4330_s26, %s3930_s23  ;;  %s3935_s6 = sshll.u32 %s4074_s16, 4  ;;  %s3936_s6 = int_to_ptr.vmem [resolvable:$false] %s3935_s6 }
  0x8d   : > { %s3937_s7 = scalar_lea.vmem %s3936_s6, 2048  ;;  %p3938_p11 = scmp.lt.s32.totalorder %s4330_s26, %s3936_s6 }
  0x8e   : > { %p3933_p4 = pnand %p3931_p12, %p5045_p13  ;;  %p3939_p10 = scmp.lt.s32.totalorder %s3937_s7, %s3930_s23 }
  0x90   : > { %p3934_p5 = pneg %p3933_p4  ;;  %p3940_p7 = por %p3939_p10, %p3938_p11 }
  0x92   : > { %p3941_p8 = pnand %p3940_p7, %p3934_p5 }
  0x94   : > { %3944 = shalt.err (!%p3941_p8)
}
  0x95   : > { %s4075_s25 = smov 64   ;;  %s4076_s21 = smov 4  }
  0x96   : > { %p5046_p6 = scmp.ne.s32.totalorder %s5034_s20, 0  ;;  %s3945_s30 = scalar_lea.hbm %s4289_s3, 4096 }
  0x97   : > { %p3946_p3 = scmp.ne.s32.totalorder %s4289_s3, %s3945_s30  ;;  %s3950_s28 = scalar_lea.hbm %s5039_s10, 8192 }
  0x98   : > { %3539 = dma.hbm_to_vmem [thread:$0]  (!%p5046_p6), %s4328_s11, 1024, %s4330_s26, %s4215_s27, %s4075_s25, %s4075_s25, %s4076_s21  }
  0x99   : > { %p3948_p9 = pnand %p3946_p3, %p5045_p13  ;;  %p3951_p2 = scmp.lt.u32.totalorder %s4289_s3, %s5039_s10 }
  0x9a   : > { %p3952_p0 = scmp.lt.u32.totalorder %s3950_s28, %s3945_s30  ;;  %p3954_p4 = scmp.lt.u32.totalorder %s3945_s30, %s4289_s3 }
  0x9b   : > { %p3949_p1 = pneg %p3948_p9 }
  0x9c   : > { %p3953_p12 = por %p3952_p0, %p3951_p2 }
  0x9e   : > { %p3955_p5 = por %p3954_p4, %p3953_p12 }
  0xa0   : > { %p3956_p11 = pnand %p3955_p5, %p3949_p1 }
  0xa2   : > { %3959 = shalt.err (!%p3956_p11)
}
  0xa3   : > { %s3960_s26 = scalar_lea.vmem %s4293_s19, 4096  ;;  %s4077_s27 = smov [#allocation11]  }
  0xa4   : > { %p3961_p10 = scmp.ne.s32.totalorder %s4293_s19, %s3960_s26  ;;  %s3965_s11 = sshll.u32 %s4077_s27, 4  ;;  %s3966_s11 = int_to_ptr.vmem [resolvable:$false] %s3965_s11 }
  0xa5   : > { %s3967_s23 = scalar_lea.vmem %s3966_s11, 8192  ;;  %p3968_p3 = scmp.lt.s32.totalorder %s4293_s19, %s3966_s11 }
  0xa6   : > { %p3963_p7 = pnand %p3961_p10, %p5045_p13  ;;  %p3969_p9 = scmp.lt.s32.totalorder %s3967_s23, %s3960_s26 }
  0xa8   : > { %p3964_p8 = pneg %p3963_p7  ;;  %p3970_p2 = por %p3969_p9, %p3968_p3 }
  0xaa   : > { %p3971_p0 = pnand %p3970_p2, %p3964_p8 }
  0xac   : > { %3974 = shalt.err (!%p3971_p0)
}
  0xad   : > { %3545 = dma.hbm_to_vmem [thread:$0]  (!%p5046_p6), %s4289_s3, 4096, %s4293_s19, %s4260_s9, %s4075_s25, %s4075_s25, %s4076_s21  }
  0xae   : > { %p5047_p13 = scmp.ne.s32.totalorder %s5041_s17, 0 }
  0xaf   : > { %p5048_p1 = scmp.eq.s32.totalorder (!%p5047_p13), %s4296_s15, 0 }
  0xb0   : > { %543 = sbr.rel (%p5047_p13) target bundleno = 2872 (0xb38), region = 68 }
  0xb7   : > { %4026 = dma.done.wait (%p5048_p1), [#allocation4], 256   ;;  %p5049_p12 = pmov %p5048_p1 }
  0xb8   : > { %s549_s20 = sand.u32 1, %s4296_s15   ;;  %s551_s14 = sand.u32 1, %s4047_s22  }
  0xb9   : > { %4028 = vsyncadd (%p5049_p12), [#allocation4], 4294967040  ;;  %s3512_s16 = smul.u32 192, %s551_s14  ;;  %s550_s6 = scalar_lea.sflag [#allocation7], %s549_s20 }
  0xba   : > { %p5050_p4 = scmp.ne.s32.totalorder %s5040_s12, 0 }
  0xbb   : > { %s4411_s7 = scalar_lea.vmem [#allocation6], %s3512_s16 }
  0xbc   : > { %4030 = dma.done.wait (%p5050_p4), %s550_s6, 4096  }
  0xbd   : > { %4032 = vsyncadd (%p5050_p4), %s550_s6, 4294963200  ;;  %s3149_s9 = sshll.u32 %s551_s14, 6  ;;  %s3150_s3 = sshll.u32 %s551_s14, 8 }
  0xbe   : > { %s4417_s19 = scalar_lea.vmem [#allocation8], %s3149_s9  ;;  %s568_s17 = scalar_lea.sflag [#allocation10], %s549_s20 }
  0xbf   : > { %s4419_s25 = scalar_lea.vmem [#allocation9], %s3150_s3 }
  0xc0   : > { %4034 = dma.done.wait (%p5050_p4), %s568_s17, 8192  }
  0xc1   : > { %4036 = vsyncadd (%p5050_p4), %s568_s17, 4294959104  ;;  %p654_p6 = scmp.lt.s32.totalorder %s4055_s24, 1  ;;  %s5051_s20 = sld [smem:[#allocation25_spill]] }
  0xc2   : > { %s5052_s9 = sld [smem:[#allocation26_spill]]  ;;  %s5053_s13 = sld [smem:[#allocation28_spill]] }
  0xc3   : > { %s4427_s21 = scalar_select %p654_p6, %s4055_s24, 1 }
  0xc4   : > { %s5054_s12 = sld [smem:[#allocation30_spill]]  ;;  %s4459_s8 = scalar_lea.vmem [#allocation11], %s3150_s3 }
  0xc5   : > { %s662_s27 = scalar_lea.vmem %s4998_s5, %s4427_s21  ;;  %s3152_s30 = sshll.u32 %s4427_s21, 2 }
  0xc6   : > { %p3153_p5 = scmp.ne.s32.totalorder %s4055_s24, 0 }
  0xc7   : > { %s665_s14 = scalar_lea.vmem %s5051_s20, %s4427_s21  ;;  %v682_v0 = vld [vmem:[#allocation3] sm:$0xff] (!%p3153_p5)  ;;  %v683_v1 = vld [vmem:[#allocation3 + $0x8] sm:$0xff] (!%p3153_p5) }
  0xc8   : > { %s668_s17 = scalar_lea.vmem %s5052_s9, %s4427_s21  ;;  %s4453_s4 = scalar_lea.vmem %s5053_s13, %s3152_s30  ;;  %684 = vst [vmem:[#allocation2] sm:$0xff] (!%p3153_p5), %v682_v0  ;;  %685 = vst [vmem:[#allocation2 + $0x8] sm:$0xff] (!%p3153_p5), %v683_v1 }
  0xc9   : > { %681 = sbr.rel (%p3153_p5) target bundleno = 208 (0xd0), region = 92 }
  0xca   : > { %s675_s10 = scalar_lea.vmem %s5054_s12, %s4427_s21 }
  0xd0 PF: > { %v686_v2 = vld [vmem:[#allocation2] sm:$0xff]  ;;  %v687_v3 = vld [vmem:[#allocation2 + $0x8] sm:$0xff]  ;;  %v4078_v6 = vmov 0.0   ;;  %v3643_v20 = vld [vmem:[%s4411_s7 + $0x30] ss:$12 sps:$4 sm:$0xff]   ;;  %v4079_v32 = vmov 0   ;;  %s5055_s3 = scalar_lea.vmem %s4994_s1, %s4427_s21  ;;  %s5056_s26 = scalar_lea.vmem %s4995_s2, %s4427_s21 }
  0xd1   : > { %690 = vadd.xlane.f32.xlu0 %v686_v2  ;;  %v3633_v4 = vld [vmem:[%s4411_s7 + $0x4] ss:$12 sps:$4 sm:$0xff]   ;;  %v3635_v5 = vld [vmem:[%s4411_s7] ss:$12 sps:$4 sm:$0xff]   ;;  %3374 = vmatprep.subr.bf16.mxu1 %v4078_v6  ;;  %v3636_v7 = vld [vmem:[%s4411_s7 + $0x8] ss:$12 sps:$4 sm:$0xff]  }
  0xd2   : > { %v3637_v8 = vld [vmem:[%s4411_s7 + $0x1c] ss:$12 sps:$4 sm:$0xff]   ;;  %890 = vmatprep.subr.bf16.mxu0 %v3633_v4  ;;  %3375 = vmatpush3.bf16.msra.mxu1 %v3636_v7  ;;  %v3639_v17 = vld [vmem:[%s4411_s7 + $0x18] ss:$12 sps:$4 sm:$0xff]   ;;  %v3640_v18 = vld [vmem:[%s4411_s7 + $0x20] ss:$12 sps:$4 sm:$0xff]  }
  0xd3   : > { %891 = vmatpush1.bf16.msra.mxu0 %v3635_v5  ;;  %3376 = vmatprep.subr.bf16.mxu1 %v4078_v6  ;;  %v3641_v19 = vld [vmem:[%s4411_s7 + $0x34] ss:$12 sps:$4 sm:$0xff]   ;;  %v3644_v21 = vld [vmem:[%s4411_s7 + $0x38] ss:$12 sps:$4 sm:$0xff]   ;;  %v3648_v24 = vld [vmem:[%s4411_s7 + $0x50] ss:$12 sps:$4 sm:$0xff]  }
  0xd4   : > { %892 = vmatprep.subr.bf16.mxu0 %v3637_v8  ;;  %v3645_v22 = vld [vmem:[%s4411_s7 + $0x4c] ss:$12 sps:$4 sm:$0xff]   ;;  %v3647_v23 = vld [vmem:[%s4411_s7 + $0x48] ss:$12 sps:$4 sm:$0xff]   ;;  %v3649_v25 = vld [vmem:[%s4411_s7 + $0x64] ss:$12 sps:$4 sm:$0xff]   ;;  %922 = vmatprep.mubr.bf16.mxu0 %v4079_v32 }
  0xd5   : > { %692 = vadd.xlane.f32.xlu0 %v687_v3  ;;  %v3651_v26 = vld [vmem:[%s4411_s7 + $0x60] ss:$12 sps:$4 sm:$0xff]   ;;  %v3652_v27 = vld [vmem:[%s4411_s7 + $0x68] ss:$12 sps:$4 sm:$0xff]   ;;  %v3655_v29 = vld [vmem:[%s4411_s7 + $0x78] ss:$12 sps:$4 sm:$0xff]  }
  0xd6   : > { %3377 = vmatpush3.bf16.msra.mxu1 %v3640_v18  ;;  %v3653_v28 = vld [vmem:[%s4411_s7 + $0x7c] ss:$12 sps:$4 sm:$0xff]   ;;  %v3656_v30 = vld [vmem:[%s4411_s7 + $0x80] ss:$12 sps:$4 sm:$0xff]   ;;  %vm4080_vm0 = vmmov 0   ;;  %vm1019_vm1 = vcmask 261120  }
  0xd7   : > { %893 = vmatpush1.bf16.msra.mxu0 %v3639_v17  ;;  %3378 = vmatprep.subr.bf16.mxu1 %v4078_v6  ;;  %v3657_v31 = vld [vmem:[%s4411_s7 + $0x94] ss:$12 sps:$4 sm:$0xff]   ;;  %v3659_v33 = vld [vmem:[%s4411_s7 + $0x90] ss:$12 sps:$4 sm:$0xff]   ;;  %v3660_v34 = vld [vmem:[%s4411_s7 + $0x98] ss:$12 sps:$4 sm:$0xff]  }
  0xd8   : > { %894 = vmatprep.subr.bf16.mxu0 %v3641_v19  ;;  %3390 = vmatprep.mubr.msk.bf16.mxu1 %vm4080_vm0, %v4078_v6  ;;  %v3661_v35 = vld [vmem:[%s4411_s7 + $0xac] ss:$12 sps:$4 sm:$0xff]   ;;  %v3663_v36 = vld [vmem:[%s4411_s7 + $0xa8] ss:$12 sps:$4 sm:$0xff]   ;;  %v3664_v37 = vld [vmem:[%s4411_s7 + $0xb0] ss:$12 sps:$4 sm:$0xff]  }
  0xd9   : > { %v3154_v46 = vld [vmem:[%s5055_s3] ss:$0 sm:$0xff]  ;;  %s4081_s11 = smov 96   ;;  %s4082_s23 = smov 64   ;;  %vm1496_vm2 = vcmask 1043456   ;;  %vm1388_vm3 = vcmask 64512  }
  0xda   : > { %3379 = vmatpush3.bf16.msra.mxu1 %v3644_v21  ;;  %v3155_v50 = vld [vmem:[%s5056_s26] ss:$0 sm:$0xff]  ;;  %s4083_s20 = smov 32   ;;  %vm1875_vm4 = vcmask 523264   ;;  %vm1877_vm5 = vcmask 785408   ;;  %p3272_p11 = scmp.ne.s32.totalorder %s4055_s24, 1 }
  0xdb   : > { %895 = vmatpush1.bf16.msra.mxu0 %v3643_v20  ;;  %3380 = vmatprep.subr.bf16.mxu1 %v4078_v6 }
  0xdc   : > { %896 = vmatprep.subr.bf16.mxu0 %v3645_v22 }
  0xde   : > { %3381 = vmatpush3.bf16.msra.mxu1 %v3648_v24 }
  0xdf   : > { %897 = vmatpush1.bf16.msra.mxu0 %v3647_v23  ;;  %3382 = vmatprep.subr.bf16.mxu1 %v4078_v6 }
  0xe0   : > { %898 = vmatprep.subr.bf16.mxu0 %v3649_v25 }
  0xe2   : > { %3383 = vmatpush3.bf16.msra.mxu1 %v3652_v27 }
  0xe3   : > { %899 = vmatpush1.bf16.msra.mxu0 %v3651_v26  ;;  %3384 = vmatprep.subr.bf16.mxu1 %v4078_v6 }
  0xe4   : > { %900 = vmatprep.subr.bf16.mxu0 %v3653_v28 }
  0xe6   : > { %3385 = vmatpush3.bf16.msra.mxu1 %v3656_v30 }
  0xe7   : > { %901 = vmatpush1.bf16.msra.mxu0 %v3655_v29  ;;  %3386 = vmatprep.subr.bf16.mxu1 %v4078_v6 }
  0xe8   : > { %902 = vmatprep.subr.bf16.mxu0 %v3657_v31 }
  0xea   : > { %3387 = vmatpush3.bf16.msra.mxu1 %v3660_v34 }
  0xeb   : > { %903 = vmatpush1.bf16.msra.mxu0 %v3659_v33  ;;  %3388 = vmatprep.subr.bf16.mxu1 %v4078_v6 }
  0xec   : > { %904 = vmatprep.subr.bf16.mxu0 %v3661_v35 }
  0xee   : > { %3389 = vmatpush3.bf16.msra.mxu1 %v3664_v37 }
  0xef   : > { %905 = vmatpush1.bf16.msra.mxu0 %v3663_v36  ;;  %3394 = vmatprep.subr.bf16.mxu1 %v4078_v6 }
  0xf0   : > { %3418 = vmatprep.subr.bf16.mxu0 %v4078_v6 }
 0x15e   : > { %v691_v9 = vpop.xlane.xlu0 %690 }
 0x15f   : > { %v695_v10 = vmul.f32 0.0078125, %v691_v9 }
 0x161   : > { %v4468_v11 = vsub.f32 %v686_v2, %v695_v10 }
 0x162   : > { %v693_v12 = vpop.xlane.xlu0 %692 }
 0x163   : > { %v696_v13 = vmul.f32 0.0078125, %v693_v12  ;;  %v699_v14 = vmul.f32 %v4468_v11, %v4468_v11 }
 0x165   : > { %v4472_v15 = vsub.f32 %v687_v3, %v696_v13  ;;  %701 = vadd.xlane.f32.xlu1 %v699_v14 }
 0x167   : > { %v700_v16 = vmul.f32 %v4472_v15, %v4472_v15 }
 0x169   : > { %703 = vadd.xlane.f32.xlu1 %v700_v16 }
 0x1f2   : > { %v702_v38 = vpop.xlane.xlu1 %701 }
 0x1f3   : > { %v705_v39 = vmul.f32 0.0078125, %v702_v38 }
 0x1f5   : > { %v707_v40 = vadd.f32 1e-05, %v705_v39 }
 0x1f6   : > { %v704_v41 = vpop.xlane.xlu1 %703 }
 0x1f7   : > { %3753 = vrsqrt.f32 %v707_v40  ;;  %v706_v42 = vmul.f32 0.0078125, %v704_v41 }
 0x1f9   : > { %v708_v43 = vadd.f32 1e-05, %v706_v42 }
 0x1fb   : > { %3755 = vrsqrt.f32 %v708_v43 }
 0x201   : > { %v3754_v44 = vpop.eup %3753 }
 0x202   : > { %v711_v45 = vmul.f32 %v3754_v44, %v4468_v11 }
 0x204   : > { %v719_v49 = vmul.f32 %v3154_v46, %v711_v45 }
 0x205   : > { %v3756_v47 = vpop.eup %3755 }
 0x206   : > { %v712_v48 = vmul.f32 %v3756_v47, %v4472_v15  ;;  %v727_v52 = vadd.f32 %v3155_v50, %v719_v49 }
 0x208   : > { %v720_v51 = vmul.f32 %v3154_v46, %v712_v48 }
 0x20a   : > { %v728_v53 = vadd.f32 %v3155_v50, %v720_v51 }
 0x20c   : > { %v729_v54 = vpack.c.bf16 %v728_v53, %v727_v52 }
 0x20e   : > { %923 = vmatmul.mubr.bf16.vlgmr.msra.gmra.mrb[0].mxu0 %v729_v54  ;;  %3391 = vmatmul.mubr.bf16.vlgmr.msra.gmra.mrb[0].mxu1 %v729_v54 }
 0x20f   : > { %3396 = vmatprep.mubr.msk.bf16.mxu1 %vm4080_vm0, %v4078_v6  ;;  %3420 = vmatprep.mubr.msk.bf16.mxu0 %vm4080_vm0, %v4078_v6 }
 0x2e1   : > { %v924_v55 = vpop.f32.mrb[0].mxu0  ;;  %v967_v56 = vpop.f32.mrb[0].mxu1 }
 0x2e2   : > { %v926_v57 = vpop.f32.mrb[1].mxu0  ;;  %v3392_v58 = vpop.f32.mrb[1].mxu1 }
 0x2e3   : > { %v928_v59 = vpop.f32.mrb[2].mxu0  ;;  %v970_v60 = vpop.f32.mrb[2].mxu1 }
 0x2e4   : > { %v974_v61 = vpack.c.bf16 %v928_v59, %v924_v55  ;;  %v4523_v62 = vpack.c.bf16 %v970_v60, %v967_v56  ;;  %v930_v63 = vpop.f32.mrb[3].mxu0  ;;  %v3393_v0 = vpop.f32.mrb[3].mxu1 }
 0x2e5   : > { %v975_v1 = vpack.c.bf16 %v930_v63, %v926_v57 }
 0x2e6   : > { %978 = vrot.lane.b32.xlu1 %v974_v61, %s4081_s11  ;;  %v984_v5 = vrot.slane %v974_v61, 4  ;;  %v1498_v21 = vsel %vm1496_vm2, %v4523_v62, 0 }
 0x2e7   : > { %992 = vrot.lane.b32.xlu0 %v975_v1, %s4081_s11  ;;  %v1024_v2 = vsel %vm1019_vm1, %v975_v1, 0  ;;  %v998_v3 = vrot.slane %v975_v1, 4 }
 0x2e8   : > { %3395 = vmatpush3.bf16.xpose.msra.mxu1 %v1024_v2 }
 0x2e9   : > { %v1208_v4 = vsel %vm1019_vm1, %v998_v3, 0  ;;  %3400 = vmatprep.subr.bf16.mxu1 %v4078_v6 }
 0x2ea   : > { %994 = vrot.lane.b32.xlu1 %v975_v1, %s4082_s23  ;;  %3419 = vmatpush3.bf16.xpose.msra.mxu0 %v1208_v4 }
 0x2eb   : > { %996 = vrot.lane.b32.xlu0 %v975_v1, %s4083_s20  ;;  %3430 = vmatprep.subr.bf16.mxu0 %v4078_v6 }
 0x2ee   : > { %980 = vrot.lane.b32.xlu1 %v974_v61, %s4082_s23 }
 0x2ef   : > { %3397 = vmatmul.mubr.msk.bf16.vlgmr.msra.gmra.mrb[4].mxu1 %vm1019_vm1, %v974_v61  ;;  %999 = vrot.lane.b32.xlu0 %v998_v3, %s4081_s11 }
 0x2f0   : > { %3402 = vmatprep.mubr.msk.bf16.mxu1 %vm4080_vm0, %v4078_v6 }
 0x2f1   : > { %3421 = vmatmul.mubr.msk.bf16.vlgmr.msra.gmra.mrb[4].mxu0 %vm1019_vm1, %v984_v5 }
 0x2f2   : > { %982 = vrot.lane.b32.xlu1 %v974_v61, %s4083_s20  ;;  %3432 = vmatprep.mubr.msk.bf16.mxu0 %vm4080_vm0, %v4078_v6 }
 0x2f3   : > { %985 = vrot.lane.b32.xlu0 %v984_v5, %s4081_s11 }
 0x2f6   : > { %1001 = vrot.lane.b32.xlu1 %v998_v3, %s4082_s23 }
 0x2f7   : > { %987 = vrot.lane.b32.xlu0 %v984_v5, %s4082_s23 }
 0x2fa   : > { %1003 = vrot.lane.b32.xlu1 %v998_v3, %s4083_s20 }
 0x2fe   : > { %989 = vrot.lane.b32.xlu1 %v984_v5, %s4083_s20 }
 0x358   : > { %v979_v7 = vpop.permute.xlu1 %978 }
 0x359   : > { %v993_v8 = vpop.permute.xlu0 %992 }
 0x35a   : > { %v1070_v9 = vsel %vm1019_vm1, %v993_v8, 0 }
 0x35b   : > { %3401 = vmatpush3.bf16.xpose.msra.mxu1 %v1070_v9 }
 0x35c   : > { %v995_v10 = vpop.permute.xlu1 %994  ;;  %3406 = vmatprep.subr.bf16.mxu1 %v4078_v6 }
 0x35d   : > { %v997_v11 = vpop.permute.xlu0 %996  ;;  %v1116_v13 = vsel %vm1019_vm1, %v995_v10, 0 }
 0x35e   : > { %v1162_v18 = vsel %vm1019_vm1, %v997_v11, 0 }
 0x360   : > { %v981_v12 = vpop.permute.xlu1 %980 }
 0x361   : > { %v1000_v14 = vpop.permute.xlu0 %999 }
 0x362   : > { %3403 = vmatmul.mubr.msk.bf16.vlgmr.msra.gmra.mrb[8].mxu1 %vm1019_vm1, %v979_v7  ;;  %v1254_v22 = vsel %vm1019_vm1, %v1000_v14, 0 }
 0x363   : > { %3407 = vmatpush3.bf16.xpose.msra.mxu1 %v1116_v13  ;;  %3408 = vmatprep.mubr.msk.bf16.mxu1 %vm4080_vm0, %v4078_v6 }
 0x364   : > { %v983_v15 = vpop.permute.xlu1 %982  ;;  %3412 = vmatprep.subr.bf16.mxu1 %v4078_v6 }
 0x365   : > { %v986_v19 = vpop.permute.xlu0 %985 }
 0x368   : > { %v1002_v16 = vpop.permute.xlu1 %1001 }
 0x369   : > { %v1300_v17 = vsel %vm1019_vm1, %v1002_v16, 0  ;;  %v988_v20 = vpop.permute.xlu0 %987 }
 0x36a   : > { %3409 = vmatmul.mubr.msk.bf16.vlgmr.msra.gmra.mrb[12].mxu1 %vm1019_vm1, %v981_v12  ;;  %3431 = vmatpush3.bf16.xpose.msra.mxu0 %v1300_v17 }
 0x36b   : > { %3413 = vmatpush3.bf16.xpose.msra.mxu1 %v1162_v18  ;;  %3414 = vmatprep.mubr.msk.bf16.mxu1 %vm4080_vm0, %v4078_v6 }
 0x36c   : > { %3442 = vmatprep.subr.bf16.mxu0 %v4078_v6  ;;  %3424 = vmatprep.subr.bf16.mxu1 %v4078_v6  ;;  %v1004_v23 = vpop.permute.xlu1 %1003 }
 0x36d   : > { %v1346_v24 = vsel %vm1019_vm1, %v1004_v23, 0 }
 0x370   : > { %v990_v25 = vpop.permute.xlu1 %989 }
 0x371   : > { %3433 = vmatmul.mubr.msk.bf16.vlgmr.msra.gmra.mrb[8].mxu0 %vm1019_vm1, %v988_v20 }
 0x372   : > { %3415 = vmatmul.mubr.msk.bf16.vlgmr.msra.gmra.mrb[16].mxu1 %vm1019_vm1, %v983_v15  ;;  %3443 = vmatpush3.bf16.msra.mxu0 %v1498_v21 }
 0x373   : > { %3425 = vmatpush3.bf16.xpose.msra.mxu1 %v1254_v22  ;;  %3426 = vmatprep.mubr.msk.bf16.mxu1 %vm4080_vm0, %v4078_v6 }
 0x374   : > { %3436 = vmatprep.subr.bf16.mxu1 %v4078_v6  ;;  %3444 = vmatprep.mubr.msk.bf16.mxu0 %vm4080_vm0, %v4078_v6 }
 0x375   : > { %3454 = vmatprep.subr.bf16.mxu0 %v4078_v6 }
 0x37a   : > { %3427 = vmatmul.mubr.msk.bf16.vlgmr.msra.gmra.mrb[20].mxu1 %vm1019_vm1, %v986_v19 }
 0x37b   : > { %3437 = vmatpush3.bf16.xpose.msra.mxu1 %v1346_v24  ;;  %3438 = vmatprep.mubr.msk.bf16.mxu1 %vm4080_vm0, %v4078_v6 }
 0x37c   : > { %3448 = vmatprep.subr.bf16.mxu1 %v4078_v6 }
 0x382   : > { %3439 = vmatmul.mubr.msk.bf16.vlgmr.msra.gmra.mrb[24].mxu1 %vm1019_vm1, %v990_v25 }
 0x383   : > { %3450 = vmatprep.mubr.msk.bf16.mxu1 %vm4080_vm0, %v4078_v6 }
 0x3c2   : > { %v1060_v26 = vpop.f32.mrb[4].mxu1 }
 0x3c3   : > { %v3398_v27 = vpop.f32.mrb[5].mxu1  ;;  %v1389_v28 = vsel %vm1388_vm3, %v1060_v26, -inf }
 0x3c4   : > { %v1063_v29 = vpop.f32.mrb[6].mxu1  ;;  %1390 = vmax.xlane.f32.xlu0 %v1389_v28  ;;  %v1244_v30 = vpop.f32.mrb[4].mxu0  ;;  %v4610_v28 = vrot.slane %v4523_v62, 4 }
 0x3c5   : > { %v3399_v31 = vpop.f32.mrb[7].mxu1  ;;  %v3422_v33 = vpop.f32.mrb[5].mxu0  ;;  %v1401_v55 = vsel %vm1388_vm3, %v1244_v30, -inf }
 0x3c6   : > { %v1247_v34 = vpop.f32.mrb[6].mxu0 }
 0x3c7   : > { %v3423_v35 = vpop.f32.mrb[7].mxu0 }
 0x435   : > { %v1106_v36 = vpop.f32.mrb[8].mxu1 }
 0x436   : > { %v3404_v37 = vpop.f32.mrb[9].mxu1  ;;  %v1392_v38 = vsel %vm1388_vm3, %v1106_v36, -inf }
 0x437   : > { %v1109_v39 = vpop.f32.mrb[10].mxu1  ;;  %1393 = vmax.xlane.f32.xlu1 %v1392_v38 }
 0x438   : > { %v3405_v40 = vpop.f32.mrb[11].mxu1 }
 0x43d   : > { %v1152_v41 = vpop.f32.mrb[12].mxu1 }
 0x43e   : > { %v3410_v42 = vpop.f32.mrb[13].mxu1  ;;  %v1395_v43 = vsel %vm1388_vm3, %v1152_v41, -inf }
 0x43f   : > { %v1155_v44 = vpop.f32.mrb[14].mxu1  ;;  %1396 = vmax.xlane.f32.xlu0 %v1395_v43 }
 0x440   : > { %v3411_v45 = vpop.f32.mrb[15].mxu1 }
 0x444   : > { %v1336_v46 = vpop.f32.mrb[8].mxu0 }
 0x445   : > { %v4583_v47 = vpop.f32.mrb[16].mxu1  ;;  %v3434_v48 = vpop.f32.mrb[9].mxu0  ;;  %v1407_v59 = vsel %vm1388_vm3, %v1336_v46, -inf }
 0x446   : > { %v3416_v49 = vpop.f32.mrb[17].mxu1  ;;  %v1339_v50 = vpop.f32.mrb[10].mxu0  ;;  %v1398_v51 = vsel %vm1388_vm3, %v4583_v47, -inf }
 0x447   : > { %v1201_v52 = vpop.f32.mrb[18].mxu1  ;;  %1399 = vmax.xlane.f32.xlu0 %v1398_v51  ;;  %v3435_v53 = vpop.f32.mrb[11].mxu0 }
 0x448   : > { %v3417_v54 = vpop.f32.mrb[19].mxu1 }
 0x44b   : > { %1402 = vmax.xlane.f32.xlu0 %v1401_v55 }
 0x44d   : > { %v4588_v56 = vpop.f32.mrb[20].mxu1 }
 0x44e   : > { %v3428_v57 = vpop.f32.mrb[21].mxu1  ;;  %v1404_v58 = vsel %vm1388_vm3, %v4588_v56, -inf }
 0x44f   : > { %1405 = vmax.xlane.f32.xlu1 %v1404_v58  ;;  %v1293_v60 = vpop.f32.mrb[22].mxu1  ;;  %1408 = vmax.xlane.f32.xlu0 %v1407_v59 }
 0x450   : > { %v3429_v61 = vpop.f32.mrb[23].mxu1 }
 0x451   : > { %v1391_v63 = vpop.xlane.xlu0 %1390 }
 0x452   : > { %v1413_v0 = vsub.f32 %v1060_v26, %v1391_v63 }
 0x454   : > { %v1421_v1 = vmul.f32 1.442695, %v1413_v0 }
 0x455   : > { %v1382_v2 = vpop.f32.mrb[24].mxu1 }
 0x456   : > { %3757 = vpow2.f32 %v1421_v1  ;;  %v3440_v3 = vpop.f32.mrb[25].mxu1  ;;  %v1410_v4 = vsel %vm1388_vm3, %v1382_v2, -inf }
 0x457   : > { %1411 = vmax.xlane.f32.xlu1 %v1410_v4  ;;  %v1385_v5 = vpop.f32.mrb[26].mxu1  ;;  %v1682_v4 = vsel %vm1496_vm2, %v4610_v28, 0 }
 0x458   : > { %v3441_v7 = vpop.f32.mrb[27].mxu1 }
 0x460   : > { %v3758_v8 = vpop.eup %3757 }
 0x461   : > { %v1437_v9 = vsel %vm1388_vm3, %v3758_v8, 0.0 }
 0x462   : > { %1438 = vadd.xlane.f32.xlu0 %v1437_v9 }
 0x4c4   : > { %v1394_v10 = vpop.xlane.xlu1 %1393 }
 0x4c5   : > { %v1414_v11 = vsub.f32 %v1106_v36, %v1394_v10 }
 0x4c7   : > { %v1423_v12 = vmul.f32 1.442695, %v1414_v11 }
 0x4c9   : > { %3759 = vpow2.f32 %v1423_v12 }
 0x4cc   : > { %v1397_v13 = vpop.xlane.xlu0 %1396 }
 0x4cd   : > { %v1415_v20 = vsub.f32 %v1152_v41, %v1397_v13 }
 0x4cf   : > { %v1425_v24 = vmul.f32 1.442695, %v1415_v20 }
 0x4d3   : > { %v4595_v14 = vpop.eup %3759 }
 0x4d4   : > { %v1400_v15 = vpop.xlane.xlu0 %1399  ;;  %v1440_v16 = vsel %vm1388_vm3, %v4595_v14, 0.0 }
 0x4d5   : > { %1441 = vadd.xlane.f32.xlu1 %v1440_v16  ;;  %v1416_v36 = vsub.f32 %v4583_v47, %v1400_v15 }
 0x4d7   : > { %v1427_v39 = vmul.f32 1.442695, %v1416_v36 }
 0x4d8   : > { %v1403_v17 = vpop.xlane.xlu0 %1402 }
 0x4d9   : > { %v1417_v18 = vsub.f32 %v1244_v30, %v1403_v17 }
 0x4db   : > { %v1429_v19 = vmul.f32 1.442695, %v1417_v18 }
 0x4dc   : > { %v1409_v21 = vpop.xlane.xlu0 %1408  ;;  %v1406_v37 = vpop.xlane.xlu1 %1405 }
 0x4dd   : > { %3761 = vpow2.f32 %v1429_v19  ;;  %v1419_v22 = vsub.f32 %v1336_v46, %v1409_v21  ;;  %v1418_v40 = vsub.f32 %v4588_v56, %v1406_v37 }
 0x4df   : > { %v1433_v23 = vmul.f32 1.442695, %v1419_v22  ;;  %v1431_v42 = vmul.f32 1.442695, %v1418_v40 }
 0x4e1   : > { %3763 = vpow2.f32 %v1433_v23 }
 0x4e2   : > { %3765 = vpow2.f32 %v1425_v24 }
 0x4e4   : > { %v1412_v41 = vpop.xlane.xlu1 %1411 }
 0x4e5   : > { %v1420_v43 = vsub.f32 %v1382_v2, %v1412_v41 }
 0x4e6   : > { %1008 = vrot.lane.b32.xlu1 %v4523_v62, %s4082_s23 }
 0x4e7   : > { %v4601_v25 = vpop.eup %3761  ;;  %v1435_v44 = vmul.f32 1.442695, %v1420_v43 }
 0x4e8   : > { %v1449_v26 = vsel %vm1388_vm3, %v4601_v25, 0.0 }
 0x4e9   : > { %1450 = vadd.xlane.f32.xlu0 %v1449_v26 }
 0x4ea   : > { %1010 = vrot.lane.b32.xlu1 %v4523_v62, %s4083_s20 }
 0x4eb   : > { %v4607_v27 = vpop.eup %3763 }
 0x4ec   : > { %v1455_v29 = vsel %vm1388_vm3, %v4607_v27, 0.0  ;;  %v3766_v30 = vpop.eup %3765 }
 0x4ed   : > { %1456 = vadd.xlane.f32.xlu0 %v1455_v29  ;;  %v1443_v33 = vsel %vm1388_vm3, %v3766_v30, 0.0 }
 0x4ee   : > { %1013 = vrot.lane.b32.xlu1 %v4610_v28, %s4081_s11 }
 0x4ef   : > { %v1439_v31 = vpop.xlane.xlu0 %1438 }
 0x4f0   : > { %3767 = vrcp.f32 %v1439_v31 }
 0x4f1   : > { %1444 = vadd.xlane.f32.xlu0 %v1443_v33  ;;  %3769 = vpow2.f32 %v1427_v39 }
 0x4f2   : > { %3771 = vpow2.f32 %v1431_v42  ;;  %v3665_v42 = vld [vmem:[%s4417_s19] sm:$0xff]  }
 0x4f3   : > { %3773 = vpow2.f32 %v1435_v44  ;;  %v3666_v44 = vld [vmem:[%s4417_s19 + $0x8] sm:$0xff]  }
 0x4fa   : > { %v3768_v34 = vpop.eup %3767 }
 0x4fb   : > { %v1477_v35 = vmul.f32 %v3768_v34, %v3758_v8  ;;  %v4626_v45 = vpop.eup %3769 }
 0x4fc   : > { %v1446_v46 = vsel %vm1388_vm3, %v4626_v45, 0.0  ;;  %v4630_v47 = vpop.eup %3771 }
 0x4fd   : > { %v1485_v38 = vpack.c.bf16 %v1477_v35, %v1477_v35  ;;  %v1452_v48 = vsel %vm1388_vm3, %v4630_v47, 0.0  ;;  %v4634_v49 = vpop.eup %3773 }
 0x4ff   : > { %3445 = vmatmul.mubr.msk.bf16.vlgmr.msra.gmra.mrb[12].mxu0 %vm1388_vm3, %v1485_v38 }
 0x500   : > { %3456 = vmatprep.mubr.msk.bf16.mxu0 %vm4080_vm0, %v4078_v6 }
 0x507   : > { %1006 = vrot.lane.b32.xlu0 %v4523_v62, %s4081_s11  ;;  %v1458_v62 = vsel %vm1388_vm3, %v4634_v49, 0.0 }
 0x50b   : > { %1015 = vrot.lane.b32.xlu0 %v4610_v28, %s4082_s23 }
 0x512   : > { %1447 = vadd.xlane.f32.xlu1 %v1446_v46 }
 0x516   : > { %1453 = vadd.xlane.f32.xlu1 %v1452_v48  ;;  %v3667_v48 = vld [vmem:[%s4417_s19 + $0x10] sm:$0xff]  }
 0x51a   : > { %1459 = vadd.xlane.f32.xlu1 %v1458_v62  ;;  %v3668_v62 = vld [vmem:[%s4417_s19 + $0x18] sm:$0xff]  }
 0x52b   : > { %1017 = vrot.lane.b32.xlu1 %v4610_v28, %s4083_s20 }
 0x562   : > { %v1442_v50 = vpop.xlane.xlu1 %1441 }
 0x563   : > { %3775 = vrcp.f32 %v1442_v50 }
 0x566   : > { %v1009_v51 = vpop.permute.xlu1 %1008 }
 0x567   : > { %v1590_v52 = vsel %vm1496_vm2, %v1009_v51, 0 }
 0x568   : > { %3455 = vmatpush3.bf16.msra.mxu0 %v1590_v52 }
 0x569   : > { %3466 = vmatprep.subr.bf16.mxu0 %v4078_v6 }
 0x56a   : > { %v1011_v60 = vpop.permute.xlu1 %1010 }
 0x56b   : > { %v1636_v63 = vsel %vm1496_vm2, %v1011_v60, 0 }
 0x56d   : > { %v3776_v55 = vpop.eup %3775 }
 0x56e   : > { %v1478_v57 = vmul.f32 %v3776_v55, %v4595_v14  ;;  %v1014_v12 = vpop.permute.xlu1 %1013 }
 0x56f   : > { %v1728_v21 = vsel %vm1496_vm2, %v1014_v12, 0 }
 0x570   : > { %v1486_v61 = vpack.c.bf16 %v1478_v57, %v1478_v57 }
 0x576   : > { %v1451_v53 = vpop.xlane.xlu0 %1450 }
 0x57a   : > { %v1457_v54 = vpop.xlane.xlu0 %1456 }
 0x57e   : > { %v1445_v56 = vpop.xlane.xlu0 %1444 }
 0x57f   : > { %3777 = vrcp.f32 %v1445_v56  ;;  %v3670_v56 = vld [vmem:[%s4417_s19 + $0x28] sm:$0xff]  }
 0x580   : > { %3779 = vrcp.f32 %v1451_v53 }
 0x581   : > { %3781 = vrcp.f32 %v1457_v54  ;;  %v3669_v54 = vld [vmem:[%s4417_s19 + $0x20] sm:$0xff]  }
 0x582   : > { %v1007_v58 = vpop.permute.xlu0 %1006 }
 0x583   : > { %v1544_v59 = vsel %vm1496_vm2, %v1007_v58, 0 }
 0x584   : > { %3449 = vmatpush3.bf16.msra.mxu1 %v1544_v59  ;;  %v3671_v59 = vld [vmem:[%s4417_s19 + $0x30] sm:$0xff]  }
 0x585   : > { %3460 = vmatprep.subr.bf16.mxu1 %v4078_v6 }
 0x586   : > { %v1016_v7 = vpop.permute.xlu0 %1015 }
 0x587   : > { %3451 = vmatmul.mubr.msk.bf16.vlgmr.msra.gmra.mrb[28].mxu1 %vm1388_vm3, %v1486_v61  ;;  %v1774_v10 = vsel %vm1496_vm2, %v1016_v7, 0 }
 0x588   : > { %3461 = vmatpush3.bf16.msra.mxu1 %v1636_v63  ;;  %3462 = vmatprep.mubr.msk.bf16.mxu1 %vm4080_vm0, %v4078_v6  ;;  %v3672_v63 = vld [vmem:[%s4417_s19 + $0x38] sm:$0xff]  }
 0x589   : > { %v3778_v0 = vpop.eup %3777  ;;  %3472 = vmatprep.subr.bf16.mxu1 %v4078_v6 }
 0x58a   : > { %v1479_v1 = vmul.f32 %v3778_v0, %v3766_v30  ;;  %v3780_v3 = vpop.eup %3779 }
 0x58b   : > { %v1481_v5 = vmul.f32 %v3780_v3, %v4601_v25  ;;  %v3782_v9 = vpop.eup %3781 }
 0x58c   : > { %v1487_v2 = vpack.c.bf16 %v1479_v1, %v1479_v1  ;;  %v1483_v11 = vmul.f32 %v3782_v9, %v4607_v27 }
 0x58d   : > { %v1489_v8 = vpack.c.bf16 %v1481_v5, %v1481_v5 }
 0x58e   : > { %3457 = vmatmul.mubr.msk.bf16.vlgmr.msra.gmra.mrb[16].mxu0 %vm1388_vm3, %v1487_v2  ;;  %v1491_v13 = vpack.c.bf16 %v1483_v11, %v1483_v11 }
 0x58f   : > { %3467 = vmatpush3.bf16.msra.mxu0 %v1682_v4  ;;  %3468 = vmatprep.mubr.msk.bf16.mxu0 %vm4080_vm0, %v4078_v6 }
 0x590   : > { %3478 = vmatprep.subr.bf16.mxu0 %v4078_v6 }
 0x596   : > { %3469 = vmatmul.mubr.msk.bf16.vlgmr.msra.gmra.mrb[20].mxu0 %vm1388_vm3, %v1489_v8 }
 0x597   : > { %3479 = vmatpush3.bf16.msra.mxu0 %v1774_v10  ;;  %3480 = vmatprep.mubr.msk.bf16.mxu0 %vm4080_vm0, %v4078_v6 }
 0x598   : > { %3490 = vmatprep.subr.bf16.mxu0 %v4078_v6 }
 0x59e   : > { %3481 = vmatmul.mubr.msk.bf16.vlgmr.msra.gmra.mrb[24].mxu0 %vm1388_vm3, %v1491_v13 }
 0x59f   : > { %v1448_v14 = vpop.xlane.xlu1 %1447  ;;  %3506 = vmatprep.mubr.msk.bf16.mxu0 %vm4080_vm0, %v4078_v6  ;;  %3491 = vmatpush3.bf16.msra.mxu0 %v3665_v42  ;;  %v3679_v42 = vld [vmem:[%s4419_s25 + $0x20] ss:$16 sps:$4 sm:$0xff]  }
 0x5a0   : > { %3783 = vrcp.f32 %v1448_v14  ;;  %3492 = vmatprep.subr.bf16.mxu0 %v4078_v6 }
 0x5a3   : > { %v1454_v15 = vpop.xlane.xlu1 %1453  ;;  %3493 = vmatpush3.bf16.msra.mxu0 %v3666_v44 }
 0x5a4   : > { %3785 = vrcp.f32 %v1454_v15  ;;  %3494 = vmatprep.subr.bf16.mxu0 %v4078_v6 }
 0x5a7   : > { %v1460_v16 = vpop.xlane.xlu1 %1459  ;;  %3495 = vmatpush3.bf16.msra.mxu0 %v3667_v48 }
 0x5a8   : > { %3787 = vrcp.f32 %v1460_v16  ;;  %3496 = vmatprep.subr.bf16.mxu0 %v4078_v6 }
 0x5aa   : > { %v3784_v17 = vpop.eup %3783 }
 0x5ab   : > { %v1480_v18 = vmul.f32 %v3784_v17, %v4626_v45  ;;  %v1018_v23 = vpop.permute.xlu1 %1017  ;;  %3497 = vmatpush3.bf16.msra.mxu0 %v3668_v62 }
 0x5ac   : > { %v1820_v26 = vsel %vm1496_vm2, %v1018_v23, 0  ;;  %3498 = vmatprep.subr.bf16.mxu0 %v4078_v6 }
 0x5ad   : > { %v1488_v19 = vpack.c.bf16 %v1480_v18, %v1480_v18 }
 0x5ae   : > { %v3786_v20 = vpop.eup %3785 }
 0x5af   : > { %3463 = vmatmul.mubr.msk.bf16.vlgmr.msra.gmra.mrb[32].mxu1 %vm1388_vm3, %v1488_v19  ;;  %v1482_v22 = vmul.f32 %v3786_v20, %v4630_v47  ;;  %3499 = vmatpush3.bf16.msra.mxu0 %v3669_v54  ;;  %v3688_v54 = vld [vmem:[%s4419_s25 + $0x48] ss:$16 sps:$4 sm:$0xff]  }
 0x5b0   : > { %3473 = vmatpush3.bf16.msra.mxu1 %v1728_v21  ;;  %3474 = vmatprep.mubr.msk.bf16.mxu1 %vm4080_vm0, %v4078_v6 }
 0x5b1   : > { %3484 = vmatprep.subr.bf16.mxu1 %v4078_v6  ;;  %v1490_v24 = vpack.c.bf16 %v1482_v22, %v1482_v22  ;;  %3500 = vmatprep.subr.bf16.mxu0 %v4078_v6 }
 0x5b2   : > { %v3788_v25 = vpop.eup %3787 }
 0x5b3   : > { %v1484_v27 = vmul.f32 %v3788_v25, %v4634_v49  ;;  %3501 = vmatpush3.bf16.msra.mxu0 %v3670_v56  ;;  %v3196_v25 = vld [vmem:[%s662_s27] ss:$0 sm:$0xff]  ;;  %v3696_v56 = vld [vmem:[%s4419_s25 + $0x6c] ss:$16 sps:$4 sm:$0xff]  }
 0x5b4   : > { %3502 = vmatprep.subr.bf16.mxu0 %v4078_v6 }
 0x5b5   : > { %v1492_v28 = vpack.c.bf16 %v1484_v27, %v1484_v27 }
 0x5b7   : > { %3475 = vmatmul.mubr.msk.bf16.vlgmr.msra.gmra.mrb[36].mxu1 %vm1388_vm3, %v1490_v24  ;;  %3503 = vmatpush3.bf16.msra.mxu0 %v3671_v59  ;;  %v3699_v59 = vld [vmem:[%s4419_s25 + $0x84] ss:$16 sps:$4 sm:$0xff]  }
 0x5b8   : > { %3485 = vmatpush3.bf16.msra.mxu1 %v1820_v26  ;;  %3486 = vmatprep.mubr.msk.bf16.mxu1 %vm4080_vm0, %v4078_v6 }
 0x5b9   : > { %3504 = vmatprep.subr.bf16.mxu0 %v4078_v6 }
 0x5bb   : > { %3505 = vmatpush3.bf16.msra.mxu0 %v3672_v63  ;;  %v3700_v63 = vld [vmem:[%s4419_s25 + $0x88] ss:$16 sps:$4 sm:$0xff]  }
 0x5bf   : > { %3487 = vmatmul.mubr.msk.bf16.vlgmr.msra.gmra.mrb[40].mxu1 %vm1388_vm3, %v1492_v28 }
 0x5c0   : > { %2296 = vmatprep.mubr.bf16.mxu1 %v4079_v32 }
 0x5d2   : > { %v4680_v29 = vpop.f32.mrb[12].mxu0 }
 0x5d3   : > { %v3446_v30 = vpop.f32.mrb[13].mxu0 }
 0x5d4   : > { %v1537_v31 = vpop.f32.mrb[14].mxu0  ;;  %v3825_v30 = vld [vmem:[#allocation2] sm:$0xff] }
 0x5d5   : > { %v3447_v33 = vpop.f32.mrb[15].mxu0 }
 0x65a   : > { %v1580_v34 = vpop.f32.mrb[28].mxu1 }
 0x65b   : > { %v3452_v35 = vpop.f32.mrb[29].mxu1 }
 0x65c   : > { %v1583_v36 = vpop.f32.mrb[30].mxu1 }
 0x65d   : > { %v3453_v37 = vpop.f32.mrb[31].mxu1  ;;  %v3673_v36 = vld [vmem:[%s4419_s25] ss:$16 sps:$4 sm:$0xff]  }
 0x65e   : > { %v3675_v37 = vld [vmem:[%s4419_s25 + $0x4] ss:$16 sps:$4 sm:$0xff]  }
 0x65f   : > { %2264 = vmatprep.subr.bf16.mxu1 %v3675_v37  ;;  %v3727_v37 = vld [vmem:[%s4459_s8 + $0x8] sm:$0xff]  }
 0x660   : > { %2265 = vmatpush1.bf16.msra.mxu1 %v3673_v36  ;;  %v3726_v36 = vld [vmem:[%s4459_s8 + $0xc8] sm:$0xff]  }
 0x661   : > { %v1626_v38 = vpop.f32.mrb[16].mxu0 }
 0x662   : > { %v3458_v39 = vpop.f32.mrb[17].mxu0 }
 0x663   : > { %v1629_v40 = vpop.f32.mrb[18].mxu0  ;;  %v3678_v39 = vld [vmem:[%s4419_s25 + $0xc] ss:$16 sps:$4 sm:$0xff]  }
 0x664   : > { %v3459_v41 = vpop.f32.mrb[19].mxu0  ;;  %v3681_v40 = vld [vmem:[%s4419_s25 + $0x24] ss:$16 sps:$4 sm:$0xff]   ;;  %2307 = vmatprep.subr.bf16.mxu0 %v3678_v39 }
 0x665   : > { %v3684_v41 = vld [vmem:[%s4419_s25 + $0x2c] ss:$16 sps:$4 sm:$0xff]   ;;  %2266 = vmatprep.subr.bf16.mxu1 %v3681_v40  ;;  %v3729_v39 = vld [vmem:[%s4459_s8 + $0x50] sm:$0xff]  }
 0x666   : > { %2267 = vmatpush1.bf16.msra.mxu1 %v3679_v42  ;;  %v3730_v40 = vld [vmem:[%s4459_s8 + $0xd0] sm:$0xff]  }
 0x667   : > { %v3732_v42 = vld [vmem:[%s4459_s8 + $0x90] sm:$0xff]  }
 0x669   : > { %v1718_v43 = vpop.f32.mrb[20].mxu0 }
 0x66a   : > { %v3470_v45 = vpop.f32.mrb[21].mxu0 }
 0x66b   : > { %v1721_v46 = vpop.f32.mrb[22].mxu0 }
 0x66c   : > { %v3471_v47 = vpop.f32.mrb[23].mxu0 }
 0x671   : > { %v1810_v49 = vpop.f32.mrb[24].mxu0 }
 0x672   : > { %v3623_v50 = vpack.i.bf16 %v1810_v49, %v1626_v38  ;;  %v3482_v51 = vpop.f32.mrb[25].mxu0  ;;  %v3676_v38 = vld [vmem:[%s4419_s25 + $0x8] ss:$16 sps:$4 sm:$0xff]  }
 0x673   : > { %v1813_v52 = vpop.f32.mrb[26].mxu0  ;;  %v3687_v51 = vld [vmem:[%s4419_s25 + $0x44] ss:$16 sps:$4 sm:$0xff]  }
 0x674   : > { %3624 = vrot.lane.b32.xlu1 %v3623_v50, %s4082_s23  ;;  %v3483_v53 = vpop.f32.mrb[27].mxu0  ;;  %v3690_v52 = vld [vmem:[%s4419_s25 + $0x4c] ss:$16 sps:$4 sm:$0xff]   ;;  %2268 = vmatprep.subr.bf16.mxu1 %v3687_v51 }
 0x675   : > { %v3685_v53 = vld [vmem:[%s4419_s25 + $0x40] ss:$16 sps:$4 sm:$0xff]   ;;  %v3742_v51 = vld [vmem:[%s4459_s8 + $0xe8] sm:$0xff]  }
 0x676   : > { %2269 = vmatpush1.bf16.msra.mxu1 %v3685_v53  ;;  %v3744_v53 = vld [vmem:[%s4459_s8 + $0xa8] sm:$0xff]  }
 0x682   : > { %v1672_v55 = vpop.f32.mrb[32].mxu1 }
 0x683   : > { %v3464_v57 = vpop.f32.mrb[33].mxu1 }
 0x684   : > { %v1675_v58 = vpop.f32.mrb[34].mxu1  ;;  %v3691_v57 = vld [vmem:[%s4419_s25 + $0x60] ss:$16 sps:$4 sm:$0xff]  }
 0x685   : > { %v3465_v60 = vpop.f32.mrb[35].mxu1  ;;  %v3694_v58 = vld [vmem:[%s4419_s25 + $0x68] ss:$16 sps:$4 sm:$0xff]  }
 0x686   : > { %v3702_v60 = vld [vmem:[%s4419_s25 + $0x8c] ss:$16 sps:$4 sm:$0xff]  }
 0x68a   : > { %v1764_v61 = vpop.f32.mrb[36].mxu1 }
 0x68b   : > { %v3618_v0 = vpack.i.bf16 %v1764_v61, %v1580_v34  ;;  %v3476_v1 = vpop.f32.mrb[37].mxu1  ;;  %v3697_v61 = vld [vmem:[%s4419_s25 + $0x80] ss:$16 sps:$4 sm:$0xff]  }
 0x68c   : > { %v1767_v2 = vpop.f32.mrb[38].mxu1  ;;  %v3708_v1 = vld [vmem:[%s4419_s25 + $0xac] ss:$16 sps:$4 sm:$0xff]  }
 0x68d   : > { %3619 = vrot.lane.b32.xlu0 %v3618_v0, %s4083_s20  ;;  %v3477_v3 = vpop.f32.mrb[39].mxu1  ;;  %v3705_v0 = vld [vmem:[%s4419_s25 + $0xa4] ss:$16 sps:$4 sm:$0xff]   ;;  %v3703_v2 = vld [vmem:[%s4419_s25 + $0xa0] ss:$16 sps:$4 sm:$0xff]  }
 0x68e   : > { %v3706_v3 = vld [vmem:[%s4419_s25 + $0xa8] ss:$16 sps:$4 sm:$0xff]  }
 0x692   : > { %v1856_v4 = vpop.f32.mrb[40].mxu1 }
 0x693   : > { %v3628_v5 = vpack.i.bf16 %v1856_v4, %v1672_v55  ;;  %v3488_v7 = vpop.f32.mrb[41].mxu1  ;;  %v3693_v55 = vld [vmem:[%s4419_s25 + $0x64] ss:$16 sps:$4 sm:$0xff]   ;;  %v3709_v4 = vld [vmem:[%s4419_s25 + $0xc0] ss:$16 sps:$4 sm:$0xff]  }
 0x694   : > { %v1859_v8 = vpop.f32.mrb[42].mxu1  ;;  %2270 = vmatprep.subr.bf16.mxu1 %v3693_v55  ;;  %v3712_v7 = vld [vmem:[%s4419_s25 + $0xc8] ss:$16 sps:$4 sm:$0xff]   ;;  %v3746_v55 = vld [vmem:[%s4459_s8 + $0xf0] sm:$0xff]  }
 0x695   : > { %3629 = vrot.lane.b32.xlu0 %v3628_v5, %s4081_s11  ;;  %v3489_v9 = vpop.f32.mrb[43].mxu1  ;;  %2271 = vmatpush1.bf16.msra.mxu1 %v3691_v57  ;;  %v3711_v5 = vld [vmem:[%s4419_s25 + $0xc4] ss:$16 sps:$4 sm:$0xff]   ;;  %v3714_v8 = vld [vmem:[%s4419_s25 + $0xcc] ss:$16 sps:$4 sm:$0xff]  }
 0x696   : > { %2272 = vmatprep.subr.bf16.mxu1 %v3699_v59  ;;  %v3717_v9 = vld [vmem:[%s4419_s25 + $0xe4] ss:$16 sps:$4 sm:$0xff]   ;;  %v3750_v59 = vld [vmem:[%s4459_s8 + $0xf8] sm:$0xff]  }
 0x697   : > { %v3748_v57 = vld [vmem:[%s4459_s8 + $0xb0] sm:$0xff]  }
 0x699   : > { %2273 = vmatpush1.bf16.msra.mxu1 %v3697_v61  ;;  %v3752_v61 = vld [vmem:[%s4459_s8 + $0xb8] sm:$0xff]  }
 0x69a   : > { %2274 = vmatprep.subr.bf16.mxu1 %v3705_v0 }
 0x69d   : > { %2275 = vmatpush1.bf16.msra.mxu1 %v3703_v2 }
 0x69e   : > { %2276 = vmatprep.subr.bf16.mxu1 %v3711_v5 }
 0x6a1   : > { %2277 = vmatpush1.bf16.msra.mxu1 %v3709_v4 }
 0x6a2   : > { %2278 = vmatprep.subr.bf16.mxu1 %v3717_v9 }
 0x6e6   : > { %v3625_v6 = vpop.permute.xlu1 %3624 }
 0x6e7   : > { %v3627_v15 = vunpack.i.h.bf16 %v3625_v6  ;;  %v3626_v16 = vunpack.i.l.bf16 %v3625_v6 }
 0x6ff   : > { %v3620_v10 = vpop.permute.xlu0 %3619 }
 0x700   : > { %v3622_v11 = vunpack.i.h.bf16 %v3620_v10  ;;  %v3621_v12 = vunpack.i.l.bf16 %v3620_v10  ;;  %v3720_v10 = vld [vmem:[%s4419_s25 + $0xec] ss:$16 sps:$4 sm:$0xff]  }
 0x702   : > { %v1874_v13 = vsel %vm1019_vm1, %v4680_v29, %v3621_v12  ;;  %v1891_v14 = vsel %vm1019_vm1, %v1718_v43, %v3622_v11  ;;  %v3682_v43 = vld [vmem:[%s4419_s25 + $0x28] ss:$16 sps:$4 sm:$0xff]   ;;  %v3715_v11 = vld [vmem:[%s4419_s25 + $0xe0] ss:$16 sps:$4 sm:$0xff]  }
 0x703   : > { %v1876_v20 = vsel %vm1875_vm4, %v1874_v13, %v3626_v16  ;;  %v1892_v21 = vsel %vm1875_vm4, %v1891_v14, %v3627_v15  ;;  %v3718_v12 = vld [vmem:[%s4419_s25 + $0xe8] ss:$16 sps:$4 sm:$0xff]   ;;  %2279 = vmatpush1.bf16.msra.mxu1 %v3715_v11 }
 0x707   : > { %v3630_v17 = vpop.permute.xlu0 %3629 }
 0x708   : > { %v3632_v18 = vunpack.i.h.bf16 %v3630_v17  ;;  %v3631_v19 = vunpack.i.l.bf16 %v3630_v17 }
 0x70a   : > { %v1878_v22 = vsel %vm1877_vm5, %v1876_v20, %v3631_v19  ;;  %v1893_v23 = vsel %vm1877_vm5, %v1892_v21, %v3632_v18  ;;  %v3205_v20 = vld [vmem:[%s665_s14] ss:$0 sm:$0xff] }
 0x70b   : > { %v1894_v24 = vpack.c.bf16 %v1893_v23, %v1878_v22 }
 0x70d   : > { %3507 = vmatmul.mubr.bf16.vlgmr.msra.gmra.mrb[28].mxu0 %v1894_v24  ;;  %v3206_v24 = vld [vmem:[%s668_s17] ss:$0 sm:$0xff] }
 0x70e   : > { %2339 = vmatprep.mubr.bf16.mxu0 %v4079_v32  ;;  %v3826_v32 = vld [vmem:[#allocation2 + $0x8] sm:$0xff]  ;;  %2308 = vmatpush1.bf16.msra.mxu0 %v3676_v38 }
 0x70f   : > { %2309 = vmatprep.subr.bf16.mxu0 %v3684_v41  ;;  %v3728_v38 = vld [vmem:[%s4459_s8 + $0x88] sm:$0xff]   ;;  %v3731_v41 = vld [vmem:[%s4459_s8 + $0x10] sm:$0xff]  }
 0x712   : > { %2310 = vmatpush1.bf16.msra.mxu0 %v3682_v43  ;;  %v3733_v43 = vld [vmem:[%s4459_s8 + $0x58] sm:$0xff]  }
 0x713   : > { %2311 = vmatprep.subr.bf16.mxu0 %v3690_v52  ;;  %v3743_v52 = vld [vmem:[%s4459_s8 + $0x28] sm:$0xff]  }
 0x716   : > { %2312 = vmatpush1.bf16.msra.mxu0 %v3688_v54  ;;  %v3745_v54 = vld [vmem:[%s4459_s8 + $0x70] sm:$0xff]  }
 0x717   : > { %2313 = vmatprep.subr.bf16.mxu0 %v3696_v56  ;;  %v3747_v56 = vld [vmem:[%s4459_s8 + $0x30] sm:$0xff]  }
 0x71a   : > { %2314 = vmatpush1.bf16.msra.mxu0 %v3694_v58  ;;  %v3749_v58 = vld [vmem:[%s4459_s8 + $0x78] sm:$0xff]  }
 0x71b   : > { %2315 = vmatprep.subr.bf16.mxu0 %v3702_v60  ;;  %v3751_v60 = vld [vmem:[%s4459_s8 + $0x38] sm:$0xff]  }
 0x71e   : > { %2316 = vmatpush1.bf16.msra.mxu0 %v3700_v63  ;;  %v2084_v63 = vlaneseq }
 0x71f   : > { %2317 = vmatprep.subr.bf16.mxu0 %v3708_v1 }
 0x720   : > { %v2085_v0 = vshrl.u32 %v2084_v63, 7 }
 0x722   : > { %2318 = vmatpush1.bf16.msra.mxu0 %v3706_v3  ;;  %v2086_v1 = vsub.s32 0, %v2085_v0  ;;  %v2094_v2 = vsub.s32 2, %v2085_v0  ;;  %v2082_v3 = vld [vmem:[%s4453_s4] sm:$0xf]  ;;  %v2090_v4 = vsub.s32 1, %v2085_v0  ;;  %v2098_v5 = vsub.s32 3, %v2085_v0 }
 0x723   : > { %2319 = vmatprep.subr.bf16.mxu0 %v3714_v8 }
 0x724   : > { %v2095_v8 = vrot.slane %v2082_v3, %v2094_v2  ;;  %v2091_v9 = vrot.slane %v2082_v3, %v2090_v4 }
 0x726   : > { %2320 = vmatpush1.bf16.msra.mxu0 %v3712_v7  ;;  %v2087_v7 = vrot.slane %v2082_v3, %v2086_v1 }
 0x727   : > { %2321 = vmatprep.subr.bf16.mxu0 %v3720_v10  ;;  %v2099_v10 = vrot.slane %v2082_v3, %v2098_v5 }
 0x72a   : > { %2322 = vmatpush1.bf16.msra.mxu0 %v3718_v12 }
 0x7e0   : > { %v2000_v26 = vpop.f32.mrb[28].mxu0 }
 0x7e1   : > { %v2001_v27 = vadd.f32 %v3196_v25, %v2000_v26  ;;  %v3508_v28 = vpop.f32.mrb[29].mxu0 }
 0x7e2   : > { %v2003_v29 = vpop.f32.mrb[30].mxu0 }
 0x7e3   : > { %v4709_v31 = vadd.f32 %v3825_v30, %v2001_v27  ;;  %v2004_v33 = vadd.f32 %v3196_v25, %v2003_v29  ;;  %v3509_v34 = vpop.f32.mrb[31].mxu0  ;;  %v3721_v29 = vld [vmem:[%s4459_s8 + $0x40] sm:$0xff]  }
 0x7e4   : > { %v3722_v30 = vld [vmem:[%s4459_s8 + $0xc0] sm:$0xff]   ;;  %3330 = vmatprep.subr.bf16.mxu1 %v3721_v29 }
 0x7e5   : > { %v4711_v35 = vadd.f32 %v3826_v32, %v2004_v33  ;;  %2011 = vadd.xlane.f32.xlu1 %v4709_v31  ;;  %v3723_v33 = vld [vmem:[%s4459_s8] sm:$0xff]   ;;  %3352 = vmatprep.subr.bf16.mxu0 %v3722_v30  ;;  %v3725_v32 = vld [vmem:[%s4459_s8 + $0x48] sm:$0xff]  }
 0x7e6   : > { %v3724_v34 = vld [vmem:[%s4459_s8 + $0x80] sm:$0xff]  }
 0x7e7   : > { %2013 = vadd.xlane.f32.xlu0 %v4711_v35 }
 0x872   : > { %v2012_v44 = vpop.xlane.xlu1 %2011 }
 0x873   : > { %v2015_v45 = vmul.f32 0.0078125, %v2012_v44  ;;  %v3734_v44 = vld [vmem:[%s4459_s8 + $0xd8] sm:$0xff]  }
 0x874   : > { %v2014_v46 = vpop.xlane.xlu0 %2013 }
 0x875   : > { %v4724_v47 = vsub.f32 %v4709_v31, %v2015_v45  ;;  %v2016_v48 = vmul.f32 0.0078125, %v2014_v46  ;;  %v3735_v45 = vld [vmem:[%s4459_s8 + $0x18] sm:$0xff]  }
 0x876   : > { %v3736_v46 = vld [vmem:[%s4459_s8 + $0x98] sm:$0xff]  }
 0x877   : > { %v4727_v49 = vsub.f32 %v4711_v35, %v2016_v48  ;;  %v2019_v62 = vmul.f32 %v4724_v47, %v4724_v47  ;;  %v3738_v48 = vld [vmem:[%s4459_s8 + $0xe0] sm:$0xff]  }
 0x879   : > { %2021 = vadd.xlane.f32.xlu0 %v2019_v62  ;;  %v2020_v50 = vmul.f32 %v4727_v49, %v4727_v49  ;;  %v3740_v62 = vld [vmem:[%s4459_s8 + $0xa0] sm:$0xff]  }
 0x87d   : > { %2023 = vadd.xlane.f32.xlu0 %v2020_v50  ;;  %v3741_v50 = vld [vmem:[%s4459_s8 + $0x68] sm:$0xff]  }
 0x906   : > { %v2022_v6 = vpop.xlane.xlu0 %2021 }
 0x907   : > { %v2025_v13 = vmul.f32 0.0078125, %v2022_v6 }
 0x909   : > { %v2027_v14 = vadd.f32 1e-05, %v2025_v13 }
 0x90a   : > { %v2024_v15 = vpop.xlane.xlu0 %2023 }
 0x90b   : > { %3789 = vrsqrt.f32 %v2027_v14  ;;  %v2026_v16 = vmul.f32 0.0078125, %v2024_v15 }
 0x90d   : > { %v2028_v17 = vadd.f32 1e-05, %v2026_v16 }
 0x90f   : > { %3791 = vrsqrt.f32 %v2028_v17 }
 0x915   : > { %v3790_v18 = vpop.eup %3789 }
 0x916   : > { %v2031_v19 = vmul.f32 %v3790_v18, %v4724_v47  ;;  %v3737_v47 = vld [vmem:[%s4459_s8 + $0x60] sm:$0xff]  }
 0x918   : > { %v2039_v23 = vmul.f32 %v3205_v20, %v2031_v19 }
 0x919   : > { %v3792_v21 = vpop.eup %3791 }
 0x91a   : > { %v2032_v22 = vmul.f32 %v3792_v21, %v4727_v49  ;;  %v2047_v26 = vadd.f32 %v3206_v24, %v2039_v23  ;;  %v3739_v49 = vld [vmem:[%s4459_s8 + $0x20] sm:$0xff]  }
 0x91c   : > { %v2040_v25 = vmul.f32 %v3205_v20, %v2032_v22 }
 0x91e   : > { %v2048_v27 = vadd.f32 %v3206_v24, %v2040_v25 }
 0x920   : > { %v2049_v28 = vpack.c.bf16 %v2048_v27, %v2047_v26 }
 0x922   : > { %2297 = vmatmul.mubr.bf16.vlgmr.msra.gmra.mrb[44].mxu1 %v2049_v28  ;;  %2340 = vmatmul.mubr.bf16.vlgmr.msra.gmra.mrb[32].mxu0 %v2049_v28 }
 0x923   : > { %3331 = vmatpush3.bf16.msra.mxu1 %v3723_v33  ;;  %3353 = vmatpush3.bf16.msra.mxu0 %v3724_v34 }
 0x924   : > { %3332 = vmatprep.subr.bf16.mxu1 %v3725_v32  ;;  %3354 = vmatprep.subr.bf16.mxu0 %v3726_v36 }
 0x927   : > { %3333 = vmatpush3.bf16.msra.mxu1 %v3727_v37  ;;  %3355 = vmatpush3.bf16.msra.mxu0 %v3728_v38 }
 0x928   : > { %3334 = vmatprep.subr.bf16.mxu1 %v3729_v39  ;;  %3356 = vmatprep.subr.bf16.mxu0 %v3730_v40 }
 0x92b   : > { %3335 = vmatpush3.bf16.msra.mxu1 %v3731_v41  ;;  %3357 = vmatpush3.bf16.msra.mxu0 %v3732_v42 }
 0x92c   : > { %3336 = vmatprep.subr.bf16.mxu1 %v3733_v43  ;;  %3358 = vmatprep.subr.bf16.mxu0 %v3734_v44 }
 0x92f   : > { %3337 = vmatpush3.bf16.msra.mxu1 %v3735_v45  ;;  %3359 = vmatpush3.bf16.msra.mxu0 %v3736_v46 }
 0x930   : > { %3338 = vmatprep.subr.bf16.mxu1 %v3737_v47  ;;  %3360 = vmatprep.subr.bf16.mxu0 %v3738_v48 }
 0x933   : > { %3339 = vmatpush3.bf16.msra.mxu1 %v3739_v49  ;;  %3361 = vmatpush3.bf16.msra.mxu0 %v3740_v62 }
 0x934   : > { %3340 = vmatprep.subr.bf16.mxu1 %v3741_v50  ;;  %3362 = vmatprep.subr.bf16.mxu0 %v3742_v51 }
 0x937   : > { %3341 = vmatpush3.bf16.msra.mxu1 %v3743_v52  ;;  %3363 = vmatpush3.bf16.msra.mxu0 %v3744_v53 }
 0x938   : > { %3342 = vmatprep.subr.bf16.mxu1 %v3745_v54  ;;  %3364 = vmatprep.subr.bf16.mxu0 %v3746_v55 }
 0x93b   : > { %3343 = vmatpush3.bf16.msra.mxu1 %v3747_v56  ;;  %3365 = vmatpush3.bf16.msra.mxu0 %v3748_v57 }
 0x93c   : > { %3344 = vmatprep.subr.bf16.mxu1 %v3749_v58  ;;  %3366 = vmatprep.subr.bf16.mxu0 %v3750_v59 }
 0x93f   : > { %3345 = vmatpush3.bf16.msra.mxu1 %v3751_v60  ;;  %3367 = vmatpush3.bf16.msra.mxu0 %v3752_v61 }
 0x9f5   : > { %v2298_v11 = vpop.f32.mrb[44].mxu1  ;;  %v2341_v12 = vpop.f32.mrb[32].mxu0 }
 0x9f6   : > { %v2299_v6 = vadd.f32 %v2298_v11, %v2087_v7  ;;  %v2342_v13 = vadd.f32 %v2341_v12, %v2095_v8  ;;  %v2300_v14 = vpop.f32.mrb[45].mxu1  ;;  %v2343_v15 = vpop.f32.mrb[33].mxu0 }
 0x9f7   : > { %v4802_v16 = vadd.f32 %v2300_v14, %v2091_v9  ;;  %v4804_v17 = vadd.f32 %v2343_v15, %v2099_v10  ;;  %v2302_v18 = vpop.f32.mrb[46].mxu1  ;;  %v2345_v19 = vpop.f32.mrb[34].mxu0 }
 0x9f8   : > { %v4806_v20 = vmul.f32 0.70710677, %v2299_v6  ;;  %v4808_v21 = vmul.f32 0.70710677, %v2342_v13  ;;  %v2304_v27 = vpop.f32.mrb[47].mxu1  ;;  %v2347_v33 = vpop.f32.mrb[35].mxu0  ;;  %v4820_v38 = vadd.f32 %v2302_v18, %v2087_v7  ;;  %v4825_v41 = vadd.f32 %v2345_v19, %v2095_v8 }
 0x9f9   : > { %v4811_v22 = vmul.f32 0.70710677, %v4802_v16  ;;  %v4817_v26 = vmul.f32 0.70710677, %v4804_v17  ;;  %v4827_v43 = vadd.f32 %v2304_v27, %v2091_v9  ;;  %v4837_v52 = vadd.f32 %v2347_v33, %v2099_v10 }
 0x9fa   : > { %v2382_v23 = vand.u32 2147483647, %v4806_v20  ;;  %v2384_v24 = vand.u32 2147483647, %v4808_v21  ;;  %v4823_v40 = vmul.f32 0.70710677, %v4820_v38 }
 0x9fb   : > { %v2383_v25 = vand.u32 2147483647, %v4811_v22  ;;  %v2385_v36 = vand.u32 2147483647, %v4817_v26  ;;  %v4831_v46 = vmul.f32 0.70710677, %v4825_v41 }
 0x9fc   : > { %v2390_v28 = vmul.f32 0.3275911, %v2382_v23  ;;  %v2392_v29 = vmul.f32 0.3275911, %v2384_v24  ;;  %v2386_v44 = vand.u32 2147483647, %v4823_v40 }
 0x9fd   : > { %v2391_v30 = vmul.f32 0.3275911, %v2383_v25  ;;  %v2393_v39 = vmul.f32 0.3275911, %v2385_v36  ;;  %v2486_v45 = vsub.f32 0.0, %v2382_v23  ;;  %v2488_v47 = vsub.f32 0.0, %v2384_v24 }
 0x9fe   : > { %v2398_v34 = vadd.f32 1.0, %v2390_v28  ;;  %v2400_v32 = vadd.f32 1.0, %v2392_v29  ;;  %v2394_v48 = vmul.f32 0.3275911, %v2386_v44  ;;  %v2487_v49 = vsub.f32 0.0, %v2383_v25 }
 0x9ff   : > { %v2399_v37 = vadd.f32 1.0, %v2391_v30  ;;  %v2401_v42 = vadd.f32 1.0, %v2393_v39  ;;  %v2388_v62 = vand.u32 2147483647, %v4831_v46  ;;  %v4835_v50 = vmul.f32 0.70710677, %v4827_v43 }
 0xa00   : > { %3793 = vrcp.f32 %v2398_v34  ;;  %v2402_v51 = vadd.f32 1.0, %v2394_v48  ;;  %v2494_v53 = vmul.f32 %v2486_v45, %v2382_v23  ;;  %v2496_v57 = vmul.f32 %v2488_v47, %v2384_v24 }
 0xa01   : > { %3795 = vrcp.f32 %v2400_v32  ;;  %v2396_v54 = vmul.f32 0.3275911, %v2388_v62  ;;  %v4840_v55 = vand.u32 2147483647, %v4835_v50  ;;  %v2489_v58 = vsub.f32 0.0, %v2385_v36 }
 0xa02   : > { %3797 = vrcp.f32 %v2399_v37  ;;  %v2495_v61 = vmul.f32 %v2487_v49, %v2383_v25  ;;  %v4848_v1 = vmul.f32 0.5, %v2299_v6  ;;  %v4850_v2 = vmul.f32 0.5, %v2342_v13 }
 0xa03   : > { %3799 = vrcp.f32 %v2401_v42  ;;  %v2404_v63 = vadd.f32 1.0, %v2396_v54  ;;  %v2395_v0 = vmul.f32 0.3275911, %v4840_v55  ;;  %v4854_v4 = vmul.f32 0.70710677, %v4837_v52 }
 0xa04   : > { %3801 = vrcp.f32 %v2402_v51  ;;  %v2502_v7 = vmul.f32 1.442695, %v2494_v53  ;;  %v2506_v11 = vmul.f32 1.442695, %v2496_v57  ;;  %v2497_v12 = vmul.f32 %v2489_v58, %v2385_v36 }
 0xa05   : > { %3803 = vrcp.f32 %v2404_v63  ;;  %v2403_v8 = vadd.f32 1.0, %v2395_v0  ;;  %v4859_v14 = vand.u32 2147483647, %v4854_v4  ;;  %v2504_v15 = vmul.f32 1.442695, %v2495_v61 }
 0xa06   : > { %v2490_v18 = vsub.f32 0.0, %v2386_v44  ;;  %v2492_v24 = vsub.f32 0.0, %v2388_v62  ;;  %v2508_v33 = vmul.f32 1.442695, %v2497_v12  ;;  %vm2366_vm6 = vcmp.ge.f32.partialorder %v4806_v20, 0.0 }
 0xa07   : > { %3805 = vrcp.f32 %v2403_v8  ;;  %v2397_v25 = vmul.f32 0.3275911, %v4859_v14  ;;  %v2491_v57 = vsub.f32 0.0, %v4840_v55  ;;  %vm2368_vm7 = vcmp.ge.f32.partialorder %v4808_v21, 0.0 }
 0xa08   : > { %3807 = vpow2.f32 %v2502_v7  ;;  %v2498_v45 = vmul.f32 %v2490_v18, %v2386_v44  ;;  %v2500_v47 = vmul.f32 %v2492_v24, %v2388_v62  ;;  %v2493_v18 = vsub.f32 0.0, %v4859_v14 }
 0xa09   : > { %3809 = vpow2.f32 %v2506_v11  ;;  %v2405_v34 = vadd.f32 1.0, %v2397_v25  ;;  %vm2367_vm8 = vcmp.ge.f32.partialorder %v4811_v22, 0.0  ;;  %vm2370_vm9 = vcmp.ge.f32.partialorder %v4823_v40, 0.0 }
 0xa0a   : > { %v4842_v56 = vpop.eup %3793  ;;  %3811 = vpow2.f32 %v2504_v15  ;;  %v2510_v0 = vmul.f32 1.442695, %v2498_v45  ;;  %v2499_v15 = vmul.f32 %v2491_v57, %v4840_v55  ;;  %vm2372_vm10 = vcmp.ge.f32.partialorder %v4831_v46, 0.0 }
 0xa0b   : > { %v4844_v59 = vpop.eup %3795  ;;  %v2414_v60 = vmul.f32 1.0614054, %v4842_v56  ;;  %3813 = vrcp.f32 %v2405_v34  ;;  %vm2369_vm11 = vcmp.ge.f32.partialorder %v4817_v26, 0.0  ;;  %vm2371_vm12 = vcmp.ge.f32.partialorder %v4835_v50, 0.0 }
 0xa0c   : > { %v2416_v3 = vmul.f32 1.0614054, %v4844_v59  ;;  %v4856_v9 = vpop.eup %3797  ;;  %3815 = vpow2.f32 %v2508_v33  ;;  %vm2373_vm13 = vcmp.ge.f32.partialorder %v4854_v4, 0.0  ;;  %v2353_v4 = vmul.f32 0.5, %v4804_v17 }
 0xa0d   : > { %v2422_v5 = vadd.f32 -1.4531521, %v2414_v60  ;;  %v2415_v13 = vmul.f32 1.0614054, %v4856_v9  ;;  %v4863_v19 = vpop.eup %3799  ;;  %3817 = vpow2.f32 %v2510_v0 }
 0xa0e   : > { %v2424_v10 = vadd.f32 -1.4531521, %v2416_v3  ;;  %v2417_v29 = vmul.f32 1.0614054, %v4863_v19  ;;  %v4870_v39 = vpop.eup %3801 }
 0xa0f   : > { %v2430_v6 = vmul.f32 %v4842_v56, %v2422_v5  ;;  %v2423_v28 = vadd.f32 -1.4531521, %v2415_v13  ;;  %v2418_v53 = vmul.f32 1.0614054, %v4870_v39  ;;  %v4877_v58 = vpop.eup %3803  ;;  %v2514_v5 = vmul.f32 1.442695, %v2500_v47 }
 0xa10   : > { %v2432_v23 = vmul.f32 %v4844_v59, %v2424_v10  ;;  %v2425_v37 = vadd.f32 -1.4531521, %v2417_v29  ;;  %v2420_v3 = vmul.f32 1.0614054, %v4877_v58 }
 0xa11   : > { %v2438_v27 = vadd.f32 1.4214138, %v2430_v6  ;;  %v2431_v36 = vmul.f32 %v4856_v9, %v2423_v28  ;;  %v2426_v61 = vadd.f32 -1.4531521, %v2418_v53  ;;  %v4885_v12 = vpop.eup %3805  ;;  %3819 = vpow2.f32 %v2514_v5 }
 0xa12   : > { %v2440_v30 = vadd.f32 1.4214138, %v2432_v23  ;;  %v2433_v51 = vmul.f32 %v4863_v19, %v2425_v37  ;;  %v2428_v13 = vadd.f32 -1.4531521, %v2420_v3  ;;  %v3808_v23 = vpop.eup %3807  ;;  %v2419_v33 = vmul.f32 1.0614054, %v4885_v12 }
 0xa13   : > { %v2446_v32 = vmul.f32 %v4842_v56, %v2438_v27  ;;  %v2439_v49 = vadd.f32 1.4214138, %v2431_v36  ;;  %v2434_v11 = vmul.f32 %v4870_v39, %v2426_v61  ;;  %v3810_v29 = vpop.eup %3809  ;;  %v2512_v53 = vmul.f32 1.442695, %v2499_v15 }
 0xa14   : > { %v2448_v42 = vmul.f32 %v4844_v59, %v2440_v30  ;;  %v2441_v62 = vadd.f32 1.4214138, %v2433_v51  ;;  %v2436_v30 = vmul.f32 %v4877_v58, %v2428_v13  ;;  %v3812_v34 = vpop.eup %3811 }
 0xa15   : > { %v2454_v48 = vadd.f32 -0.28449672, %v2446_v32  ;;  %v2447_v44 = vmul.f32 %v4856_v9, %v2439_v49  ;;  %v2442_v28 = vadd.f32 1.4214138, %v2434_v11  ;;  %v4897_v37 = vpop.eup %3813  ;;  %3821 = vpow2.f32 %v2512_v53 }
 0xa16   : > { %v2456_v54 = vadd.f32 -0.28449672, %v2448_v42  ;;  %v2449_v10 = vmul.f32 %v4863_v19, %v2441_v62  ;;  %v4084_v42 = vmov -1.0   ;;  %v2444_v47 = vadd.f32 1.4214138, %v2436_v30 }
 0xa17   : > { %v2462_v60 = vmul.f32 %v4842_v56, %v2454_v48  ;;  %v2455_v8 = vadd.f32 -0.28449672, %v2447_v44  ;;  %v2374_v45 = vsel %vm2366_vm6, 1.0, %v4084_v42  ;;  %v2427_v48 = vadd.f32 -1.4531521, %v2419_v33 }
 0xa18   : > { %v2464_v63 = vmul.f32 %v4844_v59, %v2456_v54  ;;  %v2457_v27 = vadd.f32 -0.28449672, %v2449_v10  ;;  %v3816_v54 = vpop.eup %3815  ;;  %v2376_v57 = vsel %vm2368_vm7, 1.0, %v4084_v42  ;;  %v2421_v20 = vmul.f32 1.0614054, %v4897_v37 }
 0xa19   : > { %v2470_v7 = vadd.f32 0.2548296, %v2462_v60  ;;  %v2463_v25 = vmul.f32 %v4856_v9, %v2455_v8  ;;  %v2452_v60 = vmul.f32 %v4877_v58, %v2444_v47  ;;  %v2435_v44 = vmul.f32 %v4885_v12, %v2427_v48 }
 0xa1a   : > { %v2472_v6 = vadd.f32 0.2548296, %v2464_v63  ;;  %v2465_v36 = vmul.f32 %v4863_v19, %v2457_v27  ;;  %v2375_v22 = vsel %vm2367_vm8, 1.0, %v4084_v42  ;;  %v2378_v33 = vsel %vm2370_vm9, 1.0, %v4084_v42 }
 0xa1b   : > { %v2478_v24 = vmul.f32 %v4842_v56, %v2470_v7  ;;  %v2471_v32 = vadd.f32 0.2548296, %v2463_v25  ;;  %v2450_v56 = vmul.f32 %v4870_v39, %v2442_v28  ;;  %v2460_v3 = vadd.f32 -0.28449672, %v2452_v60 }
 0xa1c   : > { %v2480_v55 = vmul.f32 %v4844_v59, %v2472_v6  ;;  %v2501_v59 = vmul.f32 %v2493_v18, %v4859_v14  ;;  %v2473_v63 = vadd.f32 0.2548296, %v2465_v36  ;;  %v2443_v5 = vadd.f32 1.4214138, %v2435_v44  ;;  %v3818_v18 = vpop.eup %3817 }
 0xa1d   : > { %v2518_v49 = vmul.f32 %v3808_v23, %v2478_v24  ;;  %v2458_v51 = vadd.f32 -0.28449672, %v2450_v56  ;;  %v2479_v61 = vmul.f32 %v4856_v9, %v2471_v32  ;;  %v2429_v14 = vadd.f32 -1.4531521, %v2421_v20  ;;  %v3820_v30 = vpop.eup %3819 }
 0xa1e   : > { %v2520_v62 = vmul.f32 %v3810_v29, %v2480_v55  ;;  %v2516_v21 = vmul.f32 1.442695, %v2501_v59  ;;  %v2468_v10 = vmul.f32 %v4877_v58, %v2460_v3  ;;  %v2451_v11 = vmul.f32 %v4885_v12, %v2443_v5 }
 0xa1f   : > { %v2466_v0 = vmul.f32 %v4870_v39, %v2458_v51  ;;  %v2526_v7 = vsub.f32 1.0, %v2518_v49  ;;  %v2437_v6 = vmul.f32 %v4897_v37, %v2429_v14  ;;  %v2519_v9 = vmul.f32 %v3812_v34, %v2479_v61  ;;  %v3822_v60 = vpop.eup %3821 }
 0xa20   : > { %v2528_v13 = vsub.f32 1.0, %v2520_v62  ;;  %v2481_v23 = vmul.f32 %v4863_v19, %v2473_v63  ;;  %v2476_v24 = vadd.f32 0.2548296, %v2468_v10  ;;  %v2459_v25 = vadd.f32 -0.28449672, %v2451_v11 }
 0xa21   : > { %v2474_v8 = vadd.f32 0.2548296, %v2466_v0  ;;  %v2445_v27 = vadd.f32 1.4214138, %v2437_v6  ;;  %v2534_v28 = vmul.f32 %v2526_v7, %v2374_v45  ;;  %3823 = vpow2.f32 %v2516_v21 }
 0xa22   : > { %v2484_v34 = vmul.f32 %v4877_v58, %v2476_v24  ;;  %v2467_v40 = vmul.f32 %v4885_v12, %v2459_v25  ;;  %v2536_v55 = vmul.f32 %v2528_v13, %v2376_v57  ;;  %v2527_v32 = vsub.f32 1.0, %v2519_v9 }
 0xa23   : > { %v2482_v15 = vmul.f32 %v4870_v39, %v2474_v8  ;;  %v2453_v39 = vmul.f32 %v4897_v37, %v2445_v27  ;;  %v2521_v36 = vmul.f32 %v3816_v54, %v2481_v23  ;;  %v2542_v48 = vadd.f32 1.0, %v2534_v28 }
 0xa24   : > { %v2524_v56 = vmul.f32 %v3820_v30, %v2484_v34  ;;  %v2475_v45 = vadd.f32 0.2548296, %v2467_v40  ;;  %v2354_v49 = vmul.f32 0.5, %v4820_v38  ;;  %v2380_v58 = vsel %vm2372_vm10, 1.0, %v4084_v42 }
 0xa25   : > { %v2522_v29 = vmul.f32 %v3818_v18, %v2482_v15  ;;  %v2461_v47 = vadd.f32 -0.28449672, %v2453_v39  ;;  %v2544_v44 = vadd.f32 1.0, %v2536_v55  ;;  %v2535_v46 = vmul.f32 %v2527_v32, %v2375_v22 }
 0xa26   : > { %v2532_v53 = vsub.f32 1.0, %v2524_v56  ;;  %v2483_v59 = vmul.f32 %v4885_v12, %v2475_v45  ;;  %v2529_v20 = vsub.f32 1.0, %v2521_v36  ;;  %v2550_v38 = vmul.f32 %v2542_v48, %v4848_v1 }
 0xa27   : > { %v2530_v19 = vsub.f32 1.0, %v2522_v29  ;;  %v2469_v57 = vmul.f32 %v4897_v37, %v2461_v47  ;;  %v2377_v0 = vsel %vm2369_vm11, 1.0, %v4084_v42  ;;  %v2356_v12 = vmul.f32 0.5, %v4825_v41 }
 0xa28   : > { %v2540_v62 = vmul.f32 %v2532_v53, %v2380_v58  ;;  %v2523_v61 = vmul.f32 %v3822_v60, %v2483_v59  ;;  %v2379_v14 = vsel %vm2371_vm12, 1.0, %v4084_v42  ;;  %v2552_v21 = vmul.f32 %v2544_v44, %v4850_v2 }
 0xa29   : > { %v2538_v51 = vmul.f32 %v2530_v19, %v2378_v33  ;;  %v2477_v63 = vadd.f32 0.2548296, %v2469_v57  ;;  %v2543_v10 = vadd.f32 1.0, %v2535_v46  ;;  %v2537_v1 = vmul.f32 %v2529_v20, %v2377_v0 }
 0xa2a   : > { %v2548_v5 = vadd.f32 1.0, %v2540_v62  ;;  %v2531_v7 = vsub.f32 1.0, %v2523_v61  ;;  %v2351_v9 = vmul.f32 0.5, %v4802_v16  ;;  %v2355_v15 = vmul.f32 0.5, %v4827_v43 }
 0xa2b   : > { %v2546_v54 = vadd.f32 1.0, %v2538_v51  ;;  %v2485_v8 = vmul.f32 %v4897_v37, %v2477_v63  ;;  %v3824_v50 = vpop.eup %3823  ;;  %v2381_v37 = vsel %vm2373_vm13, 1.0, %v4084_v42  ;;  %v2545_v2 = vadd.f32 1.0, %v2537_v1  ;;  %v3239_v42 = vld [vmem:[%s675_s10] ss:$0 sm:$0xff] }
 0xa2c   : > { %v2556_v6 = vmul.f32 %v2548_v5, %v2356_v12  ;;  %v2539_v26 = vmul.f32 %v2531_v7, %v2379_v14  ;;  %v2551_v24 = vmul.f32 %v2543_v10, %v2351_v9  ;;  %v2357_v28 = vmul.f32 0.5, %v4837_v52 }
 0xa2d   : > { %v2554_v3 = vmul.f32 %v2546_v54, %v2354_v49  ;;  %v2525_v13 = vmul.f32 %v3824_v50, %v2485_v8  ;;  %v2553_v30 = vmul.f32 %v2545_v2, %v2353_v4 }
 0xa2e   : > { %v2560_v41 = vpack.c.bf16 %v2556_v6, %v2552_v21  ;;  %v2547_v18 = vadd.f32 1.0, %v2539_v26 }
 0xa2f   : > { %v2558_v11 = vpack.c.bf16 %v2554_v3, %v2550_v38  ;;  %v2533_v23 = vsub.f32 1.0, %v2525_v13 }
 0xa30   : > { %v2555_v25 = vmul.f32 %v2547_v18, %v2355_v15 }
 0xa31   : > { %v2541_v27 = vmul.f32 %v2533_v23, %v2381_v37 }
 0xa32   : > { %v2559_v29 = vpack.c.bf16 %v2555_v25, %v2551_v24 }
 0xa33   : > { %v2549_v22 = vadd.f32 1.0, %v2541_v27 }
 0xa34   : > { %2857 = vmatprep.mubr.bf16.mxu1 %v2559_v29 }
 0xa35   : > { %v2557_v16 = vmul.f32 %v2549_v22, %v2357_v28  ;;  %2858 = vmatmul.mubr.bf16.vlgmr.msra.gmra.mrb[48].mxu1 %v2558_v11 }
 0xa37   : > { %v2561_v43 = vpack.c.bf16 %v2557_v16, %v2553_v30 }
 0xa39   : > { %2898 = vmatprep.mubr.bf16.mxu0 %v2561_v43 }
 0xa3a   : > { %2899 = vmatmul.mubr.bf16.vlgmr.msra.gmra.mrb[36].mxu0 %v2560_v41 }
 0xb08   : > { %v3346_v33 = vpop.f32.mrb[48].mxu1 }
 0xb09   : > { %v3347_v34 = vpop.f32.mrb[49].mxu1 }
 0xb0a   : > { %v3348_v40 = vadd.f32 %v3347_v34, %v3346_v33  ;;  %v3349_v17 = vpop.f32.mrb[50].mxu1 }
 0xb0b   : > { %v3350_v39 = vpop.f32.mrb[51].mxu1 }
 0xb0c   : > { %v2860_v55 = vadd.f32 %v3348_v40, %v3239_v42  ;;  %v3351_v32 = vadd.f32 %v3350_v39, %v3349_v17 }
 0xb0d   : > { %v3368_v52 = vpop.f32.mrb[36].mxu0 }
 0xb0e   : > { %v3369_v19 = vpop.f32.mrb[37].mxu0  ;;  %v2863_v45 = vadd.f32 %v3351_v32, %v3239_v42 }
 0xb0f   : > { %v3370_v36 = vadd.f32 %v3369_v19, %v3368_v52  ;;  %v3371_v56 = vpop.f32.mrb[38].mxu0 }
 0xb10   : > { %v3372_v47 = vpop.f32.mrb[39].mxu0 }
 0xb11   : > { %v2901_v48 = vadd.f32 %v3370_v36, %v2860_v55  ;;  %v3373_v49 = vadd.f32 %v3372_v47, %v3371_v56  ;;  %2914 = sbr.rel (%p3272_p11) target bundleno = 2840 (0xb18), region = 96 }
 0xb13   : > { %v2907_v51 = vadd.f32 %v2901_v48, %v4709_v31  ;;  %v2904_v58 = vadd.f32 %v3373_v49, %v2863_v45 }
 0xb15   : > { %2909 = vst [vmem:[#allocation2] sm:$0xff] %v2907_v51  ;;  %v2908_v53 = vadd.f32 %v2904_v58, %v4711_v35  ;;  %2915 = vst [vmem:[#allocation12] sm:$0xff] (!%p3272_p11), %v2907_v51 }
 0xb17   : > { %2910 = vst [vmem:[#allocation2 + $0x8] sm:$0xff] %v2908_v53  ;;  %2916 = vst [vmem:[#allocation12 + $0x8] sm:$0xff] (!%p3272_p11), %v2908_v53 }
 0xb18 PF: > { %p3549_p10 = scmp.eq.s32.totalorder %s4296_s15, 1  ;;  %s4085_s10 = smov [#allocation12]  }
 0xb19   : > { %s2926_s21 = sshll.u32 %s4085_s10, 4  ;;  %s2927_s21 = int_to_ptr.vmem [resolvable:$true] %s2926_s21 }
 0xb1a   : > { %s3975_s28 = scalar_lea.vmem %s2927_s21, 256  ;;  %p3982_p9 = scmp.lt.s32.totalorder %s2927_s21, %s2927_s21 }
 0xb1b   : > { %p3976_p7 = scmp.ne.s32.totalorder %s2927_s21, %s3975_s28  ;;  %p3983_p2 = scmp.lt.s32.totalorder %s3975_s28, %s3975_s28 }
 0xb1d   : > { %p3977_p8 = pnand %p3976_p7, %p3549_p10  ;;  %p3984_p0 = por %p3983_p2, %p3982_p9 }
 0xb1f   : > { %p3978_p3 = pneg %p3977_p8 }
 0xb21   : > { %p3985_p13 = pnand %p3984_p0, %p3978_p3 }
 0xb23   : > { %3988 = shalt.err (!%p3985_p13)
}
 0xb24   : > { %s5060_s8 = sld [smem:[#allocation31_spill]] }
 0xb2a   : > { %s3989_s0 = scalar_lea.hbm %s5060_s8, 256 }
 0xb2b   : > { %p3990_p1 = scmp.ne.s32.totalorder %s5060_s8, %s3989_s0  ;;  %p3995_p6 = scmp.lt.u32.totalorder %s3989_s0, %s5060_s8 }
 0xb2d   : > { %p3991_p12 = pnand %p3990_p1, %p3549_p10 }
 0xb2f   : > { %p3992_p4 = pneg %p3991_p12 }
 0xb31   : > { %p3997_p5 = pnand %p3995_p6, %p3992_p4 }
 0xb33   : > { %4000 = shalt.err (!%p3997_p5)
}
 0xb34   : > { %s4086_s26 = smov 128   ;;  %s4087_s11 = smov 8  }
 0xb35   : > { %3526 = dma.vmem_to_hbm [thread:$0]  (%p3549_p10), %s2927_s21, 256, %s5060_s8, [#allocation5], %s4086_s26, %s4086_s26, %s4087_s11  }
 0xb36   : > { %4038 = dma.done.wait (%p3549_p10), [#allocation5], 256  }
 0xb37   : > { %4040 = vsyncadd (%p3549_p10), [#allocation5], 4294967040 }
 0xb38 PF: > { %s5061_s19 = sld [smem:[#allocation19_spill]]  ;;  %s5062_s16 = sld [smem:[#allocation17_spill]] }
 0xb39   : > { %s5063_s23 = sld [smem:[#allocation21_spill]]  ;;  %s5064_s24 = sld [smem:[#allocation18_spill]] }
 0xb3a   : > { %s5065_s25 = sld [smem:[#allocation20_spill]]  ;;  %s5066_s21 = smov %s4047_s22 }
 0xb3e   : > { %s30_s26 = sadd.s32 1, %s5061_s19   ;;  %s5067_s22 = smov %s5062_s16 }
 0xb3f   : > { %p27_p11 = scmp.ge.s32.totalorder %s30_s26, 4  }
 0xb41   :  { %29 = sbr.rel (!%p27_p11) target bundleno = 19 (0x13), region = 176 }
 0xb48   :  { %2942 = vsyncpa [#allocation4], 1 }
 0xb49   :  { %2944 = vsyncpa [#allocation4 + $0x1], 1 }
 0xb4a   :  { %2945 = vsyncpa [#allocation7], 1 }
 0xb4b   :  { %2947 = vsyncpa [#allocation7 + $0x1], 1 }
 0xb4c   :  { %2948 = vsyncpa [#allocation10], 1 }
 0xb4d   :  { %2950 = vsyncpa [#allocation10 + $0x1], 1 }
 0xb4e   :  { %2951 = vsyncpa [#allocation5], 1 }
 0xb4f   :  { %2953 = vsyncpa [#allocation5 + $0x1], 1 }

</bundles_post_ra>
